<compile_context>
chip_gen: v6e
topology: v6e:2x2x1
jax: 0.10.0
libtpu: 0.0.40
codegen_flags: <defaults>
</compile_context>

<pallas_src>
import functools

import jax
import jax.numpy as jnp
from jax import lax
from jax.experimental import pallas as pl
from jax.experimental.pallas import tpu as pltpu

_EPS = 1e-5

# (in_dim, out_dim, stride) for the five ConvolutionBlocks. Strides are static
# Python ints (never traced).
_BLOCK_CFG = [
    (1, 32, 1),
    (32, 64, 2),
    (64, 128, 2),
    (128, 256, 2),
    (256, 256, 1),
]


# ----------------------------------------------------------------------------
# Pallas kernel: (im2col matmul) + InstanceNorm + ReLU for the whole batch.
# ----------------------------------------------------------------------------
def _conv_in_relu_kernel(p_ref, w_ref, o_ref, *, n_samples, p_rows):
    # p_ref: (N*P, K) bf16   im2col patches, samples stacked along rows
    # w_ref: (K, C)   bf16   flattened conv weight
    # o_ref: (N*P, C) f32    InstanceNorm'd + ReLU'd conv output
    y = jnp.dot(p_ref[...], w_ref[...], preferred_element_type=jnp.float32)

    np_rows = n_samples * p_rows

    # Block-diagonal selector: sel[s, r] = 1.0 iff row r belongs to sample s.
    # Built from 2-D iotas + comparisons only (no integer division, no transpose).
    row_idx = lax.broadcasted_iota(jnp.int32, (n_samples, np_rows), 1)
    start = lax.broadcasted_iota(jnp.int32, (n_samples, np_rows), 0) * p_rows
    sel = ((row_idx >= start) & (row_idx < start + p_rows)).astype(jnp.float32)

    # Transposed selector, built directly (avoids an in-kernel transpose).
    row_idx_t = lax.broadcasted_iota(jnp.int32, (np_rows, n_samples), 0)
    start_t = lax.broadcasted_iota(jnp.int32, (np_rows, n_samples), 1) * p_rows
    sel_t = ((row_idx_t >= start_t) & (row_idx_t < start_t + p_rows)).astype(
        jnp.float32)

    # One-pass per-(sample, channel) statistics.
    inv_p = 1.0 / p_rows
    s1 = jnp.dot(sel, y, preferred_element_type=jnp.float32)      # (N, C) sum
    s2 = jnp.dot(sel, y * y, preferred_element_type=jnp.float32)  # (N, C) sum sq
    mean = s1 * inv_p
    var = jnp.maximum(s2 * inv_p - mean * mean, 0.0)               # biased var
    rstd = lax.rsqrt(var + _EPS)

    # Broadcast the per-sample stats back to rows, normalize, ReLU.
    mean_rows = jnp.dot(sel_t, mean, preferred_element_type=jnp.float32)  # (N*P, C)
    rstd_rows = jnp.dot(sel_t, rstd, preferred_element_type=jnp.float32)  # (N*P, C)
    o_ref[...] = jnp.maximum((y - mean_rows) * rstd_rows, 0.0).astype(o_ref.dtype)


def _conv_block_pallas(patches, w_flat, n_samples, p_rows):
    """patches: (N*P, K) bf16; w_flat: (K, C) bf16 -> (N*P, C) f32."""
    np_rows, k = patches.shape
    c = w_flat.shape[1]
    kernel = functools.partial(
        _conv_in_relu_kernel, n_samples=n_samples, p_rows=p_rows)
    return pl.pallas_call(
        kernel,
        out_shape=jax.ShapeDtypeStruct((np_rows, c), jnp.float32),
        grid=(1,),
        in_specs=[
            pl.BlockSpec((np_rows, k), lambda i: (0, 0)),
            pl.BlockSpec((k, c), lambda i: (0, 0)),
        ],
        out_specs=pl.BlockSpec((np_rows, c), lambda i: (0, 0)),
        compiler_params=pltpu.CompilerParams(
            dimension_semantics=("arbitrary",),
            vmem_limit_bytes=64 * 1024 * 1024,
        ),
    )(patches, w_flat)


# ----------------------------------------------------------------------------
# Glue: im2col patch extraction (pad=1, kernel=3, static stride) in plain JAX.
# ----------------------------------------------------------------------------
def _im2col(x_nhwc, stride):
    """x_nhwc: (N, H, W, Cin) -> patches (N, Ho*Wo, 9*Cin), plus (Ho, Wo)."""
    assert isinstance(stride, int)
    n, h, w, cin = x_nhwc.shape
    xp = jnp.pad(x_nhwc, ((0, 0), (1, 1), (1, 1), (0, 0)))
    ho = (h + 2 - 3) // stride + 1
    wo = (w + 2 - 3) // stride + 1
    taps = []
    for kh in range(3):
        for kw in range(3):
            sl = xp[:, kh:kh + stride * (ho - 1) + 1:stride,
                       kw:kw + stride * (wo - 1) + 1:stride, :]   # (N, Ho, Wo, Cin)
            taps.append(sl)
    # patch feature order (kh, kw, Cin) matches the weight flatten order below.
    patches = jnp.stack(taps, axis=3).reshape(n, ho * wo, 9 * cin)
    return patches, ho, wo


def conv_block(x_nhwc, w, stride):
    """Conv3x3(pad=1, stride) -> InstanceNorm2d -> ReLU for the whole batch.

    x_nhwc: (N, H, W, Cin); w: (Cout, Cin, 3, 3) torch layout.
    The conv bias is intentionally not applied: with the affine-free
    InstanceNorm directly after the conv it cancels exactly.
    """
    n = x_nhwc.shape[0]
    cin = x_nhwc.shape[3]
    cout = w.shape[0]
    patches, ho, wo = _im2col(x_nhwc, stride)
    p_rows = ho * wo
    patches = patches.reshape(n * p_rows, 9 * cin).astype(jnp.bfloat16)
    # (Cout, Cin, kh, kw) -> (kh, kw, Cin, Cout) -> (9*Cin, Cout)
    w_flat = jnp.transpose(w, (2, 3, 1, 0)).reshape(9 * cin, cout)
    w_flat = w_flat.astype(jnp.bfloat16)
    out = _conv_block_pallas(patches, w_flat, n, p_rows)
    return out.reshape(n, ho, wo, cout)


# ----------------------------------------------------------------------------
# ContentEncoder parameters + forward
# ----------------------------------------------------------------------------
def init_params(key, input_channels=1):
    cfg = list(_BLOCK_CFG)
    cfg[0] = (input_channels, 32, 1)
    params = []
    for (cin, cout, _stride) in cfg:
        key, kw, kb = jax.random.split(key, 3)
        fan_in = cin * 9
        bound = float(fan_in) ** -0.5
        w = jax.random.uniform(kw, (cout, cin, 3, 3), jnp.float32, -bound, bound)
        b = jax.random.uniform(kb, (cout,), jnp.float32, -bound, bound)
        # `b` is kept for parity with the torch module but is unused: it is
        # mathematically cancelled by the following InstanceNorm(affine=False).
        params.append({"w": w, "b": b})
    return params


@jax.jit
def content_encoder_forward(x_nchw, params):
    # NCHW (torch convention) -> NHWC for the kernels.
    x = jnp.transpose(x_nchw, (0, 2, 3, 1)).astype(jnp.float32)
    for p, (_cin, _cout, stride) in zip(params, _BLOCK_CFG):
        x = conv_block(x, p["w"], stride)        # stride is a static Python int
    # back to NCHW to match the torch module's output convention.
    return jnp.transpose(x, (0, 3, 1, 2))


if __name__ == "__main__":
    key = jax.random.PRNGKey(0)
    k_x, k_p = jax.random.split(key)

    # Small shapes consistent with the module: batch=2, input_channels=1,
    # spatial 16x16 (NCHW).
    x = jax.random.normal(k_x, (2, 1, 16, 16), jnp.float32)
    params = init_params(k_p, input_channels=1)

    out = content_encoder_forward(x, params)
    out = jax.block_until_ready(out)

    # Three stride-2 blocks: spatial 16 -> 8 -> 4 -> 2; channels end at 256.
    assert out.shape == (2, 256, 2, 2), out.shape
    assert bool(jnp.all(jnp.isfinite(out)))
    print("KERNEL_OK")
</pallas_src>

<mosaic_0001>
module attributes {stable_mosaic.version = 11 : i64} {
  func.func @_conv_in_relu_kernel(%arg0: i32, %arg1: memref<512x9xbf16, #tpu.memory_space<vmem>>, %arg2: memref<9x32xbf16, #tpu.memory_space<vmem>>, %arg3: memref<512x32xf32, #tpu.memory_space<vmem>>) attributes {dimension_semantics = [#tpu.dimension_semantics<arbitrary>], iteration_bounds = array<i64: 1>, scalar_prefetch = 0 : i64, scratch_operands = 0 : i64, tpu.core_type = #tpu.core_type<tc>, window_params = [{pipeline_mode = #tpu.pipeline_mode<synchronous>, transform_indices = @transform_0, window_bounds = array<i64: 512, 9>}, {pipeline_mode = #tpu.pipeline_mode<synchronous>, transform_indices = @transform_1, window_bounds = array<i64: 9, 32>}, {pipeline_mode = #tpu.pipeline_mode<synchronous>, transform_indices = @transform_2, window_bounds = array<i64: 512, 32>}]} {
    %c0 = arith.constant 0 : index
    %c0_0 = arith.constant 0 : index
    %0 = vector.load %arg1[%c0, %c0_0] : memref<512x9xbf16, #tpu.memory_space<vmem>>, vector<512x9xbf16>
    %c0_1 = arith.constant 0 : index
    %c0_2 = arith.constant 0 : index
    %1 = vector.load %arg2[%c0_1, %c0_2] : memref<9x32xbf16, #tpu.memory_space<vmem>>, vector<9x32xbf16>
    %cst = arith.constant dense<0.000000e+00> : vector<512x32xf32>
    %2 = tpu.matmul %0, %1, %cst {dimension_numbers = #tpu.dot_dimension_numbers<[1], [0], [0], [1], [0, 0, 1, 1], [], []>} : vector<512x9xbf16>, vector<9x32xbf16>, vector<512x32xf32> -> vector<512x32xf32>
    %3 = tpu.iota {dimensions = array<i32: 1>} : vector<2x512xi32>
    %4 = tpu.iota {dimensions = array<i32: 0>} : vector<2x512xi32>
    %c256_i32 = arith.constant 256 : i32
    %5 = vector.broadcast %c256_i32 : i32 to vector<2x512xi32>
    %6 = arith.muli %4, %5 : vector<2x512xi32>
    %7 = arith.cmpi sge, %3, %6 : vector<2x512xi32>
    %c256_i32_3 = arith.constant 256 : i32
    %8 = vector.broadcast %c256_i32_3 : i32 to vector<2x512xi32>
    %9 = arith.addi %6, %8 : vector<2x512xi32>
    %10 = arith.cmpi slt, %3, %9 : vector<2x512xi32>
    %11 = arith.andi %7, %10 : vector<2x512xi1>
    %12 = arith.extui %11 : vector<2x512xi1> to vector<2x512xi32>
    %13 = arith.sitofp %12 : vector<2x512xi32> to vector<2x512xf32>
    %14 = tpu.iota {dimensions = array<i32: 0>} : vector<512x2xi32>
    %15 = tpu.iota {dimensions = array<i32: 1>} : vector<512x2xi32>
    %c256_i32_4 = arith.constant 256 : i32
    %16 = vector.broadcast %c256_i32_4 : i32 to vector<512x2xi32>
    %17 = arith.muli %15, %16 : vector<512x2xi32>
    %18 = arith.cmpi sge, %14, %17 : vector<512x2xi32>
    %c256_i32_5 = arith.constant 256 : i32
    %19 = vector.broadcast %c256_i32_5 : i32 to vector<512x2xi32>
    %20 = arith.addi %17, %19 : vector<512x2xi32>
    %21 = arith.cmpi slt, %14, %20 : vector<512x2xi32>
    %22 = arith.andi %18, %21 : vector<512x2xi1>
    %23 = arith.extui %22 : vector<512x2xi1> to vector<512x2xi32>
    %24 = arith.sitofp %23 : vector<512x2xi32> to vector<512x2xf32>
    %cst_6 = arith.constant dense<0.000000e+00> : vector<2x32xf32>
    %25 = tpu.matmul %13, %2, %cst_6 {dimension_numbers = #tpu.dot_dimension_numbers<[1], [0], [0], [1], [0, 0, 1, 1], [], []>} : vector<2x512xf32>, vector<512x32xf32>, vector<2x32xf32> -> vector<2x32xf32>
    %26 = arith.mulf %2, %2 : vector<512x32xf32>
    %cst_7 = arith.constant dense<0.000000e+00> : vector<2x32xf32>
    %27 = tpu.matmul %13, %26, %cst_7 {dimension_numbers = #tpu.dot_dimension_numbers<[1], [0], [0], [1], [0, 0, 1, 1], [], []>} : vector<2x512xf32>, vector<512x32xf32>, vector<2x32xf32> -> vector<2x32xf32>
    %cst_8 = arith.constant 3.906250e-03 : f32
    %28 = vector.broadcast %cst_8 : f32 to vector<2x32xf32>
    %29 = arith.mulf %25, %28 : vector<2x32xf32>
    %cst_9 = arith.constant 3.906250e-03 : f32
    %30 = vector.broadcast %cst_9 : f32 to vector<2x32xf32>
    %31 = arith.mulf %27, %30 : vector<2x32xf32>
    %32 = arith.mulf %29, %29 : vector<2x32xf32>
    %33 = arith.subf %31, %32 : vector<2x32xf32>
    %cst_10 = arith.constant 0.000000e+00 : f32
    %34 = vector.broadcast %cst_10 : f32 to vector<2x32xf32>
    %35 = arith.maximumf %33, %34 : vector<2x32xf32>
    %cst_11 = arith.constant 9.99999974E-6 : f32
    %36 = vector.broadcast %cst_11 : f32 to vector<2x32xf32>
    %37 = arith.addf %35, %36 : vector<2x32xf32>
    %38 = math.rsqrt %37 : vector<2x32xf32>
    %cst_12 = arith.constant dense<0.000000e+00> : vector<512x32xf32>
    %39 = tpu.matmul %24, %29, %cst_12 {dimension_numbers = #tpu.dot_dimension_numbers<[1], [0], [0], [1], [0, 0, 1, 1], [], []>} : vector<512x2xf32>, vector<2x32xf32>, vector<512x32xf32> -> vector<512x32xf32>
    %cst_13 = arith.constant dense<0.000000e+00> : vector<512x32xf32>
    %40 = tpu.matmul %24, %38, %cst_13 {dimension_numbers = #tpu.dot_dimension_numbers<[1], [0], [0], [1], [0, 0, 1, 1], [], []>} : vector<512x2xf32>, vector<2x32xf32>, vector<512x32xf32> -> vector<512x32xf32>
    %41 = arith.subf %2, %39 : vector<512x32xf32>
    %42 = arith.mulf %41, %40 : vector<512x32xf32>
    %cst_14 = arith.constant 0.000000e+00 : f32
    %43 = vector.broadcast %cst_14 : f32 to vector<512x32xf32>
    %44 = arith.maximumf %42, %43 : vector<512x32xf32>
    %c0_15 = arith.constant 0 : index
    %c0_16 = arith.constant 0 : index
    %45 = vector.load %arg3[%c0_15, %c0_16] : memref<512x32xf32, #tpu.memory_space<vmem>>, vector<512x32xf32>
    tpu.vector_store %arg3[%c0_15, %c0_16], %44 {strides = array<i32>} : memref<512x32xf32, #tpu.memory_space<vmem>>, vector<512x32xf32>,
    return
  }
  func.func @transform_0(%arg0: i32) -> (i32, i32) {
    %c0_i32 = arith.constant 0 : i32
    %c0_i32_0 = arith.constant 0 : i32
    %c0_i32_1 = arith.constant 0 : i32
    return %c0_i32, %c0_i32_0 : i32, i32
  }
  func.func @transform_1(%arg0: i32) -> (i32, i32) {
    %c0_i32 = arith.constant 0 : i32
    %c0_i32_0 = arith.constant 0 : i32
    %c0_i32_1 = arith.constant 0 : i32
    return %c0_i32, %c0_i32_0 : i32, i32
  }
  func.func @transform_2(%arg0: i32) -> (i32, i32) {
    %c0_i32 = arith.constant 0 : i32
    %c0_i32_0 = arith.constant 0 : i32
    %c0_i32_1 = arith.constant 0 : i32
    return %c0_i32, %c0_i32_0 : i32, i32
  }
}

module attributes {stable_mosaic.version = 11 : i64} {
  func.func @_conv_in_relu_kernel(%arg0: i32, %arg1: memref<128x288xbf16, #tpu.memory_space<vmem>>, %arg2: memref<288x64xbf16, #tpu.memory_space<vmem>>, %arg3: memref<128x64xf32, #tpu.memory_space<vmem>>) attributes {dimension_semantics = [#tpu.dimension_semantics<arbitrary>], iteration_bounds = array<i64: 1>, scalar_prefetch = 0 : i64, scratch_operands = 0 : i64, tpu.core_type = #tpu.core_type<tc>, window_params = [{pipeline_mode = #tpu.pipeline_mode<synchronous>, transform_indices = @transform_0, window_bounds = array<i64: 128, 288>}, {pipeline_mode = #tpu.pipeline_mode<synchronous>, transform_indices = @transform_1, window_bounds = array<i64: 288, 64>}, {pipeline_mode = #tpu.pipeline_mode<synchronous>, transform_indices = @transform_2, window_bounds = array<i64: 128, 64>}]} {
    %c0 = arith.constant 0 : index
    %c0_0 = arith.constant 0 : index
    %0 = vector.load %arg1[%c0, %c0_0] : memref<128x288xbf16, #tpu.memory_space<vmem>>, vector<128x288xbf16>
    %c0_1 = arith.constant 0 : index
    %c0_2 = arith.constant 0 : index
    %1 = vector.load %arg2[%c0_1, %c0_2] : memref<288x64xbf16, #tpu.memory_space<vmem>>, vector<288x64xbf16>
    %cst = arith.constant dense<0.000000e+00> : vector<128x64xf32>
    %2 = tpu.matmul %0, %1, %cst {dimension_numbers = #tpu.dot_dimension_numbers<[1], [0], [0], [1], [0, 0, 1, 1], [], []>} : vector<128x288xbf16>, vector<288x64xbf16>, vector<128x64xf32> -> vector<128x64xf32>
    %3 = tpu.iota {dimensions = array<i32: 1>} : vector<2x128xi32>
    %4 = tpu.iota {dimensions = array<i32: 0>} : vector<2x128xi32>
    %c64_i32 = arith.constant 64 : i32
    %5 = vector.broadcast %c64_i32 : i32 to vector<2x128xi32>
    %6 = arith.muli %4, %5 : vector<2x128xi32>
    %7 = arith.cmpi sge, %3, %6 : vector<2x128xi32>
    %c64_i32_3 = arith.constant 64 : i32
    %8 = vector.broadcast %c64_i32_3 : i32 to vector<2x128xi32>
    %9 = arith.addi %6, %8 : vector<2x128xi32>
    %10 = arith.cmpi slt, %3, %9 : vector<2x128xi32>
    %11 = arith.andi %7, %10 : vector<2x128xi1>
    %12 = arith.extui %11 : vector<2x128xi1> to vector<2x128xi32>
    %13 = arith.sitofp %12 : vector<2x128xi32> to vector<2x128xf32>
    %14 = tpu.iota {dimensions = array<i32: 0>} : vector<128x2xi32>
    %15 = tpu.iota {dimensions = array<i32: 1>} : vector<128x2xi32>
    %c64_i32_4 = arith.constant 64 : i32
    %16 = vector.broadcast %c64_i32_4 : i32 to vector<128x2xi32>
    %17 = arith.muli %15, %16 : vector<128x2xi32>
    %18 = arith.cmpi sge, %14, %17 : vector<128x2xi32>
    %c64_i32_5 = arith.constant 64 : i32
    %19 = vector.broadcast %c64_i32_5 : i32 to vector<128x2xi32>
    %20 = arith.addi %17, %19 : vector<128x2xi32>
    %21 = arith.cmpi slt, %14, %20 : vector<128x2xi32>
    %22 = arith.andi %18, %21 : vector<128x2xi1>
    %23 = arith.extui %22 : vector<128x2xi1> to vector<128x2xi32>
    %24 = arith.sitofp %23 : vector<128x2xi32> to vector<128x2xf32>
    %cst_6 = arith.constant dense<0.000000e+00> : vector<2x64xf32>
    %25 = tpu.matmul %13, %2, %cst_6 {dimension_numbers = #tpu.dot_dimension_numbers<[1], [0], [0], [1], [0, 0, 1, 1], [], []>} : vector<2x128xf32>, vector<128x64xf32>, vector<2x64xf32> -> vector<2x64xf32>
    %26 = arith.mulf %2, %2 : vector<128x64xf32>
    %cst_7 = arith.constant dense<0.000000e+00> : vector<2x64xf32>
    %27 = tpu.matmul %13, %26, %cst_7 {dimension_numbers = #tpu.dot_dimension_numbers<[1], [0], [0], [1], [0, 0, 1, 1], [], []>} : vector<2x128xf32>, vector<128x64xf32>, vector<2x64xf32> -> vector<2x64xf32>
    %cst_8 = arith.constant 1.562500e-02 : f32
    %28 = vector.broadcast %cst_8 : f32 to vector<2x64xf32>
    %29 = arith.mulf %25, %28 : vector<2x64xf32>
    %cst_9 = arith.constant 1.562500e-02 : f32
    %30 = vector.broadcast %cst_9 : f32 to vector<2x64xf32>
    %31 = arith.mulf %27, %30 : vector<2x64xf32>
    %32 = arith.mulf %29, %29 : vector<2x64xf32>
    %33 = arith.subf %31, %32 : vector<2x64xf32>
    %cst_10 = arith.constant 0.000000e+00 : f32
    %34 = vector.broadcast %cst_10 : f32 to vector<2x64xf32>
    %35 = arith.maximumf %33, %34 : vector<2x64xf32>
    %cst_11 = arith.constant 9.99999974E-6 : f32
    %36 = vector.broadcast %cst_11 : f32 to vector<2x64xf32>
    %37 = arith.addf %35, %36 : vector<2x64xf32>
    %38 = math.rsqrt %37 : vector<2x64xf32>
    %cst_12 = arith.constant dense<0.000000e+00> : vector<128x64xf32>
    %39 = tpu.matmul %24, %29, %cst_12 {dimension_numbers = #tpu.dot_dimension_numbers<[1], [0], [0], [1], [0, 0, 1, 1], [], []>} : vector<128x2xf32>, vector<2x64xf32>, vector<128x64xf32> -> vector<128x64xf32>
    %cst_13 = arith.constant dense<0.000000e+00> : vector<128x64xf32>
    %40 = tpu.matmul %24, %38, %cst_13 {dimension_numbers = #tpu.dot_dimension_numbers<[1], [0], [0], [1], [0, 0, 1, 1], [], []>} : vector<128x2xf32>, vector<2x64xf32>, vector<128x64xf32> -> vector<128x64xf32>
    %41 = arith.subf %2, %39 : vector<128x64xf32>
    %42 = arith.mulf %41, %40 : vector<128x64xf32>
    %cst_14 = arith.constant 0.000000e+00 : f32
    %43 = vector.broadcast %cst_14 : f32 to vector<128x64xf32>
    %44 = arith.maximumf %42, %43 : vector<128x64xf32>
    %c0_15 = arith.constant 0 : index
    %c0_16 = arith.constant 0 : index
    %45 = vector.load %arg3[%c0_15, %c0_16] : memref<128x64xf32, #tpu.memory_space<vmem>>, vector<128x64xf32>
    tpu.vector_store %arg3[%c0_15, %c0_16], %44 {strides = array<i32>} : memref<128x64xf32, #tpu.memory_space<vmem>>, vector<128x64xf32>,
    return
  }
  func.func @transform_0(%arg0: i32) -> (i32, i32) {
    %c0_i32 = arith.constant 0 : i32
    %c0_i32_0 = arith.constant 0 : i32
    %c0_i32_1 = arith.constant 0 : i32
    return %c0_i32, %c0_i32_0 : i32, i32
  }
  func.func @transform_1(%arg0: i32) -> (i32, i32) {
    %c0_i32 = arith.constant 0 : i32
    %c0_i32_0 = arith.constant 0 : i32
    %c0_i32_1 = arith.constant 0 : i32
    return %c0_i32, %c0_i32_0 : i32, i32
  }
  func.func @transform_2(%arg0: i32) -> (i32, i32) {
    %c0_i32 = arith.constant 0 : i32
    %c0_i32_0 = arith.constant 0 : i32
    %c0_i32_1 = arith.constant 0 : i32
    return %c0_i32, %c0_i32_0 : i32, i32
  }
}

module attributes {stable_mosaic.version = 11 : i64} {
  func.func @_conv_in_relu_kernel(%arg0: i32, %arg1: memref<32x576xbf16, #tpu.memory_space<vmem>>, %arg2: memref<576x128xbf16, #tpu.memory_space<vmem>>, %arg3: memref<32x128xf32, #tpu.memory_space<vmem>>) attributes {dimension_semantics = [#tpu.dimension_semantics<arbitrary>], iteration_bounds = array<i64: 1>, scalar_prefetch = 0 : i64, scratch_operands = 0 : i64, tpu.core_type = #tpu.core_type<tc>, window_params = [{pipeline_mode = #tpu.pipeline_mode<synchronous>, transform_indices = @transform_0, window_bounds = array<i64: 32, 576>}, {pipeline_mode = #tpu.pipeline_mode<synchronous>, transform_indices = @transform_1, window_bounds = array<i64: 576, 128>}, {pipeline_mode = #tpu.pipeline_mode<synchronous>, transform_indices = @transform_2, window_bounds = array<i64: 32, 128>}]} {
    %c0 = arith.constant 0 : index
    %c0_0 = arith.constant 0 : index
    %0 = vector.load %arg1[%c0, %c0_0] : memref<32x576xbf16, #tpu.memory_space<vmem>>, vector<32x576xbf16>
    %c0_1 = arith.constant 0 : index
    %c0_2 = arith.constant 0 : index
    %1 = vector.load %arg2[%c0_1, %c0_2] : memref<576x128xbf16, #tpu.memory_space<vmem>>, vector<576x128xbf16>
    %cst = arith.constant dense<0.000000e+00> : vector<32x128xf32>
    %2 = tpu.matmul %0, %1, %cst {dimension_numbers = #tpu.dot_dimension_numbers<[1], [0], [0], [1], [0, 0, 1, 1], [], []>} : vector<32x576xbf16>, vector<576x128xbf16>, vector<32x128xf32> -> vector<32x128xf32>
    %3 = tpu.iota {dimensions = array<i32: 1>} : vector<2x32xi32>
    %4 = tpu.iota {dimensions = array<i32: 0>} : vector<2x32xi32>
    %c16_i32 = arith.constant 16 : i32
    %5 = vector.broadcast %c16_i32 : i32 to vector<2x32xi32>
    %6 = arith.muli %4, %5 : vector<2x32xi32>
    %7 = arith.cmpi sge, %3, %6 : vector<2x32xi32>
    %c16_i32_3 = arith.constant 16 : i32
    %8 = vector.broadcast %c16_i32_3 : i32 to vector<2x32xi32>
    %9 = arith.addi %6, %8 : vector<2x32xi32>
    %10 = arith.cmpi slt, %3, %9 : vector<2x32xi32>
    %11 = arith.andi %7, %10 : vector<2x32xi1>
    %12 = arith.extui %11 : vector<2x32xi1> to vector<2x32xi32>
    %13 = arith.sitofp %12 : vector<2x32xi32> to vector<2x32xf32>
    %14 = tpu.iota {dimensions = array<i32: 0>} : vector<32x2xi32>
    %15 = tpu.iota {dimensions = array<i32: 1>} : vector<32x2xi32>
    %c16_i32_4 = arith.constant 16 : i32
    %16 = vector.broadcast %c16_i32_4 : i32 to vector<32x2xi32>
    %17 = arith.muli %15, %16 : vector<32x2xi32>
    %18 = arith.cmpi sge, %14, %17 : vector<32x2xi32>
    %c16_i32_5 = arith.constant 16 : i32
    %19 = vector.broadcast %c16_i32_5 : i32 to vector<32x2xi32>
    %20 = arith.addi %17, %19 : vector<32x2xi32>
    %21 = arith.cmpi slt, %14, %20 : vector<32x2xi32>
    %22 = arith.andi %18, %21 : vector<32x2xi1>
    %23 = arith.extui %22 : vector<32x2xi1> to vector<32x2xi32>
    %24 = arith.sitofp %23 : vector<32x2xi32> to vector<32x2xf32>
    %cst_6 = arith.constant dense<0.000000e+00> : vector<2x128xf32>
    %25 = tpu.matmul %13, %2, %cst_6 {dimension_numbers = #tpu.dot_dimension_numbers<[1], [0], [0], [1], [0, 0, 1, 1], [], []>} : vector<2x32xf32>, vector<32x128xf32>, vector<2x128xf32> -> vector<2x128xf32>
    %26 = arith.mulf %2, %2 : vector<32x128xf32>
    %cst_7 = arith.constant dense<0.000000e+00> : vector<2x128xf32>
    %27 = tpu.matmul %13, %26, %cst_7 {dimension_numbers = #tpu.dot_dimension_numbers<[1], [0], [0], [1], [0, 0, 1, 1], [], []>} : vector<2x32xf32>, vector<32x128xf32>, vector<2x128xf32> -> vector<2x128xf32>
    %cst_8 = arith.constant 6.250000e-02 : f32
    %28 = vector.broadcast %cst_8 : f32 to vector<2x128xf32>
    %29 = arith.mulf %25, %28 : vector<2x128xf32>
    %cst_9 = arith.constant 6.250000e-02 : f32
    %30 = vector.broadcast %cst_9 : f32 to vector<2x128xf32>
    %31 = arith.mulf %27, %30 : vector<2x128xf32>
    %32 = arith.mulf %29, %29 : vector<2x128xf32>
    %33 = arith.subf %31, %32 : vector<2x128xf32>
    %cst_10 = arith.constant 0.000000e+00 : f32
    %34 = vector.broadcast %cst_10 : f32 to vector<2x128xf32>
    %35 = arith.maximumf %33, %34 : vector<2x128xf32>
    %cst_11 = arith.constant 9.99999974E-6 : f32
    %36 = vector.broadcast %cst_11 : f32 to vector<2x128xf32>
    %37 = arith.addf %35, %36 : vector<2x128xf32>
    %38 = math.rsqrt %37 : vector<2x128xf32>
    %cst_12 = arith.constant dense<0.000000e+00> : vector<32x128xf32>
    %39 = tpu.matmul %24, %29, %cst_12 {dimension_numbers = #tpu.dot_dimension_numbers<[1], [0], [0], [1], [0, 0, 1, 1], [], []>} : vector<32x2xf32>, vector<2x128xf32>, vector<32x128xf32> -> vector<32x128xf32>
    %cst_13 = arith.constant dense<0.000000e+00> : vector<32x128xf32>
    %40 = tpu.matmul %24, %38, %cst_13 {dimension_numbers = #tpu.dot_dimension_numbers<[1], [0], [0], [1], [0, 0, 1, 1], [], []>} : vector<32x2xf32>, vector<2x128xf32>, vector<32x128xf32> -> vector<32x128xf32>
    %41 = arith.subf %2, %39 : vector<32x128xf32>
    %42 = arith.mulf %41, %40 : vector<32x128xf32>
    %cst_14 = arith.constant 0.000000e+00 : f32
    %43 = vector.broadcast %cst_14 : f32 to vector<32x128xf32>
    %44 = arith.maximumf %42, %43 : vector<32x128xf32>
    %c0_15 = arith.constant 0 : index
    %c0_16 = arith.constant 0 : index
    %45 = vector.load %arg3[%c0_15, %c0_16] : memref<32x128xf32, #tpu.memory_space<vmem>>, vector<32x128xf32>
    tpu.vector_store %arg3[%c0_15, %c0_16], %44 {strides = array<i32>} : memref<32x128xf32, #tpu.memory_space<vmem>>, vector<32x128xf32>,
    return
  }
  func.func @transform_0(%arg0: i32) -> (i32, i32) {
    %c0_i32 = arith.constant 0 : i32
    %c0_i32_0 = arith.constant 0 : i32
    %c0_i32_1 = arith.constant 0 : i32
    return %c0_i32, %c0_i32_0 : i32, i32
  }
  func.func @transform_1(%arg0: i32) -> (i32, i32) {
    %c0_i32 = arith.constant 0 : i32
    %c0_i32_0 = arith.constant 0 : i32
    %c0_i32_1 = arith.constant 0 : i32
    return %c0_i32, %c0_i32_0 : i32, i32
  }
  func.func @transform_2(%arg0: i32) -> (i32, i32) {
    %c0_i32 = arith.constant 0 : i32
    %c0_i32_0 = arith.constant 0 : i32
    %c0_i32_1 = arith.constant 0 : i32
    return %c0_i32, %c0_i32_0 : i32, i32
  }
}

module attributes {stable_mosaic.version = 11 : i64} {
  func.func @_conv_in_relu_kernel(%arg0: i32, %arg1: memref<8x1152xbf16, #tpu.memory_space<vmem>>, %arg2: memref<1152x256xbf16, #tpu.memory_space<vmem>>, %arg3: memref<8x256xf32, #tpu.memory_space<vmem>>) attributes {dimension_semantics = [#tpu.dimension_semantics<arbitrary>], iteration_bounds = array<i64: 1>, scalar_prefetch = 0 : i64, scratch_operands = 0 : i64, tpu.core_type = #tpu.core_type<tc>, window_params = [{pipeline_mode = #tpu.pipeline_mode<synchronous>, transform_indices = @transform_0, window_bounds = array<i64: 8, 1152>}, {pipeline_mode = #tpu.pipeline_mode<synchronous>, transform_indices = @transform_1, window_bounds = array<i64: 1152, 256>}, {pipeline_mode = #tpu.pipeline_mode<synchronous>, transform_indices = @transform_2, window_bounds = array<i64: 8, 256>}]} {
    %c0 = arith.constant 0 : index
    %c0_0 = arith.constant 0 : index
    %0 = vector.load %arg1[%c0, %c0_0] : memref<8x1152xbf16, #tpu.memory_space<vmem>>, vector<8x1152xbf16>
    %c0_1 = arith.constant 0 : index
    %c0_2 = arith.constant 0 : index
    %1 = vector.load %arg2[%c0_1, %c0_2] : memref<1152x256xbf16, #tpu.memory_space<vmem>>, vector<1152x256xbf16>
    %cst = arith.constant dense<0.000000e+00> : vector<8x256xf32>
    %2 = tpu.matmul %0, %1, %cst {dimension_numbers = #tpu.dot_dimension_numbers<[1], [0], [0], [1], [0, 0, 1, 1], [], []>} : vector<8x1152xbf16>, vector<1152x256xbf16>, vector<8x256xf32> -> vector<8x256xf32>
    %3 = tpu.iota {dimensions = array<i32: 1>} : vector<2x8xi32>
    %4 = tpu.iota {dimensions = array<i32: 0>} : vector<2x8xi32>
    %c4_i32 = arith.constant 4 : i32
    %5 = vector.broadcast %c4_i32 : i32 to vector<2x8xi32>
    %6 = arith.muli %4, %5 : vector<2x8xi32>
    %7 = arith.cmpi sge, %3, %6 : vector<2x8xi32>
    %c4_i32_3 = arith.constant 4 : i32
    %8 = vector.broadcast %c4_i32_3 : i32 to vector<2x8xi32>
    %9 = arith.addi %6, %8 : vector<2x8xi32>
    %10 = arith.cmpi slt, %3, %9 : vector<2x8xi32>
    %11 = arith.andi %7, %10 : vector<2x8xi1>
    %12 = arith.extui %11 : vector<2x8xi1> to vector<2x8xi32>
    %13 = arith.sitofp %12 : vector<2x8xi32> to vector<2x8xf32>
    %14 = tpu.iota {dimensions = array<i32: 0>} : vector<8x2xi32>
    %15 = tpu.iota {dimensions = array<i32: 1>} : vector<8x2xi32>
    %c4_i32_4 = arith.constant 4 : i32
    %16 = vector.broadcast %c4_i32_4 : i32 to vector<8x2xi32>
    %17 = arith.muli %15, %16 : vector<8x2xi32>
    %18 = arith.cmpi sge, %14, %17 : vector<8x2xi32>
    %c4_i32_5 = arith.constant 4 : i32
    %19 = vector.broadcast %c4_i32_5 : i32 to vector<8x2xi32>
    %20 = arith.addi %17, %19 : vector<8x2xi32>
    %21 = arith.cmpi slt, %14, %20 : vector<8x2xi32>
    %22 = arith.andi %18, %21 : vector<8x2xi1>
    %23 = arith.extui %22 : vector<8x2xi1> to vector<8x2xi32>
    %24 = arith.sitofp %23 : vector<8x2xi32> to vector<8x2xf32>
    %cst_6 = arith.constant dense<0.000000e+00> : vector<2x256xf32>
    %25 = tpu.matmul %13, %2, %cst_6 {dimension_numbers = #tpu.dot_dimension_numbers<[1], [0], [0], [1], [0, 0, 1, 1], [], []>} : vector<2x8xf32>, vector<8x256xf32>, vector<2x256xf32> -> vector<2x256xf32>
    %26 = arith.mulf %2, %2 : vector<8x256xf32>
    %cst_7 = arith.constant dense<0.000000e+00> : vector<2x256xf32>
    %27 = tpu.matmul %13, %26, %cst_7 {dimension_numbers = #tpu.dot_dimension_numbers<[1], [0], [0], [1], [0, 0, 1, 1], [], []>} : vector<2x8xf32>, vector<8x256xf32>, vector<2x256xf32> -> vector<2x256xf32>
    %cst_8 = arith.constant 2.500000e-01 : f32
    %28 = vector.broadcast %cst_8 : f32 to vector<2x256xf32>
    %29 = arith.mulf %25, %28 : vector<2x256xf32>
    %cst_9 = arith.constant 2.500000e-01 : f32
    %30 = vector.broadcast %cst_9 : f32 to vector<2x256xf32>
    %31 = arith.mulf %27, %30 : vector<2x256xf32>
    %32 = arith.mulf %29, %29 : vector<2x256xf32>
    %33 = arith.subf %31, %32 : vector<2x256xf32>
    %cst_10 = arith.constant 0.000000e+00 : f32
    %34 = vector.broadcast %cst_10 : f32 to vector<2x256xf32>
    %35 = arith.maximumf %33, %34 : vector<2x256xf32>
    %cst_11 = arith.constant 9.99999974E-6 : f32
    %36 = vector.broadcast %cst_11 : f32 to vector<2x256xf32>
    %37 = arith.addf %35, %36 : vector<2x256xf32>
    %38 = math.rsqrt %37 : vector<2x256xf32>
    %cst_12 = arith.constant dense<0.000000e+00> : vector<8x256xf32>
    %39 = tpu.matmul %24, %29, %cst_12 {dimension_numbers = #tpu.dot_dimension_numbers<[1], [0], [0], [1], [0, 0, 1, 1], [], []>} : vector<8x2xf32>, vector<2x256xf32>, vector<8x256xf32> -> vector<8x256xf32>
    %cst_13 = arith.constant dense<0.000000e+00> : vector<8x256xf32>
    %40 = tpu.matmul %24, %38, %cst_13 {dimension_numbers = #tpu.dot_dimension_numbers<[1], [0], [0], [1], [0, 0, 1, 1], [], []>} : vector<8x2xf32>, vector<2x256xf32>, vector<8x256xf32> -> vector<8x256xf32>
    %41 = arith.subf %2, %39 : vector<8x256xf32>
    %42 = arith.mulf %41, %40 : vector<8x256xf32>
    %cst_14 = arith.constant 0.000000e+00 : f32
    %43 = vector.broadcast %cst_14 : f32 to vector<8x256xf32>
    %44 = arith.maximumf %42, %43 : vector<8x256xf32>
    %c0_15 = arith.constant 0 : index
    %c0_16 = arith.constant 0 : index
    %45 = vector.load %arg3[%c0_15, %c0_16] : memref<8x256xf32, #tpu.memory_space<vmem>>, vector<8x256xf32>
    tpu.vector_store %arg3[%c0_15, %c0_16], %44 {strides = array<i32>} : memref<8x256xf32, #tpu.memory_space<vmem>>, vector<8x256xf32>,
    return
  }
  func.func @transform_0(%arg0: i32) -> (i32, i32) {
    %c0_i32 = arith.constant 0 : i32
    %c0_i32_0 = arith.constant 0 : i32
    %c0_i32_1 = arith.constant 0 : i32
    return %c0_i32, %c0_i32_0 : i32, i32
  }
  func.func @transform_1(%arg0: i32) -> (i32, i32) {
    %c0_i32 = arith.constant 0 : i32
    %c0_i32_0 = arith.constant 0 : i32
    %c0_i32_1 = arith.constant 0 : i32
    return %c0_i32, %c0_i32_0 : i32, i32
  }
  func.func @transform_2(%arg0: i32) -> (i32, i32) {
    %c0_i32 = arith.constant 0 : i32
    %c0_i32_0 = arith.constant 0 : i32
    %c0_i32_1 = arith.constant 0 : i32
    return %c0_i32, %c0_i32_0 : i32, i32
  }
}

module attributes {stable_mosaic.version = 11 : i64} {
  func.func @_conv_in_relu_kernel(%arg0: i32, %arg1: memref<8x2304xbf16, #tpu.memory_space<vmem>>, %arg2: memref<2304x256xbf16, #tpu.memory_space<vmem>>, %arg3: memref<8x256xf32, #tpu.memory_space<vmem>>) attributes {dimension_semantics = [#tpu.dimension_semantics<arbitrary>], iteration_bounds = array<i64: 1>, scalar_prefetch = 0 : i64, scratch_operands = 0 : i64, tpu.core_type = #tpu.core_type<tc>, window_params = [{pipeline_mode = #tpu.pipeline_mode<synchronous>, transform_indices = @transform_0, window_bounds = array<i64: 8, 2304>}, {pipeline_mode = #tpu.pipeline_mode<synchronous>, transform_indices = @transform_1, window_bounds = array<i64: 2304, 256>}, {pipeline_mode = #tpu.pipeline_mode<synchronous>, transform_indices = @transform_2, window_bounds = array<i64: 8, 256>}]} {
    %c0 = arith.constant 0 : index
    %c0_0 = arith.constant 0 : index
    %0 = vector.load %arg1[%c0, %c0_0] : memref<8x2304xbf16, #tpu.memory_space<vmem>>, vector<8x2304xbf16>
    %c0_1 = arith.constant 0 : index
    %c0_2 = arith.constant 0 : index
    %1 = vector.load %arg2[%c0_1, %c0_2] : memref<2304x256xbf16, #tpu.memory_space<vmem>>, vector<2304x256xbf16>
    %cst = arith.constant dense<0.000000e+00> : vector<8x256xf32>
    %2 = tpu.matmul %0, %1, %cst {dimension_numbers = #tpu.dot_dimension_numbers<[1], [0], [0], [1], [0, 0, 1, 1], [], []>} : vector<8x2304xbf16>, vector<2304x256xbf16>, vector<8x256xf32> -> vector<8x256xf32>
    %3 = tpu.iota {dimensions = array<i32: 1>} : vector<2x8xi32>
    %4 = tpu.iota {dimensions = array<i32: 0>} : vector<2x8xi32>
    %c4_i32 = arith.constant 4 : i32
    %5 = vector.broadcast %c4_i32 : i32 to vector<2x8xi32>
    %6 = arith.muli %4, %5 : vector<2x8xi32>
    %7 = arith.cmpi sge, %3, %6 : vector<2x8xi32>
    %c4_i32_3 = arith.constant 4 : i32
    %8 = vector.broadcast %c4_i32_3 : i32 to vector<2x8xi32>
    %9 = arith.addi %6, %8 : vector<2x8xi32>
    %10 = arith.cmpi slt, %3, %9 : vector<2x8xi32>
    %11 = arith.andi %7, %10 : vector<2x8xi1>
    %12 = arith.extui %11 : vector<2x8xi1> to vector<2x8xi32>
    %13 = arith.sitofp %12 : vector<2x8xi32> to vector<2x8xf32>
    %14 = tpu.iota {dimensions = array<i32: 0>} : vector<8x2xi32>
    %15 = tpu.iota {dimensions = array<i32: 1>} : vector<8x2xi32>
    %c4_i32_4 = arith.constant 4 : i32
    %16 = vector.broadcast %c4_i32_4 : i32 to vector<8x2xi32>
    %17 = arith.muli %15, %16 : vector<8x2xi32>
    %18 = arith.cmpi sge, %14, %17 : vector<8x2xi32>
    %c4_i32_5 = arith.constant 4 : i32
    %19 = vector.broadcast %c4_i32_5 : i32 to vector<8x2xi32>
    %20 = arith.addi %17, %19 : vector<8x2xi32>
    %21 = arith.cmpi slt, %14, %20 : vector<8x2xi32>
    %22 = arith.andi %18, %21 : vector<8x2xi1>
    %23 = arith.extui %22 : vector<8x2xi1> to vector<8x2xi32>
    %24 = arith.sitofp %23 : vector<8x2xi32> to vector<8x2xf32>
    %cst_6 = arith.constant dense<0.000000e+00> : vector<2x256xf32>
    %25 = tpu.matmul %13, %2, %cst_6 {dimension_numbers = #tpu.dot_dimension_numbers<[1], [0], [0], [1], [0, 0, 1, 1], [], []>} : vector<2x8xf32>, vector<8x256xf32>, vector<2x256xf32> -> vector<2x256xf32>
    %26 = arith.mulf %2, %2 : vector<8x256xf32>
    %cst_7 = arith.constant dense<0.000000e+00> : vector<2x256xf32>
    %27 = tpu.matmul %13, %26, %cst_7 {dimension_numbers = #tpu.dot_dimension_numbers<[1], [0], [0], [1], [0, 0, 1, 1], [], []>} : vector<2x8xf32>, vector<8x256xf32>, vector<2x256xf32> -> vector<2x256xf32>
    %cst_8 = arith.constant 2.500000e-01 : f32
    %28 = vector.broadcast %cst_8 : f32 to vector<2x256xf32>
    %29 = arith.mulf %25, %28 : vector<2x256xf32>
    %cst_9 = arith.constant 2.500000e-01 : f32
    %30 = vector.broadcast %cst_9 : f32 to vector<2x256xf32>
    %31 = arith.mulf %27, %30 : vector<2x256xf32>
    %32 = arith.mulf %29, %29 : vector<2x256xf32>
    %33 = arith.subf %31, %32 : vector<2x256xf32>
    %cst_10 = arith.constant 0.000000e+00 : f32
    %34 = vector.broadcast %cst_10 : f32 to vector<2x256xf32>
    %35 = arith.maximumf %33, %34 : vector<2x256xf32>
    %cst_11 = arith.constant 9.99999974E-6 : f32
    %36 = vector.broadcast %cst_11 : f32 to vector<2x256xf32>
    %37 = arith.addf %35, %36 : vector<2x256xf32>
    %38 = math.rsqrt %37 : vector<2x256xf32>
    %cst_12 = arith.constant dense<0.000000e+00> : vector<8x256xf32>
    %39 = tpu.matmul %24, %29, %cst_12 {dimension_numbers = #tpu.dot_dimension_numbers<[1], [0], [0], [1], [0, 0, 1, 1], [], []>} : vector<8x2xf32>, vector<2x256xf32>, vector<8x256xf32> -> vector<8x256xf32>
    %cst_13 = arith.constant dense<0.000000e+00> : vector<8x256xf32>
    %40 = tpu.matmul %24, %38, %cst_13 {dimension_numbers = #tpu.dot_dimension_numbers<[1], [0], [0], [1], [0, 0, 1, 1], [], []>} : vector<8x2xf32>, vector<2x256xf32>, vector<8x256xf32> -> vector<8x256xf32>
    %41 = arith.subf %2, %39 : vector<8x256xf32>
    %42 = arith.mulf %41, %40 : vector<8x256xf32>
    %cst_14 = arith.constant 0.000000e+00 : f32
    %43 = vector.broadcast %cst_14 : f32 to vector<8x256xf32>
    %44 = arith.maximumf %42, %43 : vector<8x256xf32>
    %c0_15 = arith.constant 0 : index
    %c0_16 = arith.constant 0 : index
    %45 = vector.load %arg3[%c0_15, %c0_16] : memref<8x256xf32, #tpu.memory_space<vmem>>, vector<8x256xf32>
    tpu.vector_store %arg3[%c0_15, %c0_16], %44 {strides = array<i32>} : memref<8x256xf32, #tpu.memory_space<vmem>>, vector<8x256xf32>,
    return
  }
  func.func @transform_0(%arg0: i32) -> (i32, i32) {
    %c0_i32 = arith.constant 0 : i32
    %c0_i32_0 = arith.constant 0 : i32
    %c0_i32_1 = arith.constant 0 : i32
    return %c0_i32, %c0_i32_0 : i32, i32
  }
  func.func @transform_1(%arg0: i32) -> (i32, i32) {
    %c0_i32 = arith.constant 0 : i32
    %c0_i32_0 = arith.constant 0 : i32
    %c0_i32_1 = arith.constant 0 : i32
    return %c0_i32, %c0_i32_0 : i32, i32
  }
  func.func @transform_2(%arg0: i32) -> (i32, i32) {
    %c0_i32 = arith.constant 0 : i32
    %c0_i32_0 = arith.constant 0 : i32
    %c0_i32_1 = arith.constant 0 : i32
    return %c0_i32, %c0_i32_0 : i32, i32
  }
}

</mosaic_0001>

<bundles_post_ra>
// kernel: content_encoder_forward.6
= control target key start
LH: loop header
LB: loop body
LE: loop exit
PB: predicated region body
PF: predicated region fallthrough
CT: control target
= control target key end

     0   :  { %vm308_vm0 = vcmask 261120   ;;  %v1657_v42 = vmov 0.0   ;;  %vm1658_vm1 = vmmov 0   ;;  %vm2282_vm10 = vcmask 15360   ;;  %s2279_s1 = inlined_call_operand.vmem [shape: bf16[288,64], index: 1, kind: input, shape index: {}]   ;;  %s2280_s0 = inlined_call_operand.vmem [shape: bf16[128,288], index: 0, kind: input, shape index: {}]   ;;  %s2281_s2 = inlined_call_operand.vmem [shape: f32[128,64], index: 2, kind: output, shape index: {}]  }
   0x1   :  { %v1605_v0 = vld [vmem:[%s2279_s1 + $0x78] sm:$0xff]   ;;  %v1607_v2 = vld [vmem:[%s2279_s1 + $0x70] sm:$0xff]   ;;  %v1609_v4 = vld [vmem:[%s2279_s1 + $0x68] sm:$0xff]  }
   0x2   :  { %v1606_v1 = vld [vmem:[%s2279_s1 + $0x38] sm:$0xff]   ;;  %1316 = vmatprep.subr.bf16.mxu0 %v1605_v0  ;;  %v1608_v3 = vld [vmem:[%s2279_s1 + $0x30] sm:$0xff]   ;;  %v1610_v5 = vld [vmem:[%s2279_s1 + $0x28] sm:$0xff]  }
   0x3   :  { %1317 = vmatpush3.bf16.msra.mxu0 %v1606_v1  ;;  %v1611_v6 = vld [vmem:[%s2279_s1 + $0x60] sm:$0xff]   ;;  %v1613_v8 = vld [vmem:[%s2279_s1 + $0x58] sm:$0xff]   ;;  %v1619_v9 = vld [vmem:[%s2279_s1 + $0x88] sm:$0xff]  }
   0x4   :  { %1318 = vmatprep.subr.bf16.mxu0 %v1607_v2  ;;  %v1612_v7 = vld [vmem:[%s2279_s1 + $0x20] sm:$0xff]   ;;  %v1614_v10 = vld [vmem:[%s2279_s1 + $0x18] sm:$0xff]   ;;  %v1615_v11 = vld [vmem:[%s2279_s1 + $0x50] sm:$0xff]   ;;  %1458 = vmatprep.subr.bf16.mxu1 %v1619_v9 }
   0x5   :  { %v1616_v12 = vld [vmem:[%s2279_s1 + $0x10] sm:$0xff]   ;;  %1459 = vmatpush3.bf16.msra.mxu1 %v1619_v9  ;;  %v1622_v13 = vld [vmem:[%s2279_s1 + $0x80] sm:$0xff]   ;;  %v1617_v14 = vld [vmem:[%s2279_s1 + $0x48] sm:$0xff]  }
   0x6   :  { %1460 = vmatprep.subr.bf16.mxu1 %v1622_v13  ;;  %v1625_v15 = vld [vmem:[%s2280_s0 + $0x4] ss:$12 sps:$4 sm:$0xff]   ;;  %v1626_v16 = vld [vmem:[%s2280_s0 + $0x8] ss:$12 sps:$4 sm:$0xff]   ;;  %v1627_v17 = vld [vmem:[%s2280_s0 + $0x20] ss:$12 sps:$4 sm:$0xff]  }
   0x7   :  { %1319 = vmatpush3.bf16.msra.mxu0 %v1608_v3  ;;  %365 = vmatprep.mubr.bf16.mxu0 %v1625_v15  ;;  %v1618_v18 = vld [vmem:[%s2279_s1 + $0x8] sm:$0xff]   ;;  %v1620_v19 = vld [vmem:[%s2279_s1 + $0x40] sm:$0xff]   ;;  %v1635_v22 = vld [vmem:[%s2280_s0 + $0x50] ss:$12 sps:$4 sm:$0xff]  }
   0x8   :  { %1320 = vmatprep.subr.bf16.mxu0 %v1609_v4  ;;  %1462 = vmatprep.mubr.msk.bf16.mxu1 %vm308_vm0, %v1626_v16  ;;  %v1634_v20 = vld [vmem:[%s2280_s0 + $0x38] ss:$12 sps:$4 sm:$0xff]   ;;  %v1642_v23 = vld [vmem:[%s2280_s0 + $0x68] ss:$12 sps:$4 sm:$0xff]   ;;  %v1623_v24 = vld [vmem:[%s2280_s0] ss:$12 sps:$4 sm:$0xff]  }
   0x9   :  { %1461 = vmatpush3.bf16.msra.mxu1 %v1622_v13  ;;  %v1621_v21 = vld [vmem:[%s2279_s1] sm:$0xff]   ;;  %v1628_v25 = vld [vmem:[%s2280_s0 + $0x1c] ss:$12 sps:$4 sm:$0xff]   ;;  %v1636_v32 = vld [vmem:[%s2280_s0 + $0x4c] ss:$12 sps:$4 sm:$0xff]  }
   0xa   :  { %v1643_v26 = vld [vmem:[%s2280_s0 + $0x80] ss:$12 sps:$4 sm:$0xff]   ;;  %v1650_v27 = vld [vmem:[%s2280_s0 + $0x98] ss:$12 sps:$4 sm:$0xff]   ;;  %v1651_v30 = vld [vmem:[%s2280_s0 + $0xb0] ss:$12 sps:$4 sm:$0xff]   ;;  %1478 = vmatprep.subr.mxu1 %v1657_v42 }
   0xb   :  { %1321 = vmatpush3.bf16.msra.mxu0 %v1610_v5  ;;  %v1630_v28 = vld [vmem:[%s2280_s0 + $0x18] ss:$12 sps:$4 sm:$0xff]   ;;  %v1631_v29 = vld [vmem:[%s2280_s0 + $0x34] ss:$12 sps:$4 sm:$0xff]   ;;  %v1633_v31 = vld [vmem:[%s2280_s0 + $0x30] ss:$12 sps:$4 sm:$0xff]  }
   0xc   :  { %1322 = vmatprep.subr.bf16.mxu0 %v1611_v6  ;;  %1463 = vmatmul.mubr.msk.bf16.vlgmr.msra.gmra.mxu1 %vm308_vm0, %v1627_v17  ;;  %v1638_v33 = vld [vmem:[%s2280_s0 + $0x48] ss:$12 sps:$4 sm:$0xff]   ;;  %v1639_v34 = vld [vmem:[%s2280_s0 + $0x64] ss:$12 sps:$4 sm:$0xff]   ;;  %v1641_v35 = vld [vmem:[%s2280_s0 + $0x60] ss:$12 sps:$4 sm:$0xff]  }
   0xd   :  { %1466 = vmatprep.mubr.msk.bf16.mxu1 %vm308_vm0, %v1634_v20  ;;  %v1644_v36 = vld [vmem:[%s2280_s0 + $0x7c] ss:$12 sps:$4 sm:$0xff]   ;;  %v1646_v37 = vld [vmem:[%s2280_s0 + $0x78] ss:$12 sps:$4 sm:$0xff]   ;;  %v1647_v38 = vld [vmem:[%s2280_s0 + $0x94] ss:$12 sps:$4 sm:$0xff]  }
   0xe   :  { %v1649_v39 = vld [vmem:[%s2280_s0 + $0x90] ss:$12 sps:$4 sm:$0xff]   ;;  %v1652_v40 = vld [vmem:[%s2280_s0 + $0xac] ss:$12 sps:$4 sm:$0xff]   ;;  %v1654_v41 = vld [vmem:[%s2280_s0 + $0xa8] ss:$12 sps:$4 sm:$0xff]  }
   0xf   :  { %1323 = vmatpush3.bf16.msra.mxu0 %v1612_v7 }
  0x10   :  { %1324 = vmatprep.subr.bf16.mxu0 %v1613_v8 }
  0x13   :  { %1325 = vmatpush3.bf16.msra.mxu0 %v1614_v10 }
  0x14   :  { %1326 = vmatprep.subr.bf16.mxu0 %v1615_v11  ;;  %1467 = vmatmul.mubr.msk.bf16.gmra.mxu1 %vm308_vm0, %v1635_v22 }
  0x15   :  { %1470 = vmatprep.mubr.msk.bf16.mxu1 %vm308_vm0, %v1642_v23 }
  0x17   :  { %1327 = vmatpush3.bf16.msra.mxu0 %v1616_v12 }
  0x18   :  { %1328 = vmatprep.subr.bf16.mxu0 %v1617_v14 }
  0x1b   :  { %1329 = vmatpush3.bf16.msra.mxu0 %v1618_v18 }
  0x1c   :  { %1330 = vmatprep.subr.bf16.mxu0 %v1620_v19  ;;  %1471 = vmatmul.mubr.msk.bf16.gmra.mxu1 %vm308_vm0, %v1643_v26 }
  0x1d   :  { %1474 = vmatprep.mubr.msk.bf16.mxu1 %vm308_vm0, %v1650_v27 }
  0x1f   :  { %1331 = vmatpush3.bf16.msra.mxu0 %v1621_v21 }
  0x22   :  { %366 = vmatmul.mubr.bf16.vlgmr.msra.gmra.mxu0 %v1623_v24 }
  0x23   :  { %373 = vmatprep.mubr.bf16.mxu0 %v1628_v25 }
  0x24   :  { %1475 = vmatmul.mubr.msk.bf16.gmra.mxu1 %vm308_vm0, %v1651_v30 }
  0x25   :  { %1510 = vmatprep.mubr.msk.f32.mxu1 %vm1658_vm1, %v1657_v42 }
  0x2a   :  { %374 = vmatmul.mubr.bf16.gmra.mxu0 %v1630_v28 }
  0x2b   :  { %381 = vmatprep.mubr.bf16.mxu0 %v1631_v29 }
  0x32   :  { %382 = vmatmul.mubr.bf16.gmra.mxu0 %v1633_v31 }
  0x33   :  { %389 = vmatprep.mubr.bf16.mxu0 %v1636_v32 }
  0x3a   :  { %390 = vmatmul.mubr.bf16.gmra.mxu0 %v1638_v33 }
  0x3b   :  { %397 = vmatprep.mubr.bf16.mxu0 %v1639_v34 }
  0x42   :  { %398 = vmatmul.mubr.bf16.gmra.mxu0 %v1641_v35 }
  0x43   :  { %405 = vmatprep.mubr.bf16.mxu0 %v1644_v36 }
  0x4a   :  { %406 = vmatmul.mubr.bf16.gmra.mxu0 %v1646_v37 }
  0x4b   :  { %413 = vmatprep.mubr.bf16.mxu0 %v1647_v38 }
  0x52   :  { %414 = vmatmul.mubr.bf16.gmra.mxu0 %v1649_v39 }
  0x53   :  { %421 = vmatprep.mubr.bf16.mxu0 %v1652_v40 }
  0x5a   :  { %422 = vmatmul.mubr.bf16.gmra.mxu0 %v1654_v41 }
  0xcc   :  { %v1818_v52 = vpop.f32.mrf.mxu1 }
  0xce   :  { %v1822_v56 = vpop.f32.mrf.mxu1 }
  0xd0   :  { %v1826_v60 = vpop.f32.mrf.mxu1 }
  0xd2   :  { %v1832_v63 = vpop.f32.mrf.mxu1 }
  0xd4   :  { %v1834_v1 = vpop.f32.mrf.mxu1 }
  0xd6   :  { %v1836_v4 = vpop.f32.mrf.mxu1 }
  0xd8   :  { %v1469_v7 = vpop.f32.mrf.mxu1 }
  0xda   :  { %v1838_v10 = vpop.f32.mrf.mxu1 }
  0xdc   :  { %v1472_v12 = vpop.f32.mrf.mxu1 }
  0xde   :  { %v496_v15 = vpop.f32.mrf.mxu1 }
  0xe0   :  { %v1473_v18 = vpop.f32.mrf.mxu1 }
  0xe2   :  { %v1332_v43 = vpop.f32.mrf.mxu0  ;;  %v499_v21 = vpop.f32.mrf.mxu1 }
  0xe4   :  { %v1333_v44 = vpop.f32.mrf.mxu0  ;;  %v1476_v23 = vpop.f32.mrf.mxu1 }
  0xe5   :  { %v1812_v45 = vadd.f32 %v1333_v44, %v1332_v43 }
  0xe6   :  { %v1335_v46 = vpop.f32.mrf.mxu0  ;;  %v512_v26 = vpop.f32.mrf.mxu1 }
  0xe8   :  { %v1336_v47 = vpop.f32.mrf.mxu0  ;;  %v1477_v29 = vpop.f32.mrf.mxu1 }
  0xe9   :  { %v1814_v48 = vadd.f32 %v1336_v47, %v1335_v46 }
  0xea   :  { %v1338_v49 = vpop.f32.mrf.mxu0  ;;  %v515_v35 = vpop.f32.mrf.mxu1 }
  0xec   :  { %v1339_v50 = vpop.f32.mrf.mxu0 }
  0xed   :  { %v1816_v51 = vadd.f32 %v1339_v50, %v1338_v49  ;;  %v527_v49 = vlaneseq }
  0xee   :  { %v1341_v53 = vpop.f32.mrf.mxu0 }
  0xf0   :  { %v1342_v54 = vpop.f32.mrf.mxu0 }
  0xf1   :  { %v1820_v55 = vadd.f32 %v1342_v54, %v1341_v53 }
  0xf2   :  { %v1344_v57 = vpop.f32.mrf.mxu0 }
  0xf4   :  { %v1345_v58 = vpop.f32.mrf.mxu0 }
  0xf5   :  { %v1824_v59 = vadd.f32 %v1345_v58, %v1344_v57  ;;  %v1870_v58 = vshrl.u32 %v527_v49, 7 }
  0xf6   :  { %v1828_v61 = vpop.f32.mrf.mxu0 }
  0xf8   :  { %v1830_v62 = vpop.f32.mrf.mxu0 }
  0xfa   :  { %v1350_v0 = vpop.f32.mrf.mxu0 }
  0xfc   :  { %v1351_v2 = vpop.f32.mrf.mxu0 }
  0xfd   :  { %v1352_v54 = vadd.f32 %v1351_v2, %v1350_v0  ;;  %v531_v0 = vmul.u32 64, %v1870_v58 }
  0xfe   :  { %v1353_v3 = vpop.f32.mrf.mxu0 }
 0x100   :  { %v1354_v5 = vpop.f32.mrf.mxu0 }
 0x101   :  { %v1355_v50 = vadd.f32 %v1354_v5, %v1353_v3  ;;  %v1879_v3 = vadd.f32 %v1834_v1, %v1352_v54  ;;  %v533_v1 = vadd.s32 64, %v531_v0  ;;  %v1899_v5 = vadd.f32 %v1826_v60, %v1820_v55 }
 0x102   :  { %v1356_v6 = vpop.f32.mrf.mxu0  ;;  %v1913_v55 = vadd.f32 %v1814_v48, %v1832_v63  ;;  %v2303_v54 = vmov 0 }
 0x104   :  { %v1357_v8 = vpop.f32.mrf.mxu0 }
 0x105   :  { %v1358_v46 = vadd.f32 %v1357_v8, %v1356_v6  ;;  %v1349_v6 = vadd.f32 %v1830_v62, %v1828_v61  ;;  %v1874_v8 = vadd.f32 %v1469_v7, %v1355_v50  ;;  %v1891_v61 = vadd.f32 %v1824_v59, %v1836_v4 }
 0x106   :  { %v1359_v9 = vpop.f32.mrf.mxu0  ;;  %v1895_v62 = vand.u32 127, %v527_v49  ;;  %v1905_v7 = vadd.f32 %v1818_v52, %v1816_v51  ;;  %v1919_v51 = vadd.f32 %v1812_v45, %v1822_v56  ;;  %v1659_v59 = vmov 1.0  }
 0x107   :  { %v1866_v57 = vadd.f32 %v1358_v46, %v496_v15  ;;  %v1885_v2 = vadd.f32 %v1349_v6, %v1838_v10  ;;  %v708_v15 = vmul.f32 %v1899_v5, %v1899_v5  ;;  %v2301_v46 = vmov 0 }
 0x108   :  { %v1360_v11 = vpop.f32.mrf.mxu0  ;;  %vm532_vm2 = vcmp.ge.s32.totalorder %v1895_v62, %v531_v0  ;;  %vm534_vm3 = vcmp.lt.s32.totalorder %v1895_v62, %v533_v1  ;;  %v547_v49 = vadd.s32 80, %v1870_v58  ;;  %v548_v50 = vadd.s32 88, %v1870_v58 }
 0x109   :  { %v1361_v43 = vadd.f32 %v1360_v11, %v1359_v9  ;;  %vm1922_vm4 = vmand %vm532_vm2, %vm534_vm3  ;;  %v713_v10 = vmul.f32 %v1866_v57, %v1866_v57  ;;  %v712_v11 = vmul.f32 %v1874_v8, %v1874_v8  ;;  %v2305_v6 = vmov 0 }
 0x10a   :  { %v1362_v13 = vpop.f32.mrf.mxu0  ;;  %v549_v0 = vadd.s32 96, %v1870_v58  ;;  %v2307_v1 = vmov 0 }
 0x10b   :  { %v1862_v53 = vadd.f32 %v1361_v43, %v499_v21  ;;  %v538_v21 = vadd.s32 8, %v1870_v58 }
 0x10c   :  { %v1363_v14 = vpop.f32.mrf.mxu0 }
 0x10d   :  { %v1364_v40 = vadd.f32 %v1363_v14, %v1362_v13  ;;  %v714_v9 = vmul.f32 %v1862_v53, %v1862_v53  ;;  %v710_v13 = vmul.f32 %v1885_v2, %v1885_v2  ;;  %v709_v14 = vmul.f32 %v1891_v61, %v1891_v61 }
 0x10e   :  { %v1365_v16 = vpop.f32.mrf.mxu0 }
 0x10f   :  { %v1858_v47 = vadd.f32 %v1472_v12, %v1364_v40  ;;  %v711_v12 = vmul.f32 %v1879_v3, %v1879_v3  ;;  %v546_v40 = vadd.s32 72, %v1870_v58 }
 0x110   :  { %v1366_v17 = vpop.f32.mrf.mxu0 }
 0x111   :  { %v1367_v38 = vadd.f32 %v1366_v17, %v1365_v16  ;;  %v715_v4 = vmul.f32 %v1858_v47, %v1858_v47  ;;  %v707_v16 = vmul.f32 %v1905_v7, %v1905_v7  ;;  %v706_v17 = vmul.f32 %v1913_v55, %v1913_v55 }
 0x112   :  { %v1368_v19 = vpop.f32.mrf.mxu0 }
 0x113   :  { %v1854_v44 = vadd.f32 %v1473_v18, %v1367_v38  ;;  %v705_v18 = vmul.f32 %v1919_v51, %v1919_v51  ;;  %v545_v38 = vadd.s32 64, %v1870_v58 }
 0x114   :  { %v1369_v20 = vpop.f32.mrf.mxu0 }
 0x115   :  { %v1370_v36 = vadd.f32 %v1369_v20, %v1368_v19  ;;  %v716_v63 = vmul.f32 %v1854_v44, %v1854_v44  ;;  %v1983_v19 = vmul.u32 64, %v1895_v62  ;;  %v550_v62 = vadd.s32 104, %v1870_v58 }
 0x116   :  { %v1371_v22 = vpop.f32.mrf.mxu0 }
 0x117   :  { %v1850_v41 = vadd.f32 %v1370_v36, %v512_v26  ;;  %v1986_v20 = vadd.s32 64, %v1983_v19  ;;  %vm554_vm5 = vcmp.ge.s32.totalorder %v1870_v58, %v1983_v19  ;;  %vm555_vm8 = vcmp.ge.s32.totalorder %v538_v21, %v1983_v19 }
 0x118   :  { %v1372_v24 = vpop.f32.mrf.mxu0 }
 0x119   :  { %v1373_v33 = vadd.f32 %v1372_v24, %v1371_v22  ;;  %v717_v60 = vmul.f32 %v1850_v41, %v1850_v41  ;;  %vm571_vm6 = vcmp.lt.s32.totalorder %v1870_v58, %v1986_v20  ;;  %vm572_vm9 = vcmp.lt.s32.totalorder %v538_v21, %v1986_v20 }
 0x11a   :  { %v1374_v25 = vpop.f32.mrf.mxu0  ;;  %vm587_vm7 = vmand %vm554_vm5, %vm571_vm6  ;;  %v539_v24 = vadd.s32 16, %v1870_v58 }
 0x11b   :  { %v1846_v39 = vadd.f32 %v1373_v33, %v515_v35  ;;  %v1264_v22 = vsel %vm587_vm7, 1.0, %v1657_v42  ;;  %vm1996_vm11 = vmand %vm555_vm8, %vm572_vm9  ;;  %v544_v33 = vadd.s32 56, %v1870_v58 }
 0x11c   :  { %v1375_v27 = vpop.f32.mrf.mxu0  ;;  %1576 = vmatprep.mubr.msk.f32.mxu0 %vm2282_vm10, %v1264_v22  ;;  %vm556_vm12 = vcmp.ge.s32.totalorder %v539_v24, %v1983_v19  ;;  %vm573_vm13 = vcmp.lt.s32.totalorder %v539_v24, %v1986_v20 }
 0x11d   :  { %v1376_v31 = vadd.f32 %v1375_v27, %v1374_v25  ;;  %v718_v56 = vmul.f32 %v1846_v39, %v1846_v39  ;;  %v540_v25 = vadd.s32 24, %v1870_v58  ;;  %vm2006_vm14 = vmand %vm556_vm12, %vm573_vm13  ;;  %vm561_vm13 = vcmp.ge.s32.totalorder %v544_v33, %v1983_v19 }
 0x11e   :  { %v1377_v28 = vpop.f32.mrf.mxu0 }
 0x11f   :  { %v1842_v37 = vadd.f32 %v1476_v23, %v1376_v31  ;;  %vm557_vm15 = vcmp.ge.s32.totalorder %v540_v25, %v1983_v19  ;;  %vm574_vm0 = vcmp.lt.s32.totalorder %v540_v25, %v1986_v20 }
 0x120   :  { %v1378_v30 = vpop.f32.mrf.mxu0 }
 0x121   :  { %v1379_v32 = vadd.f32 %v1378_v30, %v1377_v28  ;;  %v719_v45 = vmul.f32 %v1842_v37, %v1842_v37  ;;  %v541_v28 = vadd.s32 32, %v1870_v58 }
 0x123   :  { %v1840_v34 = vadd.f32 %v1477_v29, %v1379_v32  ;;  %v542_v29 = vadd.s32 40, %v1870_v58  ;;  %vm558_vm2 = vcmp.ge.s32.totalorder %v541_v28, %v1983_v19  ;;  %vm575_vm3 = vcmp.lt.s32.totalorder %v541_v28, %v1986_v20 }
 0x124   :  { %v543_v32 = vadd.s32 48, %v1870_v58 }
 0x125   :  { %1479 = vmatpush3.msra.mxu1 %v1840_v34  ;;  %v720_v48 = vmul.f32 %v1840_v34, %v1840_v34  ;;  %vm559_vm5 = vcmp.ge.s32.totalorder %v542_v29, %v1983_v19  ;;  %vm576_vm6 = vcmp.lt.s32.totalorder %v542_v29, %v1986_v20 }
 0x126   :  { %1480 = vmatprep.subr.mxu1 %v1657_v42  ;;  %vm2026_vm7 = vmand %vm559_vm5, %vm576_vm6  ;;  %vm560_vm8 = vcmp.ge.s32.totalorder %v543_v32, %v1983_v19  ;;  %vm577_vm9 = vcmp.lt.s32.totalorder %v543_v32, %v1986_v20  ;;  %vm563_vm6 = vcmp.ge.s32.totalorder %v546_v40, %v1983_v19 }
 0x127   :  { %1481 = vmatpush3.msra.mxu1 %v1842_v37  ;;  %vm2034_vm12 = vmand %vm560_vm8, %vm577_vm9  ;;  %vm580_vm8 = vcmp.lt.s32.totalorder %v546_v40, %v1986_v20 }
 0x128   :  { %1482 = vmatprep.subr.mxu1 %v1657_v42  ;;  %vm2054_vm9 = vmand %vm563_vm6, %vm580_vm8  ;;  %vm566_vm8 = vcmp.ge.s32.totalorder %v549_v0, %v1983_v19 }
 0x129   :  { %1483 = vmatpush3.msra.mxu1 %v1846_v39  ;;  %v2302_v46 = vsel %vm2054_vm9, 4294967295, %v2301_v46  ;;  %vm583_vm9 = vcmp.lt.s32.totalorder %v549_v0, %v1986_v20 }
 0x12a   :  { %1484 = vmatprep.subr.mxu1 %v1657_v42 }
 0x12b   :  { %1485 = vmatpush3.msra.mxu1 %v1850_v41 }
 0x12c   :  { %1486 = vmatprep.subr.mxu1 %v1657_v42 }
 0x12d   :  { %1487 = vmatpush3.msra.mxu1 %v1854_v44 }
 0x12e   :  { %1488 = vmatprep.subr.mxu1 %v1657_v42 }
 0x12f   :  { %1489 = vmatpush3.msra.mxu1 %v1858_v47 }
 0x130   :  { %1490 = vmatprep.subr.mxu1 %v1657_v42 }
 0x131   :  { %1491 = vmatpush3.msra.mxu1 %v1862_v53 }
 0x132   :  { %1492 = vmatprep.subr.mxu1 %v1657_v42 }
 0x133   :  { %1493 = vmatpush3.msra.mxu1 %v1866_v57 }
 0x134   :  { %1494 = vmatprep.subr.mxu1 %v1657_v42 }
 0x135   :  { %1495 = vmatpush3.msra.mxu1 %v1874_v8 }
 0x136   :  { %1496 = vmatprep.subr.mxu1 %v1657_v42 }
 0x137   :  { %1497 = vmatpush3.msra.mxu1 %v1879_v3 }
 0x138   :  { %1498 = vmatprep.subr.mxu1 %v1657_v42 }
 0x139   :  { %1499 = vmatpush3.msra.mxu1 %v1885_v2 }
 0x13a   :  { %1500 = vmatprep.subr.mxu1 %v1657_v42 }
 0x13b   :  { %1501 = vmatpush3.msra.mxu1 %v1891_v61 }
 0x13c   :  { %1502 = vmatprep.subr.mxu1 %v1657_v42 }
 0x13d   :  { %1503 = vmatpush3.msra.mxu1 %v1899_v5 }
 0x13e   :  { %1504 = vmatprep.subr.mxu1 %v1657_v42 }
 0x13f   :  { %1505 = vmatpush3.msra.mxu1 %v1905_v7 }
 0x140   :  { %1506 = vmatprep.subr.mxu1 %v1657_v42 }
 0x141   :  { %1507 = vmatpush3.msra.mxu1 %v1913_v55 }
 0x142   :  { %1508 = vmatprep.subr.mxu1 %v1657_v42 }
 0x143   :  { %1509 = vmatpush3.msra.mxu1 %v1919_v51 }
 0x144   :  { %1511 = vmatmul.mubr.msk.f32.vlgmr.msra.gmra.mxu1 %vm1922_vm4, %v1659_v59  ;;  %1513 = vmatprep.subr.mxu1 %v1657_v42 }
 0x145   :  { %1514 = vmatpush3.msra.mxu1 %v720_v48  ;;  %1545 = vmatprep.mubr.msk.f32.mxu1 %vm1658_vm1, %v1657_v42  ;;  %vm2012_vm1 = vmand %vm557_vm15, %vm574_vm0  ;;  %vm578_vm15 = vcmp.lt.s32.totalorder %v544_v33, %v1986_v20  ;;  %v551_v48 = vadd.s32 112, %v1870_v58 }
 0x146   :  { %1515 = vmatprep.subr.mxu1 %v1657_v42  ;;  %vm2040_vm0 = vmand %vm561_vm13, %vm578_vm15  ;;  %vm564_vm13 = vcmp.ge.s32.totalorder %v547_v49, %v1983_v19  ;;  %vm581_vm15 = vcmp.lt.s32.totalorder %v547_v49, %v1986_v20 }
 0x147   :  { %1516 = vmatpush3.msra.mxu1 %v719_v45 }
 0x148   :  { %1517 = vmatprep.subr.mxu1 %v1657_v42 }
 0x149   :  { %1518 = vmatpush3.msra.mxu1 %v718_v56 }
 0x14a   :  { %1519 = vmatprep.subr.mxu1 %v1657_v42 }
 0x14b   :  { %1520 = vmatpush3.msra.mxu1 %v717_v60 }
 0x14c   :  { %1521 = vmatprep.subr.mxu1 %v1657_v42 }
 0x14d   :  { %1522 = vmatpush3.msra.mxu1 %v716_v63 }
 0x14e   :  { %1523 = vmatprep.subr.mxu1 %v1657_v42 }
 0x14f   :  { %1524 = vmatpush3.msra.mxu1 %v715_v4  ;;  %v1265_v4 = vsel %vm1996_vm11, 1.0, %v1657_v42 }
 0x150   :  { %1525 = vmatprep.subr.mxu1 %v1657_v42 }
 0x151   :  { %1526 = vmatpush3.msra.mxu1 %v714_v9  ;;  %v1266_v9 = vsel %vm2006_vm14, 1.0, %v1657_v42 }
 0x152   :  { %1527 = vmatprep.subr.mxu1 %v1657_v42 }
 0x153   :  { %1528 = vmatpush3.msra.mxu1 %v713_v10  ;;  %v1267_v10 = vsel %vm2012_vm1, 1.0, %v1657_v42 }
 0x154   :  { %1529 = vmatprep.subr.mxu1 %v1657_v42 }
 0x155   :  { %1530 = vmatpush3.msra.mxu1 %v712_v11 }
 0x156   :  { %1531 = vmatprep.subr.mxu1 %v1657_v42 }
 0x157   :  { %1532 = vmatpush3.msra.mxu1 %v711_v12  ;;  %v1269_v12 = vsel %vm2026_vm7, 1.0, %v1657_v42  ;;  %vm2323_vm7 = vnez %v2302_v46 }
 0x158   :  { %1533 = vmatprep.subr.mxu1 %v1657_v42 }
 0x159   :  { %1534 = vmatpush3.msra.mxu1 %v710_v13  ;;  %v1270_v13 = vsel %vm2034_vm12, 1.0, %v1657_v42 }
 0x15a   :  { %1535 = vmatprep.subr.mxu1 %v1657_v42 }
 0x15b   :  { %1536 = vmatpush3.msra.mxu1 %v709_v14  ;;  %v1271_v14 = vsel %vm2040_vm0, 1.0, %v1657_v42 }
 0x15c   :  { %1537 = vmatprep.subr.mxu1 %v1657_v42 }
 0x15d   :  { %1538 = vmatpush3.msra.mxu1 %v708_v15 }
 0x15e   :  { %1539 = vmatprep.subr.mxu1 %v1657_v42 }
 0x15f   :  { %1540 = vmatpush3.msra.mxu1 %v707_v16  ;;  %v1273_v16 = vsel %vm2323_vm7, 1.0, %v1657_v42 }
 0x160   :  { %1541 = vmatprep.subr.mxu1 %v1657_v42 }
 0x161   :  { %1542 = vmatpush3.msra.mxu1 %v706_v17 }
 0x162   :  { %1543 = vmatprep.subr.mxu1 %v1657_v42 }
 0x163   :  { %1544 = vmatpush3.msra.mxu1 %v705_v18 }
 0x164   :  { %1546 = vmatmul.mubr.msk.f32.vlgmr.msra.gmra.mxu1 %vm1922_vm4, %v1659_v59  ;;  %vm2020_vm4 = vmand %vm558_vm2, %vm575_vm3  ;;  %vm562_vm2 = vcmp.ge.s32.totalorder %v545_v38, %v1983_v19  ;;  %vm579_vm3 = vcmp.lt.s32.totalorder %v545_v38, %v1986_v20  ;;  %v552_v59 = vadd.s32 120, %v1870_v58 }
 0x165   :  { %1550 = vmatprep.mubr.msk.f32.mxu1 %vm2282_vm10, %v1264_v22  ;;  %vm2048_vm5 = vmand %vm562_vm2, %vm579_vm3  ;;  %vm565_vm3 = vcmp.ge.s32.totalorder %v548_v50, %v1983_v19  ;;  %vm582_vm10 = vcmp.lt.s32.totalorder %v548_v50, %v1986_v20  ;;  %v1268_v11 = vsel %vm2020_vm4, 1.0, %v1657_v42 }
 0x166   :  { %vm2062_vm2 = vmand %vm564_vm13, %vm581_vm15  ;;  %vm567_vm15 = vcmp.ge.s32.totalorder %v550_v62, %v1983_v19  ;;  %v1272_v15 = vsel %vm2048_vm5, 1.0, %v1657_v42 }
 0x167   :  { %v2304_v54 = vsel %vm2062_vm2, 4294967295, %v2303_v54  ;;  %vm2068_vm6 = vmand %vm565_vm3, %vm582_vm10  ;;  %vm584_vm2 = vcmp.lt.s32.totalorder %v550_v62, %v1986_v20  ;;  %vm568_vm3 = vcmp.ge.s32.totalorder %v551_v48, %v1983_v19 }
 0x168   :  { %v2306_v6 = vsel %vm2068_vm6, 4294967295, %v2305_v6  ;;  %vm2076_vm13 = vmand %vm566_vm8, %vm583_vm9  ;;  %vm585_vm6 = vcmp.lt.s32.totalorder %v551_v48, %v1986_v20  ;;  %vm569_vm8 = vcmp.ge.s32.totalorder %v552_v59, %v1983_v19  ;;  %vm2324_vm12 = vnez %v2304_v54 }
 0x169   :  { %v2308_v1 = vsel %vm2076_vm13, 4294967295, %v2307_v1  ;;  %vm2082_vm10 = vmand %vm567_vm15, %vm584_vm2  ;;  %vm586_vm13 = vcmp.lt.s32.totalorder %v552_v59, %v1986_v20  ;;  %vm847_vm15 = vcmask 1041408   ;;  %v1274_v17 = vsel %vm2324_vm12, 1.0, %v1657_v42 }
 0x16a   :  { %vm2090_vm9 = vmand %vm568_vm3, %vm585_vm6  ;;  %vm2315_vm6 = vcmask 15360   ;;  %vm2327_vm0 = vnez %v2306_v6  ;;  %vm2328_vm5 = vnez %v2308_v1  ;;  %v1277_v20 = vsel %vm2082_vm10, 1.0, %v1657_v42 }
 0x16b   :  { %vm2096_vm2 = vmand %vm569_vm8, %vm586_vm13  ;;  %v1275_v18 = vsel %vm2327_vm0, 1.0, %v1657_v42  ;;  %v1276_v19 = vsel %vm2328_vm5, 1.0, %v1657_v42  ;;  %v1278_v21 = vsel %vm2090_vm9, 1.0, %v1657_v42 }
 0x16c   :  { %vm2316_vm13 = vmmov %vm2315_vm6  ;;  %v1279_v22 = vsel %vm2096_vm2, 1.0, %v1657_v42 }
 0x16d   :  { %vm2317_vm11 = vmmov %vm2315_vm6 }
 0x16e   :  { %vm2318_vm3 = vmmov %vm2315_vm6 }
 0x16f   :  { %vm2319_vm14 = vmmov %vm2318_vm3 }
 0x170   :  { %vm2320_vm8 = vmmov %vm2318_vm3 }
 0x171   :  { %vm2321_vm1 = vmmov %vm2318_vm3 }
 0x172   :  { %vm2322_vm4 = vmmov %vm2321_vm1 }
 0x173   :  { %vm2334_vm10 = vmmov %vm2321_vm1 }
 0x174   :  { %vm2335_vm9 = vmmov %vm2321_vm1 }
 0x175   :  { %vm2336_vm2 = vmmov %vm2321_vm1 }
 0x176   :  { %vm2337_vm7 = vmmov %vm2321_vm1 }
 0x177   :  { %vm2338_vm12 = vmmov %vm2321_vm1 }
 0x178   :  { %vm2341_vm0 = vmmov %vm2321_vm1 }
 0x179   :  { %vm2342_vm5 = vmmov %vm2341_vm0 }
 0x204   :  { %v701_v60 = vpop.f32.mrf.mxu1 }
 0x205   :  { %v791_v63 = vmul.f32 0.015625, %v701_v60 }
 0x206   :  { %v1512_v58 = vpop.f32.mrf.mxu1 }
 0x207   :  { %1548 = vmatprep.subr.msk.mxu1 %vm847_vm15, %v791_v63  ;;  %v793_v25 = vmul.f32 %v791_v63, %v791_v63 }
 0x208   :  { %1549 = vmatpush3.msk.msra.mxu1 %vm847_vm15, %v791_v63 }
 0x209   :  { %1551 = vmatmul.mubr.msk.f32.vlgmr.msra.gmra.mxu1 %vm2315_vm6, %v1265_v4  ;;  %vm2325_vm6 = vmmov %vm2321_vm1 }
 0x20a   :  { %1553 = vmatprep.mubr.msk.f32.mxu1 %vm2316_vm13, %v1266_v9  ;;  %vm2326_vm13 = vmmov %vm2321_vm1 }
 0x20d   :  { %1554 = vmatmul.mubr.msk.f32.gmra.mxu1 %vm2317_vm11, %v1267_v10  ;;  %vm2329_vm11 = vmmov %vm2321_vm1 }
 0x20e   :  { %1556 = vmatprep.mubr.msk.f32.mxu1 %vm2318_vm3, %v1268_v11  ;;  %vm2330_vm3 = vmmov %vm2321_vm1 }
 0x211   :  { %1557 = vmatmul.mubr.msk.f32.gmra.mxu1 %vm2319_vm14, %v1269_v12  ;;  %vm2331_vm14 = vmmov %vm2321_vm1 }
 0x212   :  { %1559 = vmatprep.mubr.msk.f32.mxu1 %vm2320_vm8, %v1270_v13  ;;  %vm2332_vm8 = vmmov %vm2321_vm1 }
 0x215   :  { %1560 = vmatmul.mubr.msk.f32.gmra.mxu1 %vm2321_vm1, %v1271_v14 }
 0x216   :  { %1562 = vmatprep.mubr.msk.f32.mxu1 %vm2322_vm4, %v1272_v15  ;;  %vm2333_vm4 = vmmov %vm2321_vm1 }
 0x219   :  { %1563 = vmatmul.mubr.msk.f32.gmra.mxu1 %vm2325_vm6, %v1273_v16  ;;  %vm2339_vm6 = vmmov %vm2321_vm1 }
 0x21a   :  { %1565 = vmatprep.mubr.msk.f32.mxu1 %vm2326_vm13, %v1274_v17  ;;  %vm2340_vm13 = vmmov %vm2321_vm1 }
 0x21d   :  { %1566 = vmatmul.mubr.msk.f32.gmra.mxu1 %vm2329_vm11, %v1275_v18  ;;  %vm2343_vm11 = vmmov %vm2341_vm0 }
 0x21e   :  { %1568 = vmatprep.mubr.msk.f32.mxu1 %vm2330_vm3, %v1276_v19  ;;  %vm2345_vm3 = vmmov %vm2341_vm0 }
 0x221   :  { %1569 = vmatmul.mubr.msk.f32.gmra.mxu1 %vm2331_vm14, %v1277_v20  ;;  %vm2346_vm14 = vmmov %vm2341_vm0 }
 0x222   :  { %1571 = vmatprep.mubr.msk.f32.mxu1 %vm2332_vm8, %v1278_v21  ;;  %vm2347_vm8 = vmmov %vm2341_vm0 }
 0x224   :  { %v787_v23 = vpop.f32.mrf.mxu1 }
 0x225   :  { %v792_v24 = vmul.f32 0.015625, %v787_v23  ;;  %1572 = vmatmul.mubr.msk.f32.gmra.mxu1 %vm2321_vm1, %v1279_v22  ;;  %vm1192_vm1 = vcmask 523264  }
 0x226   :  { %v1547_v26 = vpop.f32.mrf.mxu1  ;;  %1594 = vmatprep.mubr.msk.f32.mxu1 %vm2333_vm4, %v1276_v19 }
 0x227   :  { %v794_v27 = vsub.f32 %v792_v24, %v793_v25 }
 0x229   :  { %v795_v28 = vmax.f32 %v794_v27, 0.0 }
 0x22b   :  { %v796_v29 = vadd.f32 1e-05, %v795_v28 }
 0x22d   :  { %1655 = vrsqrt.f32 %v796_v29 }
 0x23a   :  { %v1656_v30 = vpop.eup %1655 }
 0x23b   :  { %1574 = vmatprep.subr.msk.mxu0 %vm847_vm15, %v1656_v30  ;;  %1600 = vmatprep.subr.msk.mxu1 %vm847_vm15, %v1656_v30 }
 0x23c   :  { %1575 = vmatpush3.msk.msra.mxu0 %vm847_vm15, %v1656_v30  ;;  %1601 = vmatpush3.msk.msra.mxu1 %vm847_vm15, %v1656_v30  ;;  %vm2344_vm15 = vmmov %vm2341_vm0 }
 0x23d   :  { %1577 = vmatmul.mubr.msk.f32.vlgmr.msra.gmra.mxu0 %vm2334_vm10, %v1265_v4  ;;  %1595 = vmatmul.mubr.msk.f32.vlgmr.msra.gmra.mxu1 %vm2335_vm9, %v1277_v20 }
 0x23e   :  { %1579 = vmatprep.mubr.msk.f32.mxu0 %vm2336_vm2, %v1266_v9  ;;  %1597 = vmatprep.mubr.msk.f32.mxu1 %vm2337_vm7, %v1278_v21 }
 0x241   :  { %1580 = vmatmul.mubr.msk.f32.gmra.mxu0 %vm2338_vm12, %v1267_v10  ;;  %1598 = vmatmul.mubr.msk.f32.gmra.mxu1 %vm2339_vm6, %v1279_v22 }
 0x242   :  { %1582 = vmatprep.mubr.msk.f32.mxu0 %vm2340_vm13, %v1268_v11 }
 0x245   :  { %1583 = vmatmul.mubr.msk.f32.gmra.mxu0 %vm2341_vm0, %v1269_v12 }
 0x246   :  { %1585 = vmatprep.mubr.msk.f32.mxu0 %vm2342_vm5, %v1270_v13 }
 0x249   :  { %1586 = vmatmul.mubr.msk.f32.gmra.mxu0 %vm2343_vm11, %v1271_v14 }
 0x24a   :  { %1588 = vmatprep.mubr.msk.f32.mxu0 %vm2344_vm15, %v1272_v15 }
 0x24d   :  { %1589 = vmatmul.mubr.msk.f32.gmra.mxu0 %vm2345_vm3, %v1273_v16 }
 0x24e   :  { %1591 = vmatprep.mubr.msk.f32.mxu0 %vm2346_vm14, %v1274_v17 }
 0x251   :  { %1592 = vmatmul.mubr.msk.f32.gmra.mxu0 %vm2347_vm8, %v1275_v18 }
 0x2c9   :  { %v1552_v42 = vpop.f32.mrf.mxu1 }
 0x2ca   :  { %v1145_v1 = vsub.f32 %v1913_v55, %v1552_v42 }
 0x2cb   :  { %v917_v31 = vpop.f32.mrf.mxu1 }
 0x2cc   :  { %v1144_v45 = vsub.f32 %v1919_v51, %v917_v31 }
 0x2cd   :  { %v1555_v32 = vpop.f32.mrf.mxu1 }
 0x2ce   :  { %v1147_v58 = vsub.f32 %v1899_v5, %v1555_v32 }
 0x2cf   :  { %v927_v33 = vpop.f32.mrf.mxu1 }
 0x2d1   :  { %v1558_v35 = vpop.f32.mrf.mxu1 }
 0x2d3   :  { %v937_v36 = vpop.f32.mrf.mxu1 }
 0x2d4   :  { %v1148_v23 = vsub.f32 %v1891_v61, %v937_v36 }
 0x2d5   :  { %v2181_v38 = vpop.f32.mrf.mxu1 }
 0x2d6   :  { %v1151_v27 = vsub.f32 %v1874_v8, %v2181_v38 }
 0x2d7   :  { %v2183_v40 = vpop.f32.mrf.mxu1 }
 0x2d8   :  { %v1150_v30 = vsub.f32 %v1879_v3, %v2183_v40 }
 0x2d9   :  { %v2185_v43 = vpop.f32.mrf.mxu1 }
 0x2da   :  { %v1153_v32 = vsub.f32 %v1862_v53, %v2185_v43 }
 0x2db   :  { %v2187_v46 = vpop.f32.mrf.mxu1 }
 0x2dc   :  { %v1152_v3 = vsub.f32 %v1866_v57, %v2187_v46 }
 0x2dd   :  { %v2189_v49 = vpop.f32.mrf.mxu1 }
 0x2de   :  { %v1155_v53 = vsub.f32 %v1854_v44, %v2189_v49 }
 0x2df   :  { %v2191_v50 = vpop.f32.mrf.mxu1 }
 0x2e0   :  { %v1154_v57 = vsub.f32 %v1858_v47, %v2191_v50 }
 0x2e1   :  { %v1570_v54 = vpop.f32.mrf.mxu1 }
 0x2e2   :  { %v1157_v52 = vsub.f32 %v1846_v39, %v1570_v54  ;;  %v1146_v39 = vsub.f32 %v1905_v7, %v927_v33  ;;  %v1149_v7 = vsub.f32 %v1885_v2, %v1558_v35 }
 0x2e3   :  { %v977_v6 = vpop.f32.mrf.mxu1 }
 0x2e4   :  { %v1156_v56 = vsub.f32 %v1850_v41, %v977_v6 }
 0x2e5   :  { %v1573_v0 = vpop.f32.mrf.mxu1 }
 0x2e6   :  { %v1159_v4 = vsub.f32 %v1840_v34, %v1573_v0 }
 0x2e7   :  { %v987_v62 = vpop.f32.mrf.mxu1 }
 0x2e8   :  { %v1158_v14 = vsub.f32 %v1842_v37, %v987_v62 }
 0x2fd   :  { %v1578_v48 = vpop.f32.mrf.mxu0  ;;  %v1596_v59 = vpop.f32.mrf.mxu1 }
 0x2fe   :  { %v1161_v60 = vmul.f32 %v1578_v48, %v1145_v1  ;;  %v1173_v63 = vmul.f32 %v1596_v59, %v1157_v52 }
 0x2ff   :  { %v1065_v9 = vpop.f32.mrf.mxu0  ;;  %v1125_v10 = vpop.f32.mrf.mxu1 }
 0x300   :  { %v1177_v11 = vmax.f32 %v1161_v60, 0.0  ;;  %v1189_v12 = vmax.f32 %v1173_v63, 0.0  ;;  %v1160_v55 = vmul.f32 %v1144_v45, %v1065_v9  ;;  %v1172_v13 = vmul.f32 %v1156_v56, %v1125_v10 }
 0x301   :  { %v1581_v51 = vpop.f32.mrf.mxu0  ;;  %v1599_v15 = vpop.f32.mrf.mxu1 }
 0x302   :  { %1194 = vst.msk [vmem:[%s2281_s2 + $0x8] sm:$0xff] %vm1192_vm1, %v1177_v11  ;;  %1206 = vst.msk [vmem:[%s2281_s2 + $0x68] sm:$0xff] %vm1192_vm1, %v1189_v12  ;;  %v1176_v34 = vmax.f32 %v1160_v55, 0.0  ;;  %v1188_v41 = vmax.f32 %v1172_v13, 0.0  ;;  %v1163_v5 = vmul.f32 %v1581_v51, %v1147_v58  ;;  %v1175_v16 = vmul.f32 %v1599_v15, %v1159_v4 }
 0x303   :  { %v1075_v17 = vpop.f32.mrf.mxu0  ;;  %v1135_v37 = vpop.f32.mrf.mxu1 }
 0x304   :  { %1193 = vst.msk [vmem:[%s2281_s2] sm:$0xff] %vm1192_vm1, %v1176_v34  ;;  %1205 = vst.msk [vmem:[%s2281_s2 + $0x60] sm:$0xff] %vm1192_vm1, %v1188_v41  ;;  %v1179_v18 = vmax.f32 %v1163_v5, 0.0  ;;  %v1191_v19 = vmax.f32 %v1175_v16, 0.0  ;;  %v1162_v20 = vmul.f32 %v1146_v39, %v1075_v17  ;;  %v1174_v21 = vmul.f32 %v1158_v14, %v1135_v37 }
 0x305   :  { %v1584_v22 = vpop.f32.mrf.mxu0 }
 0x306   :  { %1196 = vst.msk [vmem:[%s2281_s2 + $0x18] sm:$0xff] %vm1192_vm1, %v1179_v18  ;;  %1208 = vst.msk [vmem:[%s2281_s2 + $0x78] sm:$0xff] %vm1192_vm1, %v1191_v19  ;;  %v1178_v2 = vmax.f32 %v1162_v20, 0.0  ;;  %v1190_v24 = vmax.f32 %v1174_v21, 0.0  ;;  %v1165_v25 = vmul.f32 %v1584_v22, %v1149_v7 }
 0x307   :  { %v1085_v26 = vpop.f32.mrf.mxu0 }
 0x308   :  { %1195 = vst.msk [vmem:[%s2281_s2 + $0x10] sm:$0xff] %vm1192_vm1, %v1178_v2  ;;  %1207 = vst.msk [vmem:[%s2281_s2 + $0x70] sm:$0xff] %vm1192_vm1, %v1190_v24  ;;  %v1181_v61 = vmax.f32 %v1165_v25, 0.0  ;;  %v1164_v28 = vmul.f32 %v1148_v23, %v1085_v26 }
 0x309   :  { %v1587_v29 = vpop.f32.mrf.mxu0 }
 0x30a   :  { %1198 = vst.msk [vmem:[%s2281_s2 + $0x28] sm:$0xff] %vm1192_vm1, %v1181_v61  ;;  %v1180_v8 = vmax.f32 %v1164_v28, 0.0  ;;  %v1167_v42 = vmul.f32 %v1587_v29, %v1151_v27 }
 0x30b   :  { %v1095_v31 = vpop.f32.mrf.mxu0 }
 0x30c   :  { %1197 = vst.msk [vmem:[%s2281_s2 + $0x20] sm:$0xff] %vm1192_vm1, %v1180_v8  ;;  %v1183_v33 = vmax.f32 %v1167_v42, 0.0  ;;  %v1166_v35 = vmul.f32 %v1150_v30, %v1095_v31 }
 0x30d   :  { %v1590_v36 = vpop.f32.mrf.mxu0 }
 0x30e   :  { %1200 = vst.msk [vmem:[%s2281_s2 + $0x38] sm:$0xff] %vm1192_vm1, %v1183_v33  ;;  %v1182_v38 = vmax.f32 %v1166_v35, 0.0  ;;  %v1169_v40 = vmul.f32 %v1590_v36, %v1153_v32 }
 0x30f   :  { %v1105_v54 = vpop.f32.mrf.mxu0 }
 0x310   :  { %1199 = vst.msk [vmem:[%s2281_s2 + $0x30] sm:$0xff] %vm1192_vm1, %v1182_v38  ;;  %v1185_v43 = vmax.f32 %v1169_v40, 0.0  ;;  %v1168_v6 = vmul.f32 %v1152_v3, %v1105_v54 }
 0x311   :  { %v1593_v0 = vpop.f32.mrf.mxu0 }
 0x312   :  { %1202 = vst.msk [vmem:[%s2281_s2 + $0x48] sm:$0xff] %vm1192_vm1, %v1185_v43  ;;  %v1184_v46 = vmax.f32 %v1168_v6, 0.0  ;;  %v1171_v62 = vmul.f32 %v1593_v0, %v1155_v53 }
 0x313   :  { %v1115_v1 = vpop.f32.mrf.mxu0 }
 0x314   :  { %1201 = vst.msk [vmem:[%s2281_s2 + $0x40] sm:$0xff] %vm1192_vm1, %v1184_v46  ;;  %v1187_v44 = vmax.f32 %v1171_v62, 0.0  ;;  %v1170_v49 = vmul.f32 %v1154_v57, %v1115_v1 }
 0x316   :  { %1204 = vst.msk [vmem:[%s2281_s2 + $0x58] sm:$0xff] %vm1192_vm1, %v1187_v44  ;;  %v1186_v47 = vmax.f32 %v1170_v49, 0.0 }
 0x318   :  { %1203 = vst.msk [vmem:[%s2281_s2 + $0x50] sm:$0xff] %vm1192_vm1, %v1186_v47 }

// kernel: content_encoder_forward.5
= control target key start
LH: loop header
LB: loop body
LE: loop exit
PB: predicated region body
PF: predicated region fallthrough
CT: control target
= control target key end

     0   :  { %vm340_vm0 = vcmask 1043456   ;;  %vm341_vm1 = vcmask 1044480   ;;  %vm243_vm2 = vcmask 72704   ;;  %v3506_v1 = vmov 65535   ;;  %s5128_s1 = inlined_call_operand.vmem [shape: bf16[9,32], index: 1, kind: input, shape index: {}]   ;;  %s5129_s0 = inlined_call_operand.vmem [shape: bf16[512,9], index: 0, kind: input, shape index: {}]   ;;  %s5130_s2 = inlined_call_operand.vmem [shape: f32[512,32], index: 2, kind: output, shape index: {}]  }
   0x1   :  { %v3471_v0 = vld [vmem:[%s5128_s1] sm:$0x1f]   ;;  %v342_v2 = vsel %vm340_vm0, 4294967295, %v3506_v1  ;;  %v3473_v6 = vld [vmem:[%s5129_s0 + $0x8] sm:$0xff]   ;;  %v3474_v7 = vld [vmem:[%s5129_s0 + $0x10] sm:$0xff]   ;;  %v636_v37 = vlaneseq  ;;  %v5133_v44 = vmov 1.0  }
   0x2   :  { %v3472_v3 = vld [vmem:[%s5129_s0] sm:$0xff]   ;;  %v343_v4 = vsel %vm341_vm1, %v342_v2, 0  ;;  %v3475_v8 = vld [vmem:[%s5129_s0 + $0x18] sm:$0xff]   ;;  %v3477_v10 = vld [vmem:[%s5129_s0 + $0x28] sm:$0xff]   ;;  %v5205_v45 = vmov 0  ;;  %v5212_v62 = vmov 0 }
   0x3   :  { %v345_v5 = vand.u32 %v3471_v0, %v343_v4  ;;  %3208 = vmatprep.mubr.msk.bf16.mxu0 %vm243_vm2, %v3472_v3  ;;  %v3476_v9 = vld [vmem:[%s5129_s0 + $0x20] sm:$0xff]   ;;  %v3478_v11 = vld [vmem:[%s5129_s0 + $0x30] sm:$0xff]   ;;  %v3479_v12 = vld [vmem:[%s5129_s0 + $0x38] sm:$0xff]   ;;  %v3655_v38 = vshrl.u32 %v636_v37, 7  ;;  %v3657_v39 = vand.u32 127, %v636_v37 }
   0x4   :  { %v3480_v13 = vld [vmem:[%s5129_s0 + $0x40] sm:$0xff]   ;;  %v3481_v14 = vld [vmem:[%s5129_s0 + $0x48] sm:$0xff]   ;;  %v3482_v15 = vld [vmem:[%s5129_s0 + $0x50] sm:$0xff]  }
   0x5   :  { %3206 = vmatprep.subr.bf16.mxu0 %v345_v5  ;;  %v3483_v16 = vld [vmem:[%s5129_s0 + $0x58] sm:$0xff]   ;;  %v3484_v17 = vld [vmem:[%s5129_s0 + $0x60] sm:$0xff]   ;;  %v3485_v18 = vld [vmem:[%s5129_s0 + $0x68] sm:$0xff]   ;;  %5201 = vst [vmem:[#allocation2_spill] sm:$0xff] %v3655_v38  ;;  %v643_v40 = vmul.u32 256, %v3655_v38  ;;  %v638_v41 = vadd.s32 128, %v3657_v39 }
   0x6   :  { %3207 = vmatpush3.bf16.msra.mxu0 %v345_v5  ;;  %v3486_v19 = vld [vmem:[%s5129_s0 + $0x70] sm:$0xff]   ;;  %v3487_v20 = vld [vmem:[%s5129_s0 + $0x78] sm:$0xff]   ;;  %v3488_v21 = vld [vmem:[%s5129_s0 + $0x80] sm:$0xff]   ;;  %5202 = vst [vmem:[#allocation3_spill] sm:$0xff] %v3657_v39  ;;  %v640_v59 = vadd.s32 384, %v3657_v39  ;;  %v639_v60 = vadd.s32 256, %v3657_v39 }
   0x7   :  { %v3489_v22 = vld [vmem:[%s5129_s0 + $0x88] sm:$0xff]   ;;  %v3490_v23 = vld [vmem:[%s5129_s0 + $0x90] sm:$0xff]   ;;  %v3491_v24 = vld [vmem:[%s5129_s0 + $0x98] sm:$0xff]   ;;  %v648_v42 = vadd.s32 256, %v643_v40  ;;  %vm645_vm3 = vcmp.ge.s32.totalorder %v638_v41, %v643_v40  ;;  %vm644_vm6 = vcmp.ge.s32.totalorder %v3657_v39, %v643_v40 }
   0x8   :  { %v3492_v25 = vld [vmem:[%s5129_s0 + $0xa0] sm:$0xff]   ;;  %v3493_v26 = vld [vmem:[%s5129_s0 + $0xa8] sm:$0xff]   ;;  %v3494_v27 = vld [vmem:[%s5129_s0 + $0xb0] sm:$0xff]   ;;  %vm647_vm9 = vcmp.ge.s32.totalorder %v640_v59, %v643_v40  ;;  %vm646_vm12 = vcmp.ge.s32.totalorder %v639_v60, %v643_v40 }
   0x9   :  { %3209 = vmatmul.mubr.msk.bf16.vlgmr.msra.gmra.mxu0 %vm243_vm2, %v3473_v6  ;;  %v3495_v28 = vld [vmem:[%s5129_s0 + $0xb8] sm:$0xff]   ;;  %v3496_v29 = vld [vmem:[%s5129_s0 + $0xc0] sm:$0xff]   ;;  %v3497_v30 = vld [vmem:[%s5129_s0 + $0xc8] sm:$0xff]   ;;  %vm650_vm4 = vcmp.lt.s32.totalorder %v638_v41, %v648_v42  ;;  %vm649_vm7 = vcmp.lt.s32.totalorder %v3657_v39, %v648_v42  ;;  %vm652_vm10 = vcmp.lt.s32.totalorder %v640_v59, %v648_v42  ;;  %vm651_vm13 = vcmp.lt.s32.totalorder %v639_v60, %v648_v42 }
   0xa   :  { %3212 = vmatprep.mubr.msk.bf16.mxu0 %vm243_vm2, %v3474_v7  ;;  %v3498_v31 = vld [vmem:[%s5129_s0 + $0xd0] sm:$0xff]   ;;  %v3499_v32 = vld [vmem:[%s5129_s0 + $0xd8] sm:$0xff]   ;;  %v3500_v33 = vld [vmem:[%s5129_s0 + $0xe0] sm:$0xff]  }
   0xb   :  { %v3501_v34 = vld [vmem:[%s5129_s0 + $0xe8] sm:$0xff]   ;;  %v3502_v35 = vld [vmem:[%s5129_s0 + $0xf0] sm:$0xff]   ;;  %v3503_v36 = vld [vmem:[%s5129_s0 + $0xf8] sm:$0xff]  }
   0xc   :  { %vm3661_vm5 = vmand %vm645_vm3, %vm650_vm4 }
   0xd   :  { %2765 = vmatprep.mubr.msk.f32.mxu1 %vm3661_vm5, %v5133_v44  ;;  %vm3670_vm8 = vmand %vm644_vm6, %vm649_vm7 }
   0xe   :  { %v5206_v45 = vsel %vm3670_vm8, 4294967295, %v5205_v45  ;;  %vm3704_vm11 = vmand %vm647_vm9, %vm652_vm10 }
   0xf   :  { %5207 = vst [vmem:[#allocation4_spill] sm:$0xff] %v5206_v45  ;;  %v5213_v62 = vsel %vm3704_vm11, 4294967295, %v5212_v62  ;;  %vm3710_vm14 = vmand %vm646_vm12, %vm651_vm13 }
  0x10   :  { %5214 = vst [vmem:[#allocation9_spill] sm:$0xff] %v5213_v62 }
  0x11   :  { %3213 = vmatmul.mubr.msk.bf16.gmra.mxu0 %vm243_vm2, %v3475_v8 }
  0x12   :  { %3216 = vmatprep.mubr.msk.bf16.mxu0 %vm243_vm2, %v3476_v9 }
  0x19   :  { %3217 = vmatmul.mubr.msk.bf16.gmra.mxu0 %vm243_vm2, %v3477_v10 }
  0x1a   :  { %3220 = vmatprep.mubr.msk.bf16.mxu0 %vm243_vm2, %v3478_v11 }
  0x21   :  { %3221 = vmatmul.mubr.msk.bf16.gmra.mxu0 %vm243_vm2, %v3479_v12 }
  0x22   :  { %3224 = vmatprep.mubr.msk.bf16.mxu0 %vm243_vm2, %v3480_v13 }
  0x29   :  { %3225 = vmatmul.mubr.msk.bf16.gmra.mxu0 %vm243_vm2, %v3481_v14 }
  0x2a   :  { %3228 = vmatprep.mubr.msk.bf16.mxu0 %vm243_vm2, %v3482_v15 }
  0x31   :  { %3229 = vmatmul.mubr.msk.bf16.gmra.mxu0 %vm243_vm2, %v3483_v16 }
  0x32   :  { %3232 = vmatprep.mubr.msk.bf16.mxu0 %vm243_vm2, %v3484_v17 }
  0x39   :  { %3233 = vmatmul.mubr.msk.bf16.gmra.mxu0 %vm243_vm2, %v3485_v18 }
  0x3a   :  { %3236 = vmatprep.mubr.msk.bf16.mxu0 %vm243_vm2, %v3486_v19 }
  0x41   :  { %3237 = vmatmul.mubr.msk.bf16.gmra.mxu0 %vm243_vm2, %v3487_v20 }
  0x42   :  { %3240 = vmatprep.mubr.msk.bf16.mxu0 %vm243_vm2, %v3488_v21 }
  0x49   :  { %3241 = vmatmul.mubr.msk.bf16.gmra.mxu0 %vm243_vm2, %v3489_v22 }
  0x4a   :  { %3244 = vmatprep.mubr.msk.bf16.mxu0 %vm243_vm2, %v3490_v23 }
  0x51   :  { %3245 = vmatmul.mubr.msk.bf16.gmra.mxu0 %vm243_vm2, %v3491_v24 }
  0x52   :  { %3248 = vmatprep.mubr.msk.bf16.mxu0 %vm243_vm2, %v3492_v25 }
  0x59   :  { %3249 = vmatmul.mubr.msk.bf16.gmra.mxu0 %vm243_vm2, %v3493_v26 }
  0x5a   :  { %3252 = vmatprep.mubr.msk.bf16.mxu0 %vm243_vm2, %v3494_v27 }
  0x61   :  { %3253 = vmatmul.mubr.msk.bf16.gmra.mxu0 %vm243_vm2, %v3495_v28 }
  0x62   :  { %3256 = vmatprep.mubr.msk.bf16.mxu0 %vm243_vm2, %v3496_v29 }
  0x69   :  { %3257 = vmatmul.mubr.msk.bf16.gmra.mxu0 %vm243_vm2, %v3497_v30 }
  0x6a   :  { %3260 = vmatprep.mubr.msk.bf16.mxu0 %vm243_vm2, %v3498_v31 }
  0x71   :  { %3261 = vmatmul.mubr.msk.bf16.gmra.mxu0 %vm243_vm2, %v3499_v32 }
  0x72   :  { %3264 = vmatprep.mubr.msk.bf16.mxu0 %vm243_vm2, %v3500_v33 }
  0x79   :  { %3265 = vmatmul.mubr.msk.bf16.gmra.mxu0 %vm243_vm2, %v3501_v34 }
  0x7a   :  { %3268 = vmatprep.mubr.msk.bf16.mxu0 %vm243_vm2, %v3502_v35 }
  0x81   :  { %3269 = vmatmul.mubr.msk.bf16.gmra.mxu0 %vm243_vm2, %v3503_v36  ;;  %vm1401_vm2 = vcmask 15360  }
  0xc9   :  { %v3674_v46 = vpop.f32.mrf.mxu0 }
  0xcb   :  { %v3676_v47 = vpop.f32.mrf.mxu0 }
  0xcc   :  { %5208 = vst [vmem:[#allocation5_spill] sm:$0xff] %v3676_v47 }
  0xcd   :  { %v3678_v48 = vpop.f32.mrf.mxu0 }
  0xcf   :  { %v3680_v49 = vpop.f32.mrf.mxu0 }
  0xd1   :  { %v3682_v50 = vpop.f32.mrf.mxu0 }
  0xd3   :  { %v3684_v51 = vpop.f32.mrf.mxu0 }
  0xd5   :  { %v3686_v52 = vpop.f32.mrf.mxu0 }
  0xd7   :  { %v3688_v53 = vpop.f32.mrf.mxu0 }
  0xd9   :  { %v3690_v54 = vpop.f32.mrf.mxu0 }
  0xda   :  { %5209 = vst [vmem:[#allocation6_spill] sm:$0xff] %v3690_v54 }
  0xdb   :  { %v3692_v55 = vpop.f32.mrf.mxu0 }
  0xdd   :  { %v3694_v56 = vpop.f32.mrf.mxu0 }
  0xdf   :  { %v3696_v57 = vpop.f32.mrf.mxu0 }
  0xe1   :  { %v3698_v58 = vpop.f32.mrf.mxu0 }
  0xe2   :  { %5210 = vst [vmem:[#allocation7_spill] sm:$0xff] %v3698_v58 }
  0xe3   :  { %v3702_v61 = vpop.f32.mrf.mxu0 }
  0xe4   :  { %5211 = vst [vmem:[#allocation8_spill] sm:$0xff] %v3702_v61 }
  0xe5   :  { %v3708_v63 = vpop.f32.mrf.mxu0 }
  0xe6   :  { %5215 = vst [vmem:[#allocation10_spill] sm:$0xff] %v3708_v63 }
  0xe7   :  { %v3714_v1 = vpop.f32.mrf.mxu0 }
  0xe8   :  { %5218 = vst [vmem:[#allocation11_spill] sm:$0xff] %v3714_v1 }
  0xe9   :  { %v3716_v2 = vpop.f32.mrf.mxu0 }
  0xea   :  { %5219 = vst [vmem:[#allocation12_spill] sm:$0xff] %v3716_v2 }
  0xeb   :  { %v3718_v3 = vpop.f32.mrf.mxu0 }
  0xec   :  { %5220 = vst [vmem:[#allocation13_spill] sm:$0xff] %v3718_v3 }
  0xed   :  { %v3720_v4 = vpop.f32.mrf.mxu0 }
  0xee   :  { %5221 = vst [vmem:[#allocation14_spill] sm:$0xff] %v3720_v4 }
  0xef   :  { %v3722_v5 = vpop.f32.mrf.mxu0 }
  0xf0   :  { %5222 = vst [vmem:[#allocation15_spill] sm:$0xff] %v3722_v5 }
  0xf1   :  { %v3724_v6 = vpop.f32.mrf.mxu0 }
  0xf2   :  { %5223 = vst [vmem:[#allocation16_spill] sm:$0xff] %v3724_v6 }
  0xf3   :  { %v3726_v7 = vpop.f32.mrf.mxu0 }
  0xf4   :  { %5224 = vst [vmem:[#allocation17_spill] sm:$0xff] %v3726_v7 }
  0xf5   :  { %v3728_v8 = vpop.f32.mrf.mxu0 }
  0xf6   :  { %5225 = vst [vmem:[#allocation18_spill] sm:$0xff] %v3728_v8 }
  0xf7   :  { %v3730_v9 = vpop.f32.mrf.mxu0 }
  0xf8   :  { %5226 = vst [vmem:[#allocation19_spill] sm:$0xff] %v3730_v9 }
  0xf9   :  { %v3732_v10 = vpop.f32.mrf.mxu0 }
  0xfa   :  { %5227 = vst [vmem:[#allocation20_spill] sm:$0xff] %v3732_v10 }
  0xfb   :  { %v3734_v11 = vpop.f32.mrf.mxu0 }
  0xfc   :  { %5228 = vst [vmem:[#allocation21_spill] sm:$0xff] %v3734_v11 }
  0xfd   :  { %v3736_v12 = vpop.f32.mrf.mxu0 }
  0xfe   :  { %5229 = vst [vmem:[#allocation22_spill] sm:$0xff] %v3736_v12  ;;  %v1217_v43 = vmul.f32 %v3736_v12, %v3736_v12 }
  0xff   :  { %v3738_v13 = vpop.f32.mrf.mxu0 }
 0x100   :  { %5230 = vst [vmem:[#allocation23_spill] sm:$0xff] %v3738_v13 }
 0x101   :  { %v3740_v14 = vpop.f32.mrf.mxu0 }
 0x102   :  { %5231 = vst [vmem:[#allocation24_spill] sm:$0xff] %v3740_v14 }
 0x103   :  { %v3742_v15 = vpop.f32.mrf.mxu0 }
 0x104   :  { %5232 = vst [vmem:[#allocation25_spill] sm:$0xff] %v3742_v15 }
 0x105   :  { %v3744_v16 = vpop.f32.mrf.mxu0 }
 0x106   :  { %5233 = vst [vmem:[#allocation26_spill] sm:$0xff] %v3744_v16  ;;  %2936 = vmatprep.subr.mxu1 %v3744_v16 }
 0x107   :  { %v3747_v17 = vpop.f32.mrf.mxu0  ;;  %2937 = vmatpush3.msra.mxu1 %v3708_v63 }
 0x108   :  { %5234 = vst [vmem:[#allocation27_spill] sm:$0xff] %v3747_v17  ;;  %2938 = vmatprep.subr.mxu1 %v3740_v14 }
 0x109   :  { %v3751_v18 = vpop.f32.mrf.mxu0  ;;  %2939 = vmatpush3.msra.mxu1 %v3698_v58 }
 0x10a   :  { %5235 = vst [vmem:[#allocation28_spill] sm:$0xff] %v3751_v18  ;;  %2940 = vmatprep.subr.mxu1 %v3747_v17 }
 0x10b   :  { %v3755_v19 = vpop.f32.mrf.mxu0  ;;  %2941 = vmatpush3.msra.mxu1 %v3714_v1 }
 0x10c   :  { %5236 = vst [vmem:[#allocation29_spill] sm:$0xff] %v3755_v19  ;;  %2942 = vmatprep.subr.mxu1 %v3742_v15 }
 0x10d   :  { %v3759_v20 = vpop.f32.mrf.mxu0  ;;  %2943 = vmatpush3.msra.mxu1 %v3702_v61 }
 0x10e   :  { %5237 = vst [vmem:[#allocation30_spill] sm:$0xff] %v3759_v20  ;;  %2944 = vmatprep.subr.mxu1 %v3736_v12 }
 0x10f   :  { %v3763_v21 = vpop.f32.mrf.mxu0  ;;  %2945 = vmatpush3.msra.mxu1 %v3694_v56 }
 0x110   :  { %5238 = vst [vmem:[#allocation31_spill] sm:$0xff] %v3763_v21  ;;  %2946 = vmatprep.subr.mxu1 %v3732_v10 }
 0x111   :  { %v3767_v22 = vpop.f32.mrf.mxu0  ;;  %2947 = vmatpush3.msra.mxu1 %v3690_v54 }
 0x112   :  { %5239 = vst [vmem:[#allocation32_spill] sm:$0xff] %v3767_v22  ;;  %2948 = vmatprep.subr.mxu1 %v3738_v13 }
 0x113   :  { %v3771_v23 = vpop.f32.mrf.mxu0  ;;  %2949 = vmatpush3.msra.mxu1 %v3696_v57 }
 0x114   :  { %5240 = vst [vmem:[#allocation33_spill] sm:$0xff] %v3771_v23  ;;  %2950 = vmatprep.subr.mxu1 %v3734_v11 }
 0x115   :  { %v3775_v24 = vpop.f32.mrf.mxu0  ;;  %2951 = vmatpush3.msra.mxu1 %v3692_v55 }
 0x116   :  { %5241 = vst [vmem:[#allocation34_spill] sm:$0xff] %v3775_v24  ;;  %2952 = vmatprep.subr.mxu1 %v3728_v8 }
 0x117   :  { %v3779_v25 = vpop.f32.mrf.mxu0  ;;  %2953 = vmatpush3.msra.mxu1 %v3686_v52 }
 0x118   :  { %5242 = vst [vmem:[#allocation35_spill] sm:$0xff] %v3779_v25  ;;  %2954 = vmatprep.subr.mxu1 %v3724_v6 }
 0x119   :  { %v3783_v26 = vpop.f32.mrf.mxu0  ;;  %2955 = vmatpush3.msra.mxu1 %v3682_v50 }
 0x11a   :  { %5243 = vst [vmem:[#allocation36_spill] sm:$0xff] %v3783_v26  ;;  %2956 = vmatprep.subr.mxu1 %v3730_v9 }
 0x11b   :  { %v3787_v27 = vpop.f32.mrf.mxu0  ;;  %2957 = vmatpush3.msra.mxu1 %v3688_v53 }
 0x11c   :  { %5244 = vst [vmem:[#allocation37_spill] sm:$0xff] %v3787_v27  ;;  %2958 = vmatprep.subr.mxu1 %v3726_v7 }
 0x11d   :  { %v3791_v28 = vpop.f32.mrf.mxu0  ;;  %2959 = vmatpush3.msra.mxu1 %v3684_v51 }
 0x11e   :  { %5245 = vst [vmem:[#allocation38_spill] sm:$0xff] %v3791_v28  ;;  %2960 = vmatprep.subr.mxu1 %v3720_v4 }
 0x11f   :  { %v3795_v29 = vpop.f32.mrf.mxu0  ;;  %2961 = vmatpush3.msra.mxu1 %v3678_v48 }
 0x120   :  { %5246 = vst [vmem:[#allocation39_spill] sm:$0xff] %v3795_v29  ;;  %2962 = vmatprep.subr.mxu1 %v3716_v2 }
 0x121   :  { %v3799_v30 = vpop.f32.mrf.mxu0  ;;  %2963 = vmatpush3.msra.mxu1 %v3674_v46 }
 0x122   :  { %5247 = vst [vmem:[#allocation40_spill] sm:$0xff] %v3799_v30  ;;  %2964 = vmatprep.subr.mxu1 %v3722_v5 }
 0x123   :  { %v3803_v31 = vpop.f32.mrf.mxu0  ;;  %2965 = vmatpush3.msra.mxu1 %v3680_v49 }
 0x124   :  { %5248 = vst [vmem:[#allocation41_spill] sm:$0xff] %v3803_v31  ;;  %2966 = vmatprep.subr.mxu1 %v3718_v3 }
 0x125   :  { %v3807_v32 = vpop.f32.mrf.mxu0  ;;  %2967 = vmatpush3.msra.mxu1 %v3676_v47 }
 0x126   :  { %5249 = vst [vmem:[#allocation42_spill] sm:$0xff] %v3807_v32  ;;  %2766 = vmatmul.mubr.msk.f32.vlgmr.msra.gmra.mxu1 %vm3670_vm8, %v5133_v44 }
 0x127   :  { %v3813_v33 = vpop.f32.mrf.mxu0  ;;  %2767 = vmatprep.mubr.msk.f32.mxu1 %vm3704_vm11, %v5133_v44 }
 0x128   :  { %5250 = vst [vmem:[#allocation43_spill] sm:$0xff] %v3813_v33 }
 0x129   :  { %v3818_v34 = vpop.f32.mrf.mxu0 }
 0x12a   :  { %5251 = vst [vmem:[#allocation44_spill] sm:$0xff] %v3818_v34 }
 0x12b   :  { %v3820_v35 = vpop.f32.mrf.mxu0 }
 0x12c   :  { %5252 = vst [vmem:[#allocation45_spill] sm:$0xff] %v3820_v35 }
 0x12d   :  { %v3822_v36 = vpop.f32.mrf.mxu0 }
 0x12e   :  { %5253 = vst [vmem:[#allocation46_spill] sm:$0xff] %v3822_v36 }
 0x12f   :  { %v3824_v37 = vpop.f32.mrf.mxu0 }
 0x130   :  { %5254 = vst [vmem:[#allocation47_spill] sm:$0xff] %v3824_v37 }
 0x131   :  { %v3826_v40 = vpop.f32.mrf.mxu0 }
 0x132   :  { %5255 = vst [vmem:[#allocation48_spill] sm:$0xff] %v3826_v40 }
 0x133   :  { %v3828_v41 = vpop.f32.mrf.mxu0 }
 0x134   :  { %5256 = vst [vmem:[#allocation49_spill] sm:$0xff] %v3828_v41 }
 0x135   :  { %v3830_v42 = vpop.f32.mrf.mxu0 }
 0x136   :  { %5257 = vst [vmem:[#allocation50_spill] sm:$0xff] %v3830_v42 }
 0x137   :  { %v3832_v59 = vpop.f32.mrf.mxu0 }
 0x138   :  { %5258 = vst [vmem:[#allocation51_spill] sm:$0xff] %v3832_v59 }
 0x139   :  { %v3834_v60 = vpop.f32.mrf.mxu0 }
 0x13a   :  { %5259 = vst [vmem:[#allocation52_spill] sm:$0xff] %v3834_v60 }
 0x13b   :  { %v3836_v38 = vpop.f32.mrf.mxu0 }
 0x13c   :  { %5260 = vst [vmem:[#allocation53_spill] sm:$0xff] %v3836_v38 }
 0x13d   :  { %v3838_v44 = vpop.f32.mrf.mxu0 }
 0x13e   :  { %5261 = vst [vmem:[#allocation54_spill] sm:$0xff] %v3838_v44 }
 0x13f   :  { %v3840_v39 = vpop.f32.mrf.mxu0 }
 0x140   :  { %5262 = vst [vmem:[#allocation55_spill] sm:$0xff] %v3840_v39 }
 0x141   :  { %v3842_v62 = vpop.f32.mrf.mxu0 }
 0x142   :  { %5263 = vst [vmem:[#allocation56_spill] sm:$0xff] %v3842_v62 }
 0x143   :  { %v3844_v45 = vpop.f32.mrf.mxu0 }
 0x144   :  { %5264 = vst [vmem:[#allocation57_spill] sm:$0xff] %v3844_v45 }
 0x145   :  { %v3846_v47 = vpop.f32.mrf.mxu0 }
 0x146   :  { %5265 = vst [vmem:[#allocation58_spill] sm:$0xff] %v3846_v47  ;;  %2971 = vmatprep.subr.mxu1 %v3846_v47 }
 0x147   :  { %2972 = vmatpush3.msra.mxu1 %v3807_v32  ;;  %v3851_v3 = vpop.f32.mrf.mxu0 }
 0x148   :  { %2973 = vmatprep.subr.mxu1 %v3842_v62  ;;  %5266 = vst [vmem:[#allocation59_spill] sm:$0xff] %v3851_v3 }
 0x149   :  { %2974 = vmatpush3.msra.mxu1 %v3799_v30 }
 0x14a   :  { %2975 = vmatprep.subr.mxu1 %v3851_v3 }
 0x14b   :  { %2976 = vmatpush3.msra.mxu1 %v3813_v33 }
 0x14c   :  { %2977 = vmatprep.subr.mxu1 %v3844_v45 }
 0x14d   :  { %2978 = vmatpush3.msra.mxu1 %v3803_v31 }
 0x14e   :  { %2979 = vmatprep.subr.mxu1 %v3838_v44 }
 0x14f   :  { %2980 = vmatpush3.msra.mxu1 %v3791_v28 }
 0x150   :  { %2981 = vmatprep.subr.mxu1 %v3834_v60 }
 0x151   :  { %2982 = vmatpush3.msra.mxu1 %v3783_v26 }
 0x152   :  { %2983 = vmatprep.subr.mxu1 %v3840_v39 }
 0x153   :  { %2984 = vmatpush3.msra.mxu1 %v3795_v29 }
 0x154   :  { %2985 = vmatprep.subr.mxu1 %v3836_v38 }
 0x155   :  { %2986 = vmatpush3.msra.mxu1 %v3787_v27 }
 0x156   :  { %2987 = vmatprep.subr.mxu1 %v3830_v42 }
 0x157   :  { %2988 = vmatpush3.msra.mxu1 %v3775_v24 }
 0x158   :  { %2989 = vmatprep.subr.mxu1 %v3826_v40 }
 0x159   :  { %2990 = vmatpush3.msra.mxu1 %v3767_v22 }
 0x15a   :  { %2991 = vmatprep.subr.mxu1 %v3832_v59  ;;  %v1221_v59 = vmul.f32 %v3744_v16, %v3744_v16  ;;  %v1219_v16 = vmul.f32 %v3747_v17, %v3747_v17 }
 0x15b   :  { %2992 = vmatpush3.msra.mxu1 %v3779_v25 }
 0x15c   :  { %2993 = vmatprep.subr.mxu1 %v3828_v41 }
 0x15d   :  { %2994 = vmatpush3.msra.mxu1 %v3771_v23  ;;  %v1205_v23 = vmul.f32 %v3708_v63, %v3708_v63  ;;  %v1218_v63 = vmul.f32 %v3742_v15, %v3742_v15 }
 0x15e   :  { %2995 = vmatprep.subr.mxu1 %v3822_v36 }
 0x15f   :  { %2996 = vmatpush3.msra.mxu1 %v3759_v20  ;;  %v1220_v20 = vmul.f32 %v3740_v14, %v3740_v14  ;;  %v1203_v14 = vmul.f32 %v3714_v1, %v3714_v1 }
 0x160   :  { %2997 = vmatprep.subr.mxu1 %v3818_v34  ;;  %v5267_v34 = vmov 1.0  }
 0x161   :  { %2998 = vmatpush3.msra.mxu1 %v3751_v18 }
 0x162   :  { %2999 = vmatprep.subr.mxu1 %v3824_v37 }
 0x163   :  { %3000 = vmatpush3.msra.mxu1 %v3763_v21  ;;  %v1204_v21 = vmul.f32 %v3698_v58, %v3698_v58 }
 0x164   :  { %3001 = vmatprep.subr.mxu1 %v3820_v35 }
 0x165   :  { %3002 = vmatpush3.msra.mxu1 %v3755_v19 }
 0x166   :  { %2768 = vmatmul.mubr.msk.f32.vlgmr.msra.gmra.mxu1 %vm3710_vm14, %v5267_v34  ;;  %3006 = vmatprep.subr.mxu1 %v1221_v59  ;;  %v1202_v59 = vmul.f32 %v3702_v61, %v3702_v61 }
 0x167   :  { %3007 = vmatpush3.msra.mxu1 %v1205_v23  ;;  %2769 = vmatprep.mubr.msk.f32.mxu1 %vm3661_vm5, %v5267_v34  ;;  %v1201_v23 = vmul.f32 %v3694_v56, %v3694_v56 }
 0x168   :  { %3008 = vmatprep.subr.mxu1 %v1220_v20  ;;  %v1216_v20 = vmul.f32 %v3732_v10, %v3732_v10 }
 0x169   :  { %3009 = vmatpush3.msra.mxu1 %v1204_v21  ;;  %v1200_v21 = vmul.f32 %v3690_v54, %v3690_v54 }
 0x16a   :  { %3010 = vmatprep.subr.mxu1 %v1219_v16  ;;  %v1215_v16 = vmul.f32 %v3738_v13, %v3738_v13 }
 0x16b   :  { %3011 = vmatpush3.msra.mxu1 %v1203_v14  ;;  %v1199_v14 = vmul.f32 %v3696_v57, %v3696_v57 }
 0x16c   :  { %3012 = vmatprep.subr.mxu1 %v1218_v63  ;;  %v1214_v63 = vmul.f32 %v3734_v11, %v3734_v11 }
 0x16d   :  { %3013 = vmatpush3.msra.mxu1 %v1202_v59  ;;  %v1198_v59 = vmul.f32 %v3692_v55, %v3692_v55 }
 0x16e   :  { %3014 = vmatprep.subr.mxu1 %v1217_v43  ;;  %v1213_v43 = vmul.f32 %v3728_v8, %v3728_v8 }
 0x16f   :  { %3015 = vmatpush3.msra.mxu1 %v1201_v23  ;;  %v1197_v23 = vmul.f32 %v3686_v52, %v3686_v52 }
 0x170   :  { %3016 = vmatprep.subr.mxu1 %v1216_v20  ;;  %v1212_v20 = vmul.f32 %v3724_v6, %v3724_v6 }
 0x171   :  { %3017 = vmatpush3.msra.mxu1 %v1200_v21  ;;  %v1196_v21 = vmul.f32 %v3682_v50, %v3682_v50 }
 0x172   :  { %3018 = vmatprep.subr.mxu1 %v1215_v16  ;;  %v1211_v16 = vmul.f32 %v3730_v9, %v3730_v9 }
 0x173   :  { %3019 = vmatpush3.msra.mxu1 %v1199_v14  ;;  %v1195_v14 = vmul.f32 %v3688_v53, %v3688_v53 }
 0x174   :  { %3020 = vmatprep.subr.mxu1 %v1214_v63  ;;  %v1210_v63 = vmul.f32 %v3726_v7, %v3726_v7 }
 0x175   :  { %3021 = vmatpush3.msra.mxu1 %v1198_v59  ;;  %v1194_v59 = vmul.f32 %v3684_v51, %v3684_v51 }
 0x176   :  { %3022 = vmatprep.subr.mxu1 %v1213_v43  ;;  %v1209_v43 = vmul.f32 %v3720_v4, %v3720_v4 }
 0x177   :  { %3023 = vmatpush3.msra.mxu1 %v1197_v23  ;;  %v1193_v23 = vmul.f32 %v3678_v48, %v3678_v48 }
 0x178   :  { %3024 = vmatprep.subr.mxu1 %v1212_v20  ;;  %v1208_v20 = vmul.f32 %v3716_v2, %v3716_v2 }
 0x179   :  { %3025 = vmatpush3.msra.mxu1 %v1196_v21  ;;  %v1192_v21 = vmul.f32 %v3674_v46, %v3674_v46 }
 0x17a   :  { %3026 = vmatprep.subr.mxu1 %v1211_v16  ;;  %v1207_v16 = vmul.f32 %v3722_v5, %v3722_v5 }
 0x17b   :  { %3027 = vmatpush3.msra.mxu1 %v1195_v14  ;;  %v1191_v14 = vmul.f32 %v3680_v49, %v3680_v49 }
 0x17c   :  { %3028 = vmatprep.subr.mxu1 %v1210_v63  ;;  %v5268_v63 = vld [vmem:[#allocation13_spill] sm:$0xff] }
 0x17d   :  { %3029 = vmatpush3.msra.mxu1 %v1194_v59  ;;  %v1206_v15 = vmul.f32 %v5268_v63, %v5268_v63  ;;  %v5269_v59 = vld [vmem:[#allocation5_spill] sm:$0xff] }
 0x17e   :  { %3030 = vmatprep.subr.mxu1 %v1209_v43  ;;  %v1190_v17 = vmul.f32 %v5269_v59, %v5269_v59  ;;  %v1253_v43 = vmul.f32 %v3846_v47, %v3846_v47 }
 0x17f   :  { %3031 = vmatpush3.msra.mxu1 %v1193_v23  ;;  %v1237_v23 = vmul.f32 %v3807_v32, %v3807_v32 }
 0x180   :  { %3032 = vmatprep.subr.mxu1 %v1208_v20  ;;  %v1252_v20 = vmul.f32 %v3842_v62, %v3842_v62 }
 0x181   :  { %3033 = vmatpush3.msra.mxu1 %v1192_v21  ;;  %v1234_v21 = vmul.f32 %v3803_v31, %v3803_v31 }
 0x182   :  { %3034 = vmatprep.subr.mxu1 %v1207_v16  ;;  %v1236_v16 = vmul.f32 %v3799_v30, %v3799_v30 }
 0x183   :  { %3035 = vmatpush3.msra.mxu1 %v1191_v14  ;;  %v1233_v14 = vmul.f32 %v3791_v28, %v3791_v28 }
 0x184   :  { %3036 = vmatprep.subr.mxu1 %v1206_v15  ;;  %v1251_v15 = vmul.f32 %v3851_v3, %v3851_v3 }
 0x185   :  { %3037 = vmatpush3.msra.mxu1 %v1190_v17  ;;  %v1235_v17 = vmul.f32 %v3813_v33, %v3813_v33 }
 0x186   :  { %3041 = vmatprep.subr.mxu1 %v1253_v43  ;;  %2770 = vmatmul.mubr.msk.f32.vlgmr.msra.gmra.mxu1 %vm3670_vm8, %v5267_v34  ;;  %v1250_v43 = vmul.f32 %v3844_v45, %v3844_v45  ;;  %vm1594_vm8 = vcmask 1041408  }
 0x187   :  { %3042 = vmatpush3.msra.mxu1 %v1237_v23  ;;  %2771 = vmatprep.mubr.msk.f32.mxu1 %vm3704_vm11, %v5267_v34  ;;  %v1249_v23 = vmul.f32 %v3838_v44, %v3838_v44 }
 0x188   :  { %3043 = vmatprep.subr.mxu1 %v1252_v20  ;;  %v1248_v20 = vmul.f32 %v3834_v60, %v3834_v60 }
 0x189   :  { %3044 = vmatpush3.msra.mxu1 %v1236_v16  ;;  %v1232_v16 = vmul.f32 %v3783_v26, %v3783_v26 }
 0x18a   :  { %3045 = vmatprep.subr.mxu1 %v1251_v15  ;;  %v1247_v15 = vmul.f32 %v3840_v39, %v3840_v39 }
 0x18b   :  { %3046 = vmatpush3.msra.mxu1 %v1235_v17  ;;  %v1231_v17 = vmul.f32 %v3795_v29, %v3795_v29 }
 0x18c   :  { %3047 = vmatprep.subr.mxu1 %v1250_v43  ;;  %v1246_v43 = vmul.f32 %v3836_v38, %v3836_v38 }
 0x18d   :  { %3048 = vmatpush3.msra.mxu1 %v1234_v21  ;;  %v1230_v21 = vmul.f32 %v3787_v27, %v3787_v27 }
 0x18e   :  { %3049 = vmatprep.subr.mxu1 %v1249_v23  ;;  %v1245_v23 = vmul.f32 %v3830_v42, %v3830_v42 }
 0x18f   :  { %3050 = vmatpush3.msra.mxu1 %v1233_v14  ;;  %v1229_v14 = vmul.f32 %v3775_v24, %v3775_v24 }
 0x190   :  { %3051 = vmatprep.subr.mxu1 %v1248_v20  ;;  %v1244_v20 = vmul.f32 %v3826_v40, %v3826_v40 }
 0x191   :  { %3052 = vmatpush3.msra.mxu1 %v1232_v16  ;;  %v1228_v16 = vmul.f32 %v3767_v22, %v3767_v22 }
 0x192   :  { %3053 = vmatprep.subr.mxu1 %v1247_v15  ;;  %v5272_v15 = vld [vmem:[#allocation51_spill] sm:$0xff] }
 0x193   :  { %3054 = vmatpush3.msra.mxu1 %v1231_v17  ;;  %v1243_v62 = vmul.f32 %v5272_v15, %v5272_v15  ;;  %v1227_v17 = vmul.f32 %v3779_v25, %v3779_v25 }
 0x194   :  { %3055 = vmatprep.subr.mxu1 %v1246_v43  ;;  %v1242_v43 = vmul.f32 %v3828_v41, %v3828_v41 }
 0x195   :  { %3056 = vmatpush3.msra.mxu1 %v1230_v21  ;;  %v5273_v21 = vld [vmem:[#allocation33_spill] sm:$0xff] }
 0x196   :  { %3057 = vmatprep.subr.mxu1 %v1245_v23  ;;  %v1226_v47 = vmul.f32 %v5273_v21, %v5273_v21  ;;  %v1241_v23 = vmul.f32 %v3822_v36, %v3822_v36 }
 0x197   :  { %3058 = vmatpush3.msra.mxu1 %v1229_v14  ;;  %v5274_v14 = vld [vmem:[#allocation30_spill] sm:$0xff] }
 0x198   :  { %3059 = vmatprep.subr.mxu1 %v1244_v20  ;;  %v1225_v45 = vmul.f32 %v5274_v14, %v5274_v14  ;;  %v5275_v20 = vld [vmem:[#allocation44_spill] sm:$0xff] }
 0x199   :  { %3060 = vmatpush3.msra.mxu1 %v1228_v16  ;;  %v1240_v3 = vmul.f32 %v5275_v20, %v5275_v20  ;;  %v1224_v16 = vmul.f32 %v3751_v18, %v3751_v18 }
 0x19a   :  { %3061 = vmatprep.subr.mxu1 %v1243_v62  ;;  %v1239_v62 = vmul.f32 %v3824_v37, %v3824_v37 }
 0x19b   :  { %3062 = vmatpush3.msra.mxu1 %v1227_v17  ;;  %v5276_v17 = vld [vmem:[#allocation31_spill] sm:$0xff] }
 0x19c   :  { %3063 = vmatprep.subr.mxu1 %v1242_v43  ;;  %v1223_v60 = vmul.f32 %v5276_v17, %v5276_v17  ;;  %v1238_v43 = vmul.f32 %v3820_v35, %v3820_v35 }
 0x19d   :  { %3064 = vmatpush3.msra.mxu1 %v1226_v47  ;;  %v1222_v47 = vmul.f32 %v3755_v19, %v3755_v19 }
 0x19e   :  { %3065 = vmatprep.subr.mxu1 %v1241_v23 }
 0x19f   :  { %3066 = vmatpush3.msra.mxu1 %v1225_v45  ;;  %v5277_v45 = vld [vmem:[#allocation3_spill] sm:$0xff] }
 0x1a0   :  { %3067 = vmatprep.subr.mxu1 %v1240_v3  ;;  %v4026_v3 = vmul.u32 256, %v5277_v45 }
 0x1a1   :  { %3068 = vmatpush3.msra.mxu1 %v1224_v16  ;;  %v5278_v16 = vld [vmem:[#allocation2_spill] sm:$0xff] }
 0x1a2   :  { %3069 = vmatprep.subr.mxu1 %v1239_v62  ;;  %v4029_v23 = vadd.s32 256, %v4026_v3  ;;  %vm729_vm15 = vcmp.ge.s32.totalorder %v5278_v16, %v4026_v3  ;;  %v696_v19 = vadd.s32 256, %v5278_v16  ;;  %v698_v12 = vadd.s32 272, %v5278_v16 }
 0x1a3   :  { %3070 = vmatpush3.msra.mxu1 %v1223_v60  ;;  %v5163_v60 = vmov 0.0   ;;  %v700_v8 = vadd.s32 288, %v5278_v16  ;;  %v714_v54 = vadd.s32 400, %v5278_v16 }
 0x1a4   :  { %3071 = vmatprep.subr.mxu1 %v1238_v43  ;;  %vm794_vm0 = vcmp.lt.s32.totalorder %v5278_v16, %v4029_v23  ;;  %v665_v43 = vadd.s32 8, %v5278_v16 }
 0x1a5   :  { %3072 = vmatpush3.msra.mxu1 %v1222_v47  ;;  %vm858_vm1 = vmand %vm729_vm15, %vm794_vm0  ;;  %v666_v47 = vadd.s32 16, %v5278_v16 }
 0x1a6   :  { %2772 = vmatmul.mubr.msk.f32.vlgmr.msra.gmra.mxu1 %vm3710_vm14, %v5267_v34  ;;  %v2701_v62 = vsel %vm858_vm1, 1.0, %v5163_v60  ;;  %vm730_vm3 = vcmp.ge.s32.totalorder %v665_v43, %v4026_v3  ;;  %vm795_vm4 = vcmp.lt.s32.totalorder %v665_v43, %v4029_v23  ;;  %v667_v60 = vadd.s32 24, %v5278_v16 }
 0x1a7   :  { %3274 = vmatprep.mubr.msk.f32.mxu0 %vm1401_vm2, %v2701_v62  ;;  %3372 = vmatprep.mubr.msk.f32.mxu1 %vm1401_vm2, %v2701_v62  ;;  %vm731_vm5 = vcmp.ge.s32.totalorder %v666_v47, %v4026_v3  ;;  %vm796_vm6 = vcmp.lt.s32.totalorder %v666_v47, %v4029_v23  ;;  %v668_v62 = vadd.s32 32, %v5278_v16  ;;  %vm859_vm7 = vmand %vm730_vm3, %vm795_vm4  ;;  %v669_v43 = vadd.s32 40, %v5278_v16 }
 0x1a8   :  { %vm860_vm9 = vmand %vm731_vm5, %vm796_vm6  ;;  %vm732_vm10 = vcmp.ge.s32.totalorder %v667_v60, %v4026_v3  ;;  %vm797_vm11 = vcmp.lt.s32.totalorder %v667_v60, %v4029_v23 }
 0x1a9   :  { %vm733_vm12 = vcmp.ge.s32.totalorder %v668_v62, %v4026_v3  ;;  %vm798_vm13 = vcmp.lt.s32.totalorder %v668_v62, %v4029_v23  ;;  %vm861_vm14 = vmand %vm732_vm10, %vm797_vm11  ;;  %vm734_vm0 = vcmp.ge.s32.totalorder %v669_v43, %v4026_v3  ;;  %vm799_vm1 = vcmp.lt.s32.totalorder %v669_v43, %v4029_v23 }
 0x1aa   :  { %vm862_vm15 = vmand %vm733_vm12, %vm798_vm13  ;;  %v674_v62 = vadd.s32 80, %v5278_v16 }
 0x1ab   :  { %vm863_vm5 = vmand %vm734_vm0, %vm799_vm1 }
 0x1ac   :  { %vm739_vm0 = vcmp.ge.s32.totalorder %v674_v62, %v4026_v3  ;;  %vm804_vm1 = vcmp.lt.s32.totalorder %v674_v62, %v4029_v23  ;;  %v678_v62 = vadd.s32 112, %v5278_v16 }
 0x1e6   :  { %v2968_v0 = vpop.f32.mrf.mxu1 }
 0x1e8   :  { %v2969_v34 = vpop.f32.mrf.mxu1 }
 0x1e9   :  { %v2970_v38 = vadd.f32 %v2969_v34, %v2968_v0  ;;  %v5279_v0 = vmov 0.0  }
 0x1ea   :  { %v4055_v34 = vsel %vm859_vm7, 1.0, %v5279_v0  ;;  %v4075_v60 = vsel %vm861_vm14, 1.0, %v5279_v0  ;;  %v4078_v47 = vsel %vm862_vm15, 1.0, %v5279_v0  ;;  %v4091_v43 = vsel %vm863_vm5, 1.0, %v5279_v0 }
 0x226   :  { %v3003_v45 = vpop.f32.mrf.mxu1 }
 0x228   :  { %v3004_v44 = vpop.f32.mrf.mxu1 }
 0x229   :  { %v3005_v39 = vadd.f32 %v3004_v44, %v3003_v45  ;;  %v670_v44 = vadd.s32 48, %v5278_v16  ;;  %v673_v45 = vadd.s32 72, %v5278_v16 }
 0x22b   :  { %v1187_v40 = vadd.f32 %v3005_v39, %v2970_v38  ;;  %v4060_v38 = vsel %vm860_vm9, 1.0, %v5279_v0  ;;  %v671_v39 = vadd.s32 56, %v5278_v16  ;;  %vm735_vm3 = vcmp.ge.s32.totalorder %v670_v44, %v4026_v3 }
 0x22c   :  { %vm800_vm4 = vcmp.lt.s32.totalorder %v670_v44, %v4029_v23  ;;  %vm738_vm14 = vcmp.ge.s32.totalorder %v673_v45, %v4026_v3  ;;  %vm803_vm15 = vcmp.lt.s32.totalorder %v673_v45, %v4029_v23  ;;  %v677_v45 = vadd.s32 104, %v5278_v16 }
 0x22d   :  { %v4049_v42 = vmul.f32 0.00390625, %v1187_v40  ;;  %v672_v40 = vadd.s32 64, %v5278_v16  ;;  %vm864_vm6 = vmand %vm735_vm3, %vm800_vm4  ;;  %vm736_vm7 = vcmp.ge.s32.totalorder %v671_v39, %v4026_v3  ;;  %vm801_vm9 = vcmp.lt.s32.totalorder %v671_v39, %v4029_v23 }
 0x22e   :  { %v4094_v44 = vsel %vm864_vm6, 1.0, %v5279_v0  ;;  %vm865_vm12 = vmand %vm736_vm7, %vm801_vm9  ;;  %v675_v39 = vadd.s32 88, %v5278_v16 }
 0x22f   :  { %3272 = vmatprep.subr.msk.mxu0 %vm1594_vm8, %v4049_v42  ;;  %vm737_vm10 = vcmp.ge.s32.totalorder %v672_v40, %v4026_v3  ;;  %vm802_vm11 = vcmp.lt.s32.totalorder %v672_v40, %v4029_v23  ;;  %v676_v40 = vadd.s32 96, %v5278_v16  ;;  %v4107_v41 = vsel %vm865_vm12, 1.0, %v5279_v0  ;;  %vm867_vm3 = vmand %vm738_vm14, %vm803_vm15 }
 0x230   :  { %3273 = vmatpush3.msk.msra.mxu0 %vm1594_vm8, %v4049_v42  ;;  %vm866_vm13 = vmand %vm737_vm10, %vm802_vm11  ;;  %vm740_vm5 = vcmp.ge.s32.totalorder %v675_v39, %v4026_v3  ;;  %vm805_vm6 = vcmp.lt.s32.totalorder %v675_v39, %v4029_v23  ;;  %v4123_v20 = vsel %vm867_vm3, 1.0, %v5279_v0  ;;  %vm742_vm12 = vcmp.ge.s32.totalorder %v677_v45, %v4026_v3 }
 0x231   :  { %3275 = vmatmul.mubr.msk.f32.vlgmr.msra.gmra.mxu0 %vm1401_vm2, %v4055_v34  ;;  %v4110_v15 = vsel %vm866_vm13, 1.0, %v5279_v0  ;;  %vm868_vm4 = vmand %vm739_vm0, %vm804_vm1  ;;  %vm741_vm7 = vcmp.ge.s32.totalorder %v676_v40, %v4026_v3  ;;  %vm806_vm9 = vcmp.lt.s32.totalorder %v676_v40, %v4029_v23  ;;  %vm807_vm13 = vcmp.lt.s32.totalorder %v677_v45, %v4029_v23 }
 0x232   :  { %3277 = vmatprep.mubr.msk.f32.mxu0 %vm1401_vm2, %v4060_v38  ;;  %v4126_v36 = vsel %vm868_vm4, 1.0, %v5279_v0  ;;  %vm869_vm10 = vmand %vm740_vm5, %vm805_vm6  ;;  %v679_v39 = vadd.s32 120, %v5278_v16  ;;  %vm743_vm14 = vcmp.ge.s32.totalorder %v678_v62, %v4026_v3  ;;  %vm808_vm15 = vcmp.lt.s32.totalorder %v678_v62, %v4029_v23 }
 0x233   :  { %vm870_vm11 = vmand %vm741_vm7, %vm806_vm9  ;;  %v680_v40 = vadd.s32 128, %v5278_v16  ;;  %v4139_v35 = vsel %vm869_vm10, 1.0, %v5279_v0  ;;  %v681_v45 = vadd.s32 136, %v5278_v16  ;;  %v682_v62 = vadd.s32 144, %v5278_v16 }
 0x234   :  { %v4142_v37 = vsel %vm870_vm11, 1.0, %v5279_v0  ;;  %vm871_vm0 = vmand %vm742_vm12, %vm807_vm13  ;;  %vm744_vm3 = vcmp.ge.s32.totalorder %v679_v39, %v4026_v3  ;;  %vm809_vm4 = vcmp.lt.s32.totalorder %v679_v39, %v4029_v23  ;;  %v683_v39 = vadd.s32 152, %v5278_v16 }
 0x235   :  { %3278 = vmatmul.mubr.msk.f32.gmra.mxu0 %vm1401_vm2, %v4075_v60  ;;  %vm872_vm1 = vmand %vm743_vm14, %vm808_vm15  ;;  %vm745_vm5 = vcmp.ge.s32.totalorder %v680_v40, %v4026_v3  ;;  %vm810_vm6 = vcmp.lt.s32.totalorder %v680_v40, %v4029_v23  ;;  %v4155_v30 = vsel %vm871_vm0, 1.0, %v5279_v0  ;;  %vm746_vm10 = vcmp.ge.s32.totalorder %v681_v45, %v4026_v3 }
 0x236   :  { %3280 = vmatprep.mubr.msk.f32.mxu0 %vm1401_vm2, %v4078_v47  ;;  %v4158_v32 = vsel %vm872_vm1, 1.0, %v5279_v0  ;;  %vm873_vm7 = vmand %vm744_vm3, %vm809_vm4  ;;  %vm811_vm11 = vcmp.lt.s32.totalorder %v681_v45, %v4029_v23  ;;  %vm747_vm12 = vcmp.ge.s32.totalorder %v682_v62, %v4026_v3  ;;  %vm812_vm13 = vcmp.lt.s32.totalorder %v682_v62, %v4029_v23 }
 0x237   :  { %vm874_vm9 = vmand %vm745_vm5, %vm810_vm6  ;;  %v684_v40 = vadd.s32 160, %v5278_v16  ;;  %v4171_v31 = vsel %vm873_vm7, 1.0, %v5279_v0  ;;  %vm748_vm0 = vcmp.ge.s32.totalorder %v683_v39, %v4026_v3  ;;  %vm813_vm1 = vcmp.lt.s32.totalorder %v683_v39, %v4029_v23 }
 0x238   :  { %v4174_v33 = vsel %vm874_vm9, 1.0, %v5279_v0  ;;  %vm875_vm14 = vmand %vm746_vm10, %vm811_vm11  ;;  %v685_v45 = vadd.s32 168, %v5278_v16  ;;  %v686_v62 = vadd.s32 176, %v5278_v16  ;;  %v687_v39 = vadd.s32 184, %v5278_v16 }
 0x239   :  { %3281 = vmatmul.mubr.msk.f32.gmra.mxu0 %vm1401_vm2, %v4091_v43  ;;  %vm876_vm15 = vmand %vm747_vm12, %vm812_vm13  ;;  %vm749_vm3 = vcmp.ge.s32.totalorder %v684_v40, %v4026_v3  ;;  %vm814_vm4 = vcmp.lt.s32.totalorder %v684_v40, %v4029_v23  ;;  %v4187_v26 = vsel %vm875_vm14, 1.0, %v5279_v0  ;;  %v688_v40 = vadd.s32 192, %v5278_v16 }
 0x23a   :  { %3283 = vmatprep.mubr.msk.f32.mxu0 %vm1401_vm2, %v4094_v44  ;;  %v4190_v28 = vsel %vm876_vm15, 1.0, %v5279_v0  ;;  %vm877_vm5 = vmand %vm748_vm0, %vm813_vm1  ;;  %vm750_vm7 = vcmp.ge.s32.totalorder %v685_v45, %v4026_v3  ;;  %vm815_vm9 = vcmp.lt.s32.totalorder %v685_v45, %v4029_v23  ;;  %vm751_vm10 = vcmp.ge.s32.totalorder %v686_v62, %v4026_v3 }
 0x23b   :  { %vm878_vm6 = vmand %vm749_vm3, %vm814_vm4  ;;  %vm816_vm11 = vcmp.lt.s32.totalorder %v686_v62, %v4029_v23  ;;  %v4203_v27 = vsel %vm877_vm5, 1.0, %v5279_v0  ;;  %vm752_vm14 = vcmp.ge.s32.totalorder %v687_v39, %v4026_v3  ;;  %vm817_vm15 = vcmp.lt.s32.totalorder %v687_v39, %v4029_v23 }
 0x23c   :  { %v4206_v29 = vsel %vm878_vm6, 1.0, %v5279_v0  ;;  %vm879_vm12 = vmand %vm750_vm7, %vm815_vm9  ;;  %v689_v45 = vadd.s32 200, %v5278_v16  ;;  %vm753_vm0 = vcmp.ge.s32.totalorder %v688_v40, %v4026_v3  ;;  %vm818_vm1 = vcmp.lt.s32.totalorder %v688_v40, %v4029_v23 }
 0x23d   :  { %3284 = vmatmul.mubr.msk.f32.gmra.mxu0 %vm1401_vm2, %v4107_v41  ;;  %vm880_vm13 = vmand %vm751_vm10, %vm816_vm11  ;;  %v690_v62 = vadd.s32 208, %v5278_v16  ;;  %v4219_v22 = vsel %vm879_vm12, 1.0, %v5279_v0  ;;  %v691_v39 = vadd.s32 216, %v5278_v16  ;;  %v692_v40 = vadd.s32 224, %v5278_v16 }
 0x23e   :  { %3286 = vmatprep.mubr.msk.f32.mxu0 %vm1401_vm2, %v4110_v15  ;;  %v4222_v24 = vsel %vm880_vm13, 1.0, %v5279_v0  ;;  %vm881_vm3 = vmand %vm752_vm14, %vm817_vm15  ;;  %vm754_vm5 = vcmp.ge.s32.totalorder %v689_v45, %v4026_v3  ;;  %vm819_vm6 = vcmp.lt.s32.totalorder %v689_v45, %v4029_v23  ;;  %v693_v45 = vadd.s32 232, %v5278_v16 }
 0x23f   :  { %vm882_vm4 = vmand %vm753_vm0, %vm818_vm1  ;;  %vm755_vm7 = vcmp.ge.s32.totalorder %v690_v62, %v4026_v3  ;;  %vm820_vm9 = vcmp.lt.s32.totalorder %v690_v62, %v4029_v23  ;;  %v4235_v21 = vsel %vm881_vm3, 1.0, %v5279_v0  ;;  %vm756_vm12 = vcmp.ge.s32.totalorder %v691_v39, %v4026_v3 }
 0x240   :  { %v4238_v25 = vsel %vm882_vm4, 1.0, %v5279_v0  ;;  %vm883_vm10 = vmand %vm754_vm5, %vm819_vm6  ;;  %vm821_vm13 = vcmp.lt.s32.totalorder %v691_v39, %v4029_v23  ;;  %vm757_vm14 = vcmp.ge.s32.totalorder %v692_v40, %v4026_v3  ;;  %vm822_vm15 = vcmp.lt.s32.totalorder %v692_v40, %v4029_v23 }
 0x241   :  { %3287 = vmatmul.mubr.msk.f32.gmra.mxu0 %vm1401_vm2, %v4123_v20  ;;  %vm884_vm11 = vmand %vm755_vm7, %vm820_vm9  ;;  %v694_v62 = vadd.s32 240, %v5278_v16  ;;  %v4251_v18 = vsel %vm883_vm10, 1.0, %v5279_v0  ;;  %vm758_vm3 = vcmp.ge.s32.totalorder %v693_v45, %v4026_v3  ;;  %vm823_vm4 = vcmp.lt.s32.totalorder %v693_v45, %v4029_v23 }
 0x242   :  { %3289 = vmatprep.mubr.msk.f32.mxu0 %vm1401_vm2, %v4126_v36  ;;  %v4254_v14 = vsel %vm884_vm11, 1.0, %v5279_v0  ;;  %vm885_vm0 = vmand %vm756_vm12, %vm821_vm13  ;;  %v695_v40 = vadd.s32 248, %v5278_v16  ;;  %vm761_vm12 = vcmp.ge.s32.totalorder %v696_v19, %v4026_v3  ;;  %vm826_vm13 = vcmp.lt.s32.totalorder %v696_v19, %v4029_v23 }
 0x243   :  { %vm886_vm1 = vmand %vm757_vm14, %vm822_vm15  ;;  %vm759_vm5 = vcmp.ge.s32.totalorder %v694_v62, %v4026_v3  ;;  %vm824_vm6 = vcmp.lt.s32.totalorder %v694_v62, %v4029_v23  ;;  %v4267_v17 = vsel %vm885_vm0, 1.0, %v5279_v0  ;;  %v697_v62 = vadd.s32 264, %v5278_v16 }
 0x244   :  { %v4270_v10 = vsel %vm886_vm1, 1.0, %v5279_v0  ;;  %vm887_vm7 = vmand %vm758_vm3, %vm823_vm4  ;;  %vm760_vm10 = vcmp.ge.s32.totalorder %v695_v40, %v4026_v3  ;;  %vm825_vm11 = vcmp.lt.s32.totalorder %v695_v40, %v4029_v23  ;;  %v699_v19 = vadd.s32 280, %v5278_v16 }
 0x245   :  { %3290 = vmatmul.mubr.msk.f32.gmra.mxu0 %vm1401_vm2, %v4139_v35  ;;  %vm888_vm9 = vmand %vm759_vm5, %vm824_vm6  ;;  %v4283_v13 = vsel %vm887_vm7, 1.0, %v5279_v0  ;;  %vm762_vm0 = vcmp.ge.s32.totalorder %v697_v62, %v4026_v3  ;;  %vm827_vm1 = vcmp.lt.s32.totalorder %v697_v62, %v4029_v23  ;;  %vm763_vm3 = vcmp.ge.s32.totalorder %v698_v12, %v4026_v3 }
 0x246   :  { %3292 = vmatprep.mubr.msk.f32.mxu0 %vm1401_vm2, %v4142_v37  ;;  %v3038_v39 = vpop.f32.mrf.mxu1  ;;  %v4286_v40 = vsel %vm888_vm9, 1.0, %v5279_v0  ;;  %vm889_vm14 = vmand %vm760_vm10, %vm825_vm11  ;;  %vm828_vm4 = vcmp.lt.s32.totalorder %v698_v12, %v4029_v23  ;;  %vm764_vm7 = vcmp.ge.s32.totalorder %v699_v19, %v4026_v3  ;;  %vm829_vm9 = vcmp.lt.s32.totalorder %v699_v19, %v4029_v23 }
 0x247   :  { %vm890_vm15 = vmand %vm761_vm12, %vm826_vm13  ;;  %v4299_v2 = vsel %vm889_vm14, 1.0, %v5279_v0  ;;  %vm765_vm10 = vcmp.ge.s32.totalorder %v700_v8, %v4026_v3  ;;  %v1396_v12 = vmul.f32 %v4049_v42, %v4049_v42  ;;  %vm830_vm11 = vcmp.lt.s32.totalorder %v700_v8, %v4029_v23 }
 0x248   :  { %v3039_v45 = vpop.f32.mrf.mxu1  ;;  %v4302_v4 = vsel %vm890_vm15, 1.0, %v5279_v0  ;;  %vm891_vm5 = vmand %vm762_vm0, %vm827_vm1  ;;  %v703_v8 = vadd.s32 312, %v5278_v16  ;;  %v704_v19 = vadd.s32 320, %v5278_v16 }
 0x249   :  { %3293 = vmatmul.mubr.msk.f32.gmra.mxu0 %vm1401_vm2, %v4155_v30  ;;  %v3040_v7 = vadd.f32 %v3039_v45, %v3038_v39  ;;  %vm892_vm6 = vmand %vm763_vm3, %vm828_vm4 }
 0x24a   :  { %3295 = vmatprep.mubr.msk.f32.mxu0 %vm1401_vm2, %v4158_v32  ;;  %v4320_v45 = vsel %vm892_vm6, 1.0, %v5279_v0  ;;  %vm893_vm12 = vmand %vm764_vm7, %vm829_vm9  ;;  %vm833_vm6 = vcmp.lt.s32.totalorder %v703_v8, %v4029_v23  ;;  %vm769_vm7 = vcmp.ge.s32.totalorder %v704_v19, %v4026_v3  ;;  %vm834_vm9 = vcmp.lt.s32.totalorder %v704_v19, %v4029_v23 }
 0x24b   :  { %vm894_vm13 = vmand %vm765_vm10, %vm830_vm11  ;;  %v708_v19 = vadd.s32 352, %v5278_v16 }
 0x24c   :  { %vm898_vm11 = vmand %vm769_vm7, %vm834_vm9 }
 0x24d   :  { %3296 = vmatmul.mubr.msk.f32.gmra.mxu0 %vm1401_vm2, %v4171_v31  ;;  %v4368_v63 = vsel %vm898_vm11, 1.0, %v5279_v0 }
 0x24e   :  { %3298 = vmatprep.mubr.msk.f32.mxu0 %vm1401_vm2, %v4174_v33 }
 0x251   :  { %3299 = vmatmul.mubr.msk.f32.gmra.mxu0 %vm1401_vm2, %v4187_v26 }
 0x252   :  { %3301 = vmatprep.mubr.msk.f32.mxu0 %vm1401_vm2, %v4190_v28 }
 0x255   :  { %3302 = vmatmul.mubr.msk.f32.gmra.mxu0 %vm1401_vm2, %v4203_v27 }
 0x256   :  { %3304 = vmatprep.mubr.msk.f32.mxu0 %vm1401_vm2, %v4206_v29 }
 0x259   :  { %3305 = vmatmul.mubr.msk.f32.gmra.mxu0 %vm1401_vm2, %v4219_v22 }
 0x25a   :  { %3307 = vmatprep.mubr.msk.f32.mxu0 %vm1401_vm2, %v4222_v24 }
 0x25d   :  { %3308 = vmatmul.mubr.msk.f32.gmra.mxu0 %vm1401_vm2, %v4235_v21 }
 0x25e   :  { %3310 = vmatprep.mubr.msk.f32.mxu0 %vm1401_vm2, %v4238_v25 }
 0x261   :  { %3311 = vmatmul.mubr.msk.f32.gmra.mxu0 %vm1401_vm2, %v4251_v18 }
 0x262   :  { %3313 = vmatprep.mubr.msk.f32.mxu0 %vm1401_vm2, %v4254_v14 }
 0x265   :  { %3314 = vmatmul.mubr.msk.f32.gmra.mxu0 %vm1401_vm2, %v4267_v17 }
 0x266   :  { %v3073_v11 = vpop.f32.mrf.mxu1  ;;  %3316 = vmatprep.mubr.msk.f32.mxu0 %vm1401_vm2, %v4270_v10 }
 0x268   :  { %v3074_v6 = vpop.f32.mrf.mxu1 }
 0x269   :  { %v3075_v9 = vadd.f32 %v3074_v6, %v3073_v11  ;;  %3317 = vmatmul.mubr.msk.f32.gmra.mxu0 %vm1401_vm2, %v4283_v13  ;;  %v701_v6 = vadd.s32 296, %v5278_v16 }
 0x26a   :  { %3319 = vmatprep.mubr.msk.f32.mxu0 %vm1401_vm2, %v4286_v40 }
 0x26b   :  { %v1391_v62 = vadd.f32 %v3075_v9, %v3040_v7  ;;  %v702_v7 = vadd.s32 304, %v5278_v16  ;;  %v4317_v9 = vsel %vm891_vm5, 1.0, %v5279_v0  ;;  %vm766_vm14 = vcmp.ge.s32.totalorder %v701_v6, %v4026_v3 }
 0x26c   :  { %vm831_vm15 = vcmp.lt.s32.totalorder %v701_v6, %v4029_v23  ;;  %v4336_v6 = vsel %vm894_vm13, 1.0, %v5279_v0  ;;  %vm768_vm5 = vcmp.ge.s32.totalorder %v703_v8, %v4026_v3 }
 0x26d   :  { %v1395_v11 = vmul.f32 0.00390625, %v1391_v62  ;;  %3320 = vmatmul.mubr.msk.f32.gmra.mxu0 %vm1401_vm2, %v4299_v2  ;;  %vm767_vm0 = vcmp.ge.s32.totalorder %v702_v7, %v4026_v3  ;;  %vm832_vm1 = vcmp.lt.s32.totalorder %v702_v7, %v4029_v23  ;;  %v4333_v62 = vsel %vm893_vm12, 1.0, %v5279_v0  ;;  %vm895_vm3 = vmand %vm766_vm14, %vm831_vm15 }
 0x26e   :  { %3322 = vmatprep.mubr.msk.f32.mxu0 %vm1401_vm2, %v4302_v4  ;;  %vm896_vm4 = vmand %vm767_vm0, %vm832_vm1  ;;  %v706_v7 = vadd.s32 336, %v5278_v16 }
 0x26f   :  { %v1397_v39 = vsub.f32 %v1395_v11, %v1396_v12  ;;  %v705_v12 = vadd.s32 328, %v5278_v16  ;;  %v4352_v8 = vsel %vm896_vm4, 1.0, %v5279_v0  ;;  %vm897_vm10 = vmand %vm768_vm5, %vm833_vm6  ;;  %vm773_vm5 = vcmp.ge.s32.totalorder %v708_v19, %v4026_v3 }
 0x270   :  { %vm771_vm14 = vcmp.ge.s32.totalorder %v706_v7, %v4026_v3  ;;  %vm836_vm15 = vcmp.lt.s32.totalorder %v706_v7, %v4029_v23  ;;  %vm838_vm6 = vcmp.lt.s32.totalorder %v708_v19, %v4029_v23  ;;  %v710_v7 = vadd.s32 368, %v5278_v16 }
 0x271   :  { %v1398_v42 = vmax.f32 %v1397_v39, 0.0  ;;  %3323 = vmatmul.mubr.msk.f32.gmra.mxu0 %vm1401_vm2, %v4317_v9  ;;  %v4349_v39 = vsel %vm895_vm3, 1.0, %v5279_v0  ;;  %vm770_vm12 = vcmp.ge.s32.totalorder %v705_v12, %v4026_v3  ;;  %vm835_vm13 = vcmp.lt.s32.totalorder %v705_v12, %v4029_v23  ;;  %vm900_vm1 = vmand %vm771_vm14, %vm836_vm15 }
 0x272   :  { %3325 = vmatprep.mubr.msk.f32.mxu0 %vm1401_vm2, %v4320_v45  ;;  %vm899_vm0 = vmand %vm770_vm12, %vm835_vm13  ;;  %v709_v12 = vadd.s32 360, %v5278_v16  ;;  %v4384_v58 = vsel %vm900_vm1, 1.0, %v5279_v0  ;;  %vm775_vm12 = vcmp.ge.s32.totalorder %v710_v7, %v4026_v3  ;;  %vm840_vm13 = vcmp.lt.s32.totalorder %v710_v7, %v4029_v23 }
 0x273   :  { %v1399_v11 = vadd.f32 1e-05, %v1398_v42  ;;  %v707_v42 = vadd.s32 344, %v5278_v16  ;;  %v4381_v5 = vsel %vm899_vm0, 1.0, %v5279_v0  ;;  %vm902_vm9 = vmand %vm773_vm5, %vm838_vm6  ;;  %v712_v19 = vadd.s32 384, %v5278_v16 }
 0x274   :  { %vm839_vm11 = vcmp.lt.s32.totalorder %v709_v12, %v4029_v23  ;;  %vm904_vm15 = vmand %vm775_vm12, %vm840_vm13  ;;  %v713_v7 = vadd.s32 392, %v5278_v16 }
 0x275   :  { %3504 = vrsqrt.f32 %v1399_v11  ;;  %3326 = vmatmul.mubr.msk.f32.gmra.mxu0 %vm1401_vm2, %v4333_v62  ;;  %v4365_v11 = vsel %vm897_vm10, 1.0, %v5279_v0  ;;  %vm772_vm3 = vcmp.ge.s32.totalorder %v707_v42, %v4026_v3  ;;  %vm837_vm4 = vcmp.lt.s32.totalorder %v707_v42, %v4029_v23 }
 0x276   :  { %3328 = vmatprep.mubr.msk.f32.mxu0 %vm1401_vm2, %v4336_v6  ;;  %vm901_vm7 = vmand %vm772_vm3, %vm837_vm4  ;;  %vm774_vm10 = vcmp.ge.s32.totalorder %v709_v12, %v4026_v3  ;;  %v711_v42 = vadd.s32 376, %v5278_v16  ;;  %v4401_v12 = vsel %vm902_vm9, 1.0, %v5279_v0  ;;  %vm777_vm3 = vcmp.ge.s32.totalorder %v712_v19, %v4026_v3 }
 0x277   :  { %v4397_v1 = vsel %vm901_vm7, 1.0, %v5279_v0  ;;  %vm903_vm14 = vmand %vm774_vm10, %vm839_vm11  ;;  %vm842_vm4 = vcmp.lt.s32.totalorder %v712_v19, %v4029_v23  ;;  %vm778_vm6 = vcmp.ge.s32.totalorder %v713_v7, %v4026_v3  ;;  %vm843_vm7 = vcmp.lt.s32.totalorder %v713_v7, %v4029_v23 }
 0x278   :  { %vm776_vm0 = vcmp.ge.s32.totalorder %v711_v42, %v4026_v3  ;;  %vm841_vm1 = vcmp.lt.s32.totalorder %v711_v42, %v4029_v23  ;;  %v4422_v42 = vsel %vm904_vm15, 1.0, %v5279_v0  ;;  %vm906_vm5 = vmand %vm777_vm3, %vm842_vm4  ;;  %vm779_vm9 = vcmp.ge.s32.totalorder %v714_v54, %v4026_v3 }
 0x279   :  { %3329 = vmatmul.mubr.msk.f32.gmra.mxu0 %vm1401_vm2, %v4349_v39  ;;  %vm844_vm10 = vcmp.lt.s32.totalorder %v714_v54, %v4029_v23  ;;  %v4442_v7 = vsel %vm906_vm5, 1.0, %v5279_v0  ;;  %vm907_vm11 = vmand %vm778_vm6, %vm843_vm7  ;;  %v717_v54 = vadd.s32 424, %v5278_v16 }
 0x27a   :  { %3331 = vmatprep.mubr.msk.f32.mxu0 %vm1401_vm2, %v4352_v8  ;;  %vm908_vm12 = vmand %vm779_vm9, %vm844_vm10 }
 0x27b   :  { %vm782_vm4 = vcmp.ge.s32.totalorder %v717_v54, %v4026_v3 }
 0x27d   :  { %3332 = vmatmul.mubr.msk.f32.gmra.mxu0 %vm1401_vm2, %v4365_v11 }
 0x27e   :  { %3334 = vmatprep.mubr.msk.f32.mxu0 %vm1401_vm2, %v4368_v63 }
 0x281   :  { %3335 = vmatmul.mubr.msk.f32.gmra.mxu0 %vm1401_vm2, %v4381_v5 }
 0x282   :  { %v3505_v61 = vpop.eup %3504  ;;  %3337 = vmatprep.mubr.msk.f32.mxu0 %vm1401_vm2, %v4384_v58 }
 0x283   :  { %3370 = vmatprep.subr.msk.mxu1 %vm1594_vm8, %v3505_v61 }
 0x284   :  { %3371 = vmatpush3.msk.msra.mxu1 %vm1594_vm8, %v3505_v61  ;;  %v4419_v61 = vsel %vm903_vm14, 1.0, %v5279_v0  ;;  %vm905_vm8 = vmand %vm776_vm0, %vm841_vm1 }
 0x285   :  { %3338 = vmatmul.mubr.msk.f32.gmra.mxu0 %vm1401_vm2, %v4397_v1  ;;  %3373 = vmatmul.mubr.msk.f32.vlgmr.msra.gmra.mxu1 %vm1401_vm2, %v4055_v34  ;;  %v715_v34 = vadd.s32 408, %v5278_v16  ;;  %v4439_v19 = vsel %vm905_vm8, 1.0, %v5279_v0  ;;  %vm847_vm8 = vcmp.lt.s32.totalorder %v717_v54, %v4029_v23 }
 0x286   :  { %3340 = vmatprep.mubr.msk.f32.mxu0 %vm1401_vm2, %v4401_v12  ;;  %3375 = vmatprep.mubr.msk.f32.mxu1 %vm1401_vm2, %v4060_v38  ;;  %v716_v38 = vadd.s32 416, %v5278_v16  ;;  %vm911_vm7 = vmand %vm782_vm4, %vm847_vm8 }
 0x287   :  { %vm780_vm13 = vcmp.ge.s32.totalorder %v715_v34, %v4026_v3  ;;  %vm845_vm14 = vcmp.lt.s32.totalorder %v715_v34, %v4029_v23  ;;  %v4462_v34 = vsel %vm908_vm12, 1.0, %v5279_v0 }
 0x288   :  { %vm781_vm15 = vcmp.ge.s32.totalorder %v716_v38, %v4026_v3  ;;  %vm846_vm0 = vcmp.lt.s32.totalorder %v716_v38, %v4029_v23  ;;  %vm909_vm1 = vmand %vm780_vm13, %vm845_vm14 }
 0x289   :  { %3341 = vmatmul.mubr.msk.f32.gmra.mxu0 %vm1401_vm2, %v4419_v61  ;;  %3376 = vmatmul.mubr.msk.f32.gmra.mxu1 %vm1401_vm2, %v4075_v60  ;;  %v718_v60 = vadd.s32 432, %v5278_v16  ;;  %vm910_vm3 = vmand %vm781_vm15, %vm846_vm0  ;;  %v4479_v38 = vsel %vm909_vm1, 1.0, %v5279_v0 }
 0x28a   :  { %3343 = vmatprep.mubr.msk.f32.mxu0 %vm1401_vm2, %v4422_v42  ;;  %3378 = vmatprep.mubr.msk.f32.mxu1 %vm1401_vm2, %v4078_v47  ;;  %v4459_v47 = vsel %vm907_vm11, 1.0, %v5279_v0  ;;  %v4482_v54 = vsel %vm910_vm3, 1.0, %v5279_v0 }
 0x28b   :  { %vm783_vm5 = vcmp.ge.s32.totalorder %v718_v60, %v4026_v3  ;;  %vm848_vm6 = vcmp.lt.s32.totalorder %v718_v60, %v4029_v23  ;;  %v4499_v60 = vsel %vm911_vm7, 1.0, %v5279_v0 }
 0x28c   :  { %vm912_vm9 = vmand %vm783_vm5, %vm848_vm6 }
 0x28d   :  { %3344 = vmatmul.mubr.msk.f32.gmra.mxu0 %vm1401_vm2, %v4439_v19  ;;  %3379 = vmatmul.mubr.msk.f32.gmra.mxu1 %vm1401_vm2, %v4091_v43  ;;  %v719_v43 = vadd.s32 440, %v5278_v16 }
 0x28e   :  { %3346 = vmatprep.mubr.msk.f32.mxu0 %vm1401_vm2, %v4442_v7  ;;  %3381 = vmatprep.mubr.msk.f32.mxu1 %vm1401_vm2, %v4094_v44  ;;  %v720_v44 = vadd.s32 448, %v5278_v16 }
 0x28f   :  { %vm784_vm10 = vcmp.ge.s32.totalorder %v719_v43, %v4026_v3  ;;  %vm849_vm11 = vcmp.lt.s32.totalorder %v719_v43, %v4029_v23  ;;  %v4502_v43 = vsel %vm912_vm9, 1.0, %v5279_v0 }
 0x290   :  { %vm785_vm12 = vcmp.ge.s32.totalorder %v720_v44, %v4026_v3  ;;  %vm850_vm13 = vcmp.lt.s32.totalorder %v720_v44, %v4029_v23  ;;  %vm913_vm14 = vmand %vm784_vm10, %vm849_vm11 }
 0x291   :  { %3347 = vmatmul.mubr.msk.f32.gmra.mxu0 %vm1401_vm2, %v4459_v47  ;;  %3382 = vmatmul.mubr.msk.f32.gmra.mxu1 %vm1401_vm2, %v4107_v41  ;;  %v721_v41 = vadd.s32 456, %v5278_v16  ;;  %vm914_vm15 = vmand %vm785_vm12, %vm850_vm13  ;;  %v4519_v44 = vsel %vm913_vm14, 1.0, %v5279_v0 }
 0x292   :  { %3349 = vmatprep.mubr.msk.f32.mxu0 %vm1401_vm2, %v4462_v34  ;;  %3384 = vmatprep.mubr.msk.f32.mxu1 %vm1401_vm2, %v4110_v15  ;;  %v722_v15 = vadd.s32 464, %v5278_v16 }
 0x293   :  { %vm786_vm0 = vcmp.ge.s32.totalorder %v721_v41, %v4026_v3  ;;  %vm851_vm1 = vcmp.lt.s32.totalorder %v721_v41, %v4029_v23  ;;  %v4522_v41 = vsel %vm914_vm15, 1.0, %v5279_v0 }
 0x294   :  { %vm787_vm3 = vcmp.ge.s32.totalorder %v722_v15, %v4026_v3  ;;  %vm852_vm4 = vcmp.lt.s32.totalorder %v722_v15, %v4029_v23  ;;  %vm915_vm8 = vmand %vm786_vm0, %vm851_vm1 }
 0x295   :  { %3350 = vmatmul.mubr.msk.f32.gmra.mxu0 %vm1401_vm2, %v4479_v38  ;;  %3385 = vmatmul.mubr.msk.f32.gmra.mxu1 %vm1401_vm2, %v4123_v20  ;;  %v723_v20 = vadd.s32 472, %v5278_v16  ;;  %vm916_vm5 = vmand %vm787_vm3, %vm852_vm4  ;;  %v4539_v15 = vsel %vm915_vm8, 1.0, %v5279_v0 }
 0x296   :  { %3352 = vmatprep.mubr.msk.f32.mxu0 %vm1401_vm2, %v4482_v54  ;;  %3387 = vmatprep.mubr.msk.f32.mxu1 %vm1401_vm2, %v4126_v36  ;;  %v724_v36 = vadd.s32 480, %v5278_v16 }
 0x297   :  { %vm788_vm6 = vcmp.ge.s32.totalorder %v723_v20, %v4026_v3  ;;  %vm853_vm7 = vcmp.lt.s32.totalorder %v723_v20, %v4029_v23  ;;  %v4542_v20 = vsel %vm916_vm5, 1.0, %v5279_v0 }
 0x298   :  { %vm789_vm9 = vcmp.ge.s32.totalorder %v724_v36, %v4026_v3  ;;  %vm854_vm10 = vcmp.lt.s32.totalorder %v724_v36, %v4029_v23  ;;  %vm917_vm11 = vmand %vm788_vm6, %vm853_vm7 }
 0x299   :  { %3353 = vmatmul.mubr.msk.f32.gmra.mxu0 %vm1401_vm2, %v4499_v60  ;;  %3388 = vmatmul.mubr.msk.f32.gmra.mxu1 %vm1401_vm2, %v4139_v35  ;;  %v725_v35 = vadd.s32 488, %v5278_v16  ;;  %vm918_vm12 = vmand %vm789_vm9, %vm854_vm10 }
 0x29a   :  { %3355 = vmatprep.mubr.msk.f32.mxu0 %vm1401_vm2, %v4502_v43  ;;  %3390 = vmatprep.mubr.msk.f32.mxu1 %vm1401_vm2, %v4142_v37  ;;  %v726_v37 = vadd.s32 496, %v5278_v16 }
 0x29b   :  { %vm790_vm13 = vcmp.ge.s32.totalorder %v725_v35, %v4026_v3  ;;  %vm855_vm14 = vcmp.lt.s32.totalorder %v725_v35, %v4029_v23 }
 0x29c   :  { %vm791_vm15 = vcmp.ge.s32.totalorder %v726_v37, %v4026_v3  ;;  %vm856_vm0 = vcmp.lt.s32.totalorder %v726_v37, %v4029_v23  ;;  %vm919_vm1 = vmand %vm790_vm13, %vm855_vm14 }
 0x29d   :  { %3356 = vmatmul.mubr.msk.f32.gmra.mxu0 %vm1401_vm2, %v4519_v44  ;;  %3391 = vmatmul.mubr.msk.f32.gmra.mxu1 %vm1401_vm2, %v4155_v30  ;;  %v727_v30 = vadd.s32 504, %v5278_v16  ;;  %v2761_v16 = vsel %vm918_vm12, 1.0, %v5279_v0  ;;  %vm920_vm3 = vmand %vm791_vm15, %vm856_vm0 }
 0x29e   :  { %3358 = vmatprep.mubr.msk.f32.mxu0 %vm1401_vm2, %v4522_v41  ;;  %3393 = vmatprep.mubr.msk.f32.mxu1 %vm1401_vm2, %v4158_v32  ;;  %v2760_v32 = vsel %vm917_vm11, 1.0, %v5279_v0 }
 0x29f   :  { %vm792_vm4 = vcmp.ge.s32.totalorder %v727_v30, %v4026_v3  ;;  %vm857_vm8 = vcmp.lt.s32.totalorder %v727_v30, %v4029_v23 }
 0x2a0   :  { %vm921_vm5 = vmand %vm792_vm4, %vm857_vm8 }
 0x2a1   :  { %3359 = vmatmul.mubr.msk.f32.gmra.mxu0 %vm1401_vm2, %v4539_v15  ;;  %3394 = vmatmul.mubr.msk.f32.gmra.mxu1 %vm1401_vm2, %v4171_v31  ;;  %v2762_v31 = vsel %vm919_vm1, 1.0, %v5279_v0 }
 0x2a2   :  { %3361 = vmatprep.mubr.msk.f32.mxu0 %vm1401_vm2, %v4542_v20  ;;  %3396 = vmatprep.mubr.msk.f32.mxu1 %vm1401_vm2, %v4174_v33  ;;  %v2763_v33 = vsel %vm920_vm3, 1.0, %v5279_v0 }
 0x2a5   :  { %3362 = vmatmul.mubr.msk.f32.gmra.mxu0 %vm1401_vm2, %v2760_v32  ;;  %3397 = vmatmul.mubr.msk.f32.gmra.mxu1 %vm1401_vm2, %v4187_v26  ;;  %v2764_v26 = vsel %vm921_vm5, 1.0, %v5279_v0 }
 0x2a6   :  { %3364 = vmatprep.mubr.msk.f32.mxu0 %vm1401_vm2, %v2761_v16  ;;  %3399 = vmatprep.mubr.msk.f32.mxu1 %vm1401_vm2, %v4190_v28 }
 0x2a9   :  { %3365 = vmatmul.mubr.msk.f32.gmra.mxu0 %vm1401_vm2, %v2762_v31  ;;  %3400 = vmatmul.mubr.msk.f32.gmra.mxu1 %vm1401_vm2, %v4203_v27 }
 0x2aa   :  { %3367 = vmatprep.mubr.msk.f32.mxu0 %vm1401_vm2, %v2763_v33  ;;  %3402 = vmatprep.mubr.msk.f32.mxu1 %vm1401_vm2, %v4206_v29 }
 0x2ad   :  { %3368 = vmatmul.mubr.msk.f32.gmra.mxu0 %vm1401_vm2, %v2764_v26  ;;  %3403 = vmatmul.mubr.msk.f32.gmra.mxu1 %vm1401_vm2, %v4219_v22 }
 0x2ae   :  { %3405 = vmatprep.mubr.msk.f32.mxu1 %vm1401_vm2, %v4222_v24 }
 0x2b1   :  { %3406 = vmatmul.mubr.msk.f32.gmra.mxu1 %vm1401_vm2, %v4235_v21 }
 0x2b2   :  { %3408 = vmatprep.mubr.msk.f32.mxu1 %vm1401_vm2, %v4238_v25 }
 0x2b5   :  { %3409 = vmatmul.mubr.msk.f32.gmra.mxu1 %vm1401_vm2, %v4251_v18 }
 0x2b6   :  { %3411 = vmatprep.mubr.msk.f32.mxu1 %vm1401_vm2, %v4254_v14 }
 0x2b9   :  { %3412 = vmatmul.mubr.msk.f32.gmra.mxu1 %vm1401_vm2, %v4267_v17 }
 0x2ba   :  { %3414 = vmatprep.mubr.msk.f32.mxu1 %vm1401_vm2, %v4270_v10 }
 0x2bd   :  { %3415 = vmatmul.mubr.msk.f32.gmra.mxu1 %vm1401_vm2, %v4283_v13 }
 0x2be   :  { %3417 = vmatprep.mubr.msk.f32.mxu1 %vm1401_vm2, %v4286_v40 }
 0x2c1   :  { %3418 = vmatmul.mubr.msk.f32.gmra.mxu1 %vm1401_vm2, %v4299_v2 }
 0x2c2   :  { %3420 = vmatprep.mubr.msk.f32.mxu1 %vm1401_vm2, %v4302_v4 }
 0x2c5   :  { %3421 = vmatmul.mubr.msk.f32.gmra.mxu1 %vm1401_vm2, %v4317_v9 }
 0x2c6   :  { %3423 = vmatprep.mubr.msk.f32.mxu1 %vm1401_vm2, %v4320_v45 }
 0x2c9   :  { %3424 = vmatmul.mubr.msk.f32.gmra.mxu1 %vm1401_vm2, %v4333_v62 }
 0x2ca   :  { %3426 = vmatprep.mubr.msk.f32.mxu1 %vm1401_vm2, %v4336_v6 }
 0x2cd   :  { %3427 = vmatmul.mubr.msk.f32.gmra.mxu1 %vm1401_vm2, %v4349_v39 }
 0x2ce   :  { %3429 = vmatprep.mubr.msk.f32.mxu1 %vm1401_vm2, %v4352_v8 }
 0x2d1   :  { %3430 = vmatmul.mubr.msk.f32.gmra.mxu1 %vm1401_vm2, %v4365_v11 }
 0x2d2   :  { %3432 = vmatprep.mubr.msk.f32.mxu1 %vm1401_vm2, %v4368_v63 }
 0x2d5   :  { %3433 = vmatmul.mubr.msk.f32.gmra.mxu1 %vm1401_vm2, %v4381_v5 }
 0x2d6   :  { %3435 = vmatprep.mubr.msk.f32.mxu1 %vm1401_vm2, %v4384_v58 }
 0x2d9   :  { %3436 = vmatmul.mubr.msk.f32.gmra.mxu1 %vm1401_vm2, %v4397_v1 }
 0x2da   :  { %3438 = vmatprep.mubr.msk.f32.mxu1 %vm1401_vm2, %v4401_v12 }
 0x2dd   :  { %3439 = vmatmul.mubr.msk.f32.gmra.mxu1 %vm1401_vm2, %v4419_v61 }
 0x2de   :  { %3441 = vmatprep.mubr.msk.f32.mxu1 %vm1401_vm2, %v4422_v42 }
 0x2e1   :  { %3442 = vmatmul.mubr.msk.f32.gmra.mxu1 %vm1401_vm2, %v4439_v19 }
 0x2e2   :  { %3444 = vmatprep.mubr.msk.f32.mxu1 %vm1401_vm2, %v4442_v7 }
 0x2e5   :  { %3445 = vmatmul.mubr.msk.f32.gmra.mxu1 %vm1401_vm2, %v4459_v47 }
 0x2e6   :  { %3447 = vmatprep.mubr.msk.f32.mxu1 %vm1401_vm2, %v4462_v34 }
 0x2e9   :  { %3448 = vmatmul.mubr.msk.f32.gmra.mxu1 %vm1401_vm2, %v4479_v38 }
 0x2ea   :  { %3450 = vmatprep.mubr.msk.f32.mxu1 %vm1401_vm2, %v4482_v54 }
 0x2ed   :  { %3451 = vmatmul.mubr.msk.f32.gmra.mxu1 %vm1401_vm2, %v4499_v60 }
 0x2ee   :  { %3453 = vmatprep.mubr.msk.f32.mxu1 %vm1401_vm2, %v4502_v43 }
 0x2f1   :  { %v3276_v58 = vpop.f32.mrf.mxu0  ;;  %3454 = vmatmul.mubr.msk.f32.gmra.mxu1 %vm1401_vm2, %v4519_v44 }
 0x2f2   :  { %3456 = vmatprep.mubr.msk.f32.mxu1 %vm1401_vm2, %v4522_v41  ;;  %v2372_v7 = vsub.f32 %v3680_v49, %v3276_v58 }
 0x2f3   :  { %v1664_v1 = vpop.f32.mrf.mxu0 }
 0x2f4   :  { %v2371_v34 = vsub.f32 %v5269_v59, %v1664_v1 }
 0x2f5   :  { %v3279_v2 = vpop.f32.mrf.mxu0  ;;  %3457 = vmatmul.mubr.msk.f32.gmra.mxu1 %vm1401_vm2, %v4539_v15 }
 0x2f6   :  { %3459 = vmatprep.mubr.msk.f32.mxu1 %vm1401_vm2, %v4542_v20  ;;  %v2374_v43 = vsub.f32 %v3678_v48, %v3279_v2 }
 0x2f7   :  { %v1674_v4 = vpop.f32.mrf.mxu0 }
 0x2f8   :  { %v2373_v35 = vsub.f32 %v3674_v46, %v1674_v4 }
 0x2f9   :  { %v3282_v5 = vpop.f32.mrf.mxu0  ;;  %3460 = vmatmul.mubr.msk.f32.gmra.mxu1 %vm1401_vm2, %v2760_v32 }
 0x2fa   :  { %3462 = vmatprep.mubr.msk.f32.mxu1 %vm1401_vm2, %v2761_v16  ;;  %v2376_v20 = vsub.f32 %v3688_v53, %v3282_v5 }
 0x2fb   :  { %v4655_v10 = vpop.f32.mrf.mxu0 }
 0x2fc   :  { %v2375_v32 = vsub.f32 %v3684_v51, %v4655_v10 }
 0x2fd   :  { %v4657_v13 = vpop.f32.mrf.mxu0  ;;  %3463 = vmatmul.mubr.msk.f32.gmra.mxu1 %vm1401_vm2, %v2762_v31 }
 0x2fe   :  { %3465 = vmatprep.mubr.msk.f32.mxu1 %vm1401_vm2, %v2763_v33 }
 0x2ff   :  { %v4661_v18 = vpop.f32.mrf.mxu0 }
 0x300   :  { %v2377_v2 = vsub.f32 %v3682_v50, %v4661_v18 }
 0x301   :  { %v4663_v22 = vpop.f32.mrf.mxu0  ;;  %3466 = vmatmul.mubr.msk.f32.gmra.mxu1 %vm1401_vm2, %v2764_v26  ;;  %vm2563_vm2 = vcmask 261120   ;;  %v2378_v26 = vsub.f32 %v3686_v52, %v4657_v13 }
 0x302   :  { %v2380_v13 = vsub.f32 %v3696_v57, %v4663_v22 }
 0x303   :  { %v4666_v24 = vpop.f32.mrf.mxu0 }
 0x305   :  { %v4668_v25 = vpop.f32.mrf.mxu0 }
 0x306   :  { %v2382_v22 = vsub.f32 %v3694_v56, %v4668_v25  ;;  %v5281_v25 = vld [vmem:[#allocation11_spill] sm:$0xff] }
 0x307   :  { %v4670_v27 = vpop.f32.mrf.mxu0 }
 0x309   :  { %v4672_v28 = vpop.f32.mrf.mxu0 }
 0x30b   :  { %v4674_v29 = vpop.f32.mrf.mxu0 }
 0x30d   :  { %v4676_v63 = vpop.f32.mrf.mxu0 }
 0x30f   :  { %v4678_v21 = vpop.f32.mrf.mxu0 }
 0x311   :  { %v4680_v14 = vpop.f32.mrf.mxu0 }
 0x313   :  { %v4682_v17 = vpop.f32.mrf.mxu0 }
 0x315   :  { %v4684_v3 = vpop.f32.mrf.mxu0 }
 0x317   :  { %v4686_v23 = vpop.f32.mrf.mxu0 }
 0x319   :  { %v4688_v0 = vpop.f32.mrf.mxu0 }
 0x31b   :  { %v4690_v40 = vpop.f32.mrf.mxu0 }
 0x31d   :  { %v4692_v9 = vpop.f32.mrf.mxu0 }
 0x31f   :  { %v4694_v45 = vpop.f32.mrf.mxu0 }
 0x321   :  { %v4696_v62 = vpop.f32.mrf.mxu0 }
 0x323   :  { %v4698_v6 = vpop.f32.mrf.mxu0 }
 0x325   :  { %v4700_v39 = vpop.f32.mrf.mxu0 }
 0x327   :  { %v4702_v8 = vpop.f32.mrf.mxu0 }
 0x329   :  { %v4704_v11 = vpop.f32.mrf.mxu0 }
 0x32b   :  { %v4706_v12 = vpop.f32.mrf.mxu0 }
 0x32d   :  { %v4708_v61 = vpop.f32.mrf.mxu0 }
 0x32f   :  { %v4710_v42 = vpop.f32.mrf.mxu0 }
 0x331   :  { %v4712_v19 = vpop.f32.mrf.mxu0 }
 0x333   :  { %v4716_v54 = vpop.f32.mrf.mxu0 }
 0x335   :  { %v4724_v59 = vpop.f32.mrf.mxu0 }
 0x337   :  { %v4737_v33 = vpop.f32.mrf.mxu0 }
 0x339   :  { %v4751_v10 = vpop.f32.mrf.mxu0 }
 0x345   :  { %v3374_v47 = vpop.f32.mrf.mxu1 }
 0x346   :  { %v2436_v38 = vmul.f32 %v3374_v47, %v2372_v7  ;;  %v2379_v47 = vsub.f32 %v3692_v55, %v4666_v24 }
 0x347   :  { %v2052_v60 = vpop.f32.mrf.mxu1 }
 0x348   :  { %v2500_v36 = vmax.f32 %v2436_v38, 0.0  ;;  %v2435_v44 = vmul.f32 %v2371_v34, %v2052_v60  ;;  %v4765_v60 = vpop.f32.mrf.mxu0 }
 0x349   :  { %v3377_v41 = vpop.f32.mrf.mxu1 }
 0x34a   :  { %2565 = vst.msk [vmem:[%s5130_s2 + $0x8] sm:$0xff] %vm2563_vm2, %v2500_v36  ;;  %v2499_v49 = vmax.f32 %v2435_v44, 0.0  ;;  %v2438_v37 = vmul.f32 %v3377_v41, %v2374_v43  ;;  %v5280_v36 = vld [vmem:[#allocation6_spill] sm:$0xff] }
 0x34b   :  { %v2062_v15 = vpop.f32.mrf.mxu1  ;;  %v2381_v44 = vsub.f32 %v5280_v36, %v4670_v27  ;;  %v5288_v36 = vld [vmem:[#allocation12_spill] sm:$0xff] }
 0x34c   :  { %2564 = vst.msk [vmem:[%s5130_s2] sm:$0xff] %vm2563_vm2, %v2499_v49  ;;  %v2502_v48 = vmax.f32 %v2438_v37, 0.0  ;;  %v2437_v30 = vmul.f32 %v2373_v35, %v2062_v15  ;;  %v4779_v49 = vpop.f32.mrf.mxu0  ;;  %v2384_v37 = vsub.f32 %v5281_v25, %v4672_v28  ;;  %v5289_v25 = vld [vmem:[#allocation19_spill] sm:$0xff] }
 0x34d   :  { %v3380_v46 = vpop.f32.mrf.mxu1 }
 0x34e   :  { %2567 = vst.msk [vmem:[%s5130_s2 + $0x18] sm:$0xff] %vm2563_vm2, %v2502_v48  ;;  %v2501_v16 = vmax.f32 %v2437_v30, 0.0  ;;  %v2440_v31 = vmul.f32 %v3380_v46, %v2376_v20  ;;  %v5282_v48 = vld [vmem:[#allocation8_spill] sm:$0xff] }
 0x34f   :  { %v2072_v53 = vpop.f32.mrf.mxu1  ;;  %v2383_v30 = vsub.f32 %v5282_v48, %v4674_v29 }
 0x350   :  { %2566 = vst.msk [vmem:[%s5130_s2 + $0x10] sm:$0xff] %vm2563_vm2, %v2501_v16  ;;  %v2504_v58 = vmax.f32 %v2440_v31, 0.0  ;;  %v2439_v51 = vmul.f32 %v2375_v32, %v2072_v53  ;;  %v4793_v16 = vpop.f32.mrf.mxu0  ;;  %v5283_v31 = vld [vmem:[#allocation10_spill] sm:$0xff] }
 0x351   :  { %v3383_v1 = vpop.f32.mrf.mxu1  ;;  %v2386_v53 = vsub.f32 %v5283_v31, %v4676_v63 }
 0x352   :  { %2569 = vst.msk [vmem:[%s5130_s2 + $0x28] sm:$0xff] %vm2563_vm2, %v2504_v58  ;;  %v2503_v4 = vmax.f32 %v2439_v51, 0.0  ;;  %v2442_v5 = vmul.f32 %v3383_v1, %v2378_v26  ;;  %v5284_v51 = vld [vmem:[#allocation7_spill] sm:$0xff] }
 0x353   :  { %v2082_v52 = vpop.f32.mrf.mxu1  ;;  %v2385_v1 = vsub.f32 %v5284_v51, %v4678_v21 }
 0x354   :  { %2568 = vst.msk [vmem:[%s5130_s2 + $0x20] sm:$0xff] %vm2563_vm2, %v2503_v4  ;;  %v2506_v7 = vmax.f32 %v2442_v5, 0.0  ;;  %v2441_v50 = vmul.f32 %v2377_v2, %v2082_v52  ;;  %v4807_v5 = vpop.f32.mrf.mxu0  ;;  %v5285_v52 = vld [vmem:[#allocation15_spill] sm:$0xff] }
 0x355   :  { %v3386_v18 = vpop.f32.mrf.mxu1 }
 0x356   :  { %2571 = vst.msk [vmem:[%s5130_s2 + $0x38] sm:$0xff] %vm2563_vm2, %v2506_v7  ;;  %v2505_v34 = vmax.f32 %v2441_v50, 0.0  ;;  %v2444_v38 = vmul.f32 %v3386_v18, %v2380_v13  ;;  %v2388_v13 = vsub.f32 %v5285_v52, %v4680_v14  ;;  %v5286_v18 = vld [vmem:[#allocation13_spill] sm:$0xff] }
 0x357   :  { %v2092_v57 = vpop.f32.mrf.mxu1 }
 0x358   :  { %2570 = vst.msk [vmem:[%s5130_s2 + $0x30] sm:$0xff] %vm2563_vm2, %v2505_v34  ;;  %v2508_v43 = vmax.f32 %v2444_v38, 0.0  ;;  %v2443_v55 = vmul.f32 %v2379_v47, %v2092_v57  ;;  %v2387_v47 = vsub.f32 %v5286_v18, %v4682_v17  ;;  %v4821_v57 = vpop.f32.mrf.mxu0 }
 0x359   :  { %v3389_v24 = vpop.f32.mrf.mxu1 }
 0x35a   :  { %2573 = vst.msk [vmem:[%s5130_s2 + $0x48] sm:$0xff] %vm2563_vm2, %v2508_v43  ;;  %v2507_v41 = vmax.f32 %v2443_v55, 0.0  ;;  %v2446_v35 = vmul.f32 %v3389_v24, %v2382_v22  ;;  %v5287_v22 = vld [vmem:[#allocation14_spill] sm:$0xff] }
 0x35b   :  { %v2102_v56 = vpop.f32.mrf.mxu1  ;;  %v2390_v43 = vsub.f32 %v5287_v22, %v4684_v3 }
 0x35c   :  { %2572 = vst.msk [vmem:[%s5130_s2 + $0x40] sm:$0xff] %vm2563_vm2, %v2507_v41  ;;  %v2510_v15 = vmax.f32 %v2446_v35, 0.0  ;;  %v2445_v27 = vmul.f32 %v2381_v44, %v2102_v56  ;;  %v2389_v44 = vsub.f32 %v5288_v36, %v4686_v23  ;;  %v4835_v56 = vpop.f32.mrf.mxu0 }
 0x35d   :  { %v3392_v20 = vpop.f32.mrf.mxu1 }
 0x35e   :  { %2575 = vst.msk [vmem:[%s5130_s2 + $0x58] sm:$0xff] %vm2563_vm2, %v2510_v15  ;;  %v2509_v46 = vmax.f32 %v2445_v27, 0.0  ;;  %v2448_v32 = vmul.f32 %v3392_v20, %v2384_v37  ;;  %v2392_v37 = vsub.f32 %v5289_v25, %v4688_v0  ;;  %v5290_v20 = vld [vmem:[#allocation17_spill] sm:$0xff] }
 0x35f   :  { %v2112_v28 = vpop.f32.mrf.mxu1  ;;  %v2391_v48 = vsub.f32 %v5290_v20, %v4690_v40  ;;  %v5298_v25 = vld [vmem:[#allocation25_spill] sm:$0xff]  ;;  %v5299_v20 = vld [vmem:[#allocation26_spill] sm:$0xff] }
 0x360   :  { %2574 = vst.msk [vmem:[%s5130_s2 + $0x50] sm:$0xff] %vm2563_vm2, %v2509_v46  ;;  %v2512_v26 = vmax.f32 %v2448_v32, 0.0  ;;  %v2447_v29 = vmul.f32 %v2383_v30, %v2112_v28  ;;  %v4849_v32 = vpop.f32.mrf.mxu0  ;;  %v5291_v28 = vld [vmem:[#allocation18_spill] sm:$0xff] }
 0x361   :  { %v3395_v58 = vpop.f32.mrf.mxu1  ;;  %v2394_v31 = vsub.f32 %v5291_v28, %v4692_v9 }
 0x362   :  { %2577 = vst.msk [vmem:[%s5130_s2 + $0x68] sm:$0xff] %vm2563_vm2, %v2512_v26  ;;  %v2511_v2 = vmax.f32 %v2447_v29, 0.0  ;;  %v2450_v4 = vmul.f32 %v3395_v58, %v2386_v53  ;;  %v5292_v29 = vld [vmem:[#allocation16_spill] sm:$0xff] }
 0x363   :  { %v2122_v63 = vpop.f32.mrf.mxu1  ;;  %v2393_v58 = vsub.f32 %v5292_v29, %v4694_v45 }
 0x364   :  { %2576 = vst.msk [vmem:[%s5130_s2 + $0x60] sm:$0xff] %vm2563_vm2, %v2511_v2  ;;  %v2514_v7 = vmax.f32 %v2450_v4, 0.0  ;;  %v2449_v21 = vmul.f32 %v2385_v1, %v2122_v63  ;;  %v4863_v2 = vpop.f32.mrf.mxu0  ;;  %v5293_v4 = vld [vmem:[#allocation23_spill] sm:$0xff] }
 0x365   :  { %v3398_v50 = vpop.f32.mrf.mxu1  ;;  %v2396_v63 = vsub.f32 %v5293_v4, %v4696_v62 }
 0x366   :  { %2579 = vst.msk [vmem:[%s5130_s2 + $0x78] sm:$0xff] %vm2563_vm2, %v2514_v7  ;;  %v2513_v34 = vmax.f32 %v2449_v21, 0.0  ;;  %v2452_v38 = vmul.f32 %v3398_v50, %v2388_v13  ;;  %v5294_v7 = vld [vmem:[#allocation21_spill] sm:$0xff] }
 0x367   :  { %v2132_v14 = vpop.f32.mrf.mxu1  ;;  %v2395_v21 = vsub.f32 %v5294_v7, %v4698_v6 }
 0x368   :  { %2578 = vst.msk [vmem:[%s5130_s2 + $0x70] sm:$0xff] %vm2563_vm2, %v2513_v34  ;;  %v2516_v55 = vmax.f32 %v2452_v38, 0.0  ;;  %v2451_v17 = vmul.f32 %v2387_v47, %v2132_v14  ;;  %v4877_v47 = vpop.f32.mrf.mxu0  ;;  %v5295_v34 = vld [vmem:[#allocation22_spill] sm:$0xff] }
 0x369   :  { %v3401_v24 = vpop.f32.mrf.mxu1  ;;  %v2398_v38 = vsub.f32 %v5295_v34, %v4700_v39 }
 0x36a   :  { %2581 = vst.msk [vmem:[%s5130_s2 + $0x88] sm:$0xff] %vm2563_vm2, %v2516_v55  ;;  %v2515_v41 = vmax.f32 %v2451_v17, 0.0  ;;  %v2454_v35 = vmul.f32 %v3401_v24, %v2390_v43  ;;  %v5296_v43 = vld [vmem:[#allocation20_spill] sm:$0xff]  ;;  %v4891_v36 = vpop.f32.mrf.mxu0 }
 0x36b   :  { %v2142_v3 = vpop.f32.mrf.mxu1  ;;  %v2397_v55 = vsub.f32 %v5296_v43, %v4702_v8 }
 0x36c   :  { %2580 = vst.msk [vmem:[%s5130_s2 + $0x80] sm:$0xff] %vm2563_vm2, %v2515_v41  ;;  %v2518_v15 = vmax.f32 %v2454_v35, 0.0  ;;  %v2453_v23 = vmul.f32 %v2389_v44, %v2142_v3  ;;  %v5297_v44 = vld [vmem:[#allocation27_spill] sm:$0xff] }
 0x36d   :  { %v3404_v27 = vpop.f32.mrf.mxu1  ;;  %v2400_v41 = vsub.f32 %v5297_v44, %v4704_v11 }
 0x36e   :  { %2583 = vst.msk [vmem:[%s5130_s2 + $0x98] sm:$0xff] %vm2563_vm2, %v2518_v15  ;;  %v2517_v30 = vmax.f32 %v2453_v23, 0.0  ;;  %v2456_v46 = vmul.f32 %v3404_v27, %v2392_v37  ;;  %v2399_v37 = vsub.f32 %v5298_v25, %v4706_v12  ;;  %v4905_v27 = vpop.f32.mrf.mxu0  ;;  %v5308_v25 = vld [vmem:[#allocation32_spill] sm:$0xff] }
 0x36f   :  { %v2152_v0 = vpop.f32.mrf.mxu1 }
 0x370   :  { %2582 = vst.msk [vmem:[%s5130_s2 + $0x90] sm:$0xff] %vm2563_vm2, %v2517_v30  ;;  %v2520_v53 = vmax.f32 %v2456_v46, 0.0  ;;  %v2455_v40 = vmul.f32 %v2391_v48, %v2152_v0  ;;  %v2402_v48 = vsub.f32 %v5299_v20, %v4708_v61  ;;  %v5300_v0 = vld [vmem:[#allocation24_spill] sm:$0xff]  ;;  %v5309_v20 = vld [vmem:[#allocation39_spill] sm:$0xff] }
 0x371   :  { %v3407_v26 = vpop.f32.mrf.mxu1  ;;  %v2401_v28 = vsub.f32 %v5300_v0, %v4710_v42 }
 0x372   :  { %2585 = vst.msk [vmem:[%s5130_s2 + $0xa8] sm:$0xff] %vm2563_vm2, %v2520_v53  ;;  %v2519_v51 = vmax.f32 %v2455_v40, 0.0  ;;  %v2458_v1 = vmul.f32 %v3407_v26, %v2394_v31  ;;  %v4919_v40 = vpop.f32.mrf.mxu0  ;;  %v5301_v26 = vld [vmem:[#allocation31_spill] sm:$0xff] }
 0x373   :  { %v2162_v9 = vpop.f32.mrf.mxu1  ;;  %v2404_v29 = vsub.f32 %v5301_v26, %v4712_v19 }
 0x374   :  { %2584 = vst.msk [vmem:[%s5130_s2 + $0xa0] sm:$0xff] %vm2563_vm2, %v2519_v51  ;;  %v2522_v52 = vmax.f32 %v2458_v1, 0.0  ;;  %v2457_v45 = vmul.f32 %v2393_v58, %v2162_v9  ;;  %v5302_v1 = vld [vmem:[#allocation29_spill] sm:$0xff] }
 0x375   :  { %v3410_v13 = vpop.f32.mrf.mxu1  ;;  %v2403_v9 = vsub.f32 %v5302_v1, %v4716_v54 }
 0x376   :  { %2587 = vst.msk [vmem:[%s5130_s2 + $0xb8] sm:$0xff] %vm2563_vm2, %v2522_v52  ;;  %v2521_v50 = vmax.f32 %v2457_v45, 0.0  ;;  %v2460_v18 = vmul.f32 %v3410_v13, %v2396_v63  ;;  %v4933_v52 = vpop.f32.mrf.mxu0  ;;  %v5303_v45 = vld [vmem:[#allocation30_spill] sm:$0xff] }
 0x377   :  { %v2172_v62 = vpop.f32.mrf.mxu1  ;;  %v2406_v13 = vsub.f32 %v5303_v45, %v4724_v59 }
 0x378   :  { %2586 = vst.msk [vmem:[%s5130_s2 + $0xb0] sm:$0xff] %vm2563_vm2, %v2521_v50  ;;  %v2524_v14 = vmax.f32 %v2460_v18, 0.0  ;;  %v2459_v6 = vmul.f32 %v2395_v21, %v2172_v62  ;;  %v5304_v50 = vld [vmem:[#allocation28_spill] sm:$0xff] }
 0x379   :  { %v3413_v22 = vpop.f32.mrf.mxu1  ;;  %v2405_v18 = vsub.f32 %v5304_v50, %v4737_v33 }
 0x37a   :  { %2589 = vst.msk [vmem:[%s5130_s2 + $0xc8] sm:$0xff] %vm2563_vm2, %v2524_v14  ;;  %v2523_v17 = vmax.f32 %v2459_v6, 0.0  ;;  %v2462_v24 = vmul.f32 %v3413_v22, %v2398_v38  ;;  %v4947_v38 = vpop.f32.mrf.mxu0  ;;  %v5305_v14 = vld [vmem:[#allocation35_spill] sm:$0xff] }
 0x37b   :  { %v2182_v39 = vpop.f32.mrf.mxu1  ;;  %v2408_v6 = vsub.f32 %v5305_v14, %v4751_v10 }
 0x37c   :  { %2588 = vst.msk [vmem:[%s5130_s2 + $0xc0] sm:$0xff] %vm2563_vm2, %v2523_v17  ;;  %v2526_v35 = vmax.f32 %v2462_v24, 0.0  ;;  %v2461_v8 = vmul.f32 %v2397_v55, %v2182_v39  ;;  %v5306_v55 = vld [vmem:[#allocation33_spill] sm:$0xff]  ;;  %v4961_v44 = vpop.f32.mrf.mxu0 }
 0x37d   :  { %v3416_v3 = vpop.f32.mrf.mxu1  ;;  %v2407_v17 = vsub.f32 %v5306_v55, %v4765_v60 }
 0x37e   :  { %2591 = vst.msk [vmem:[%s5130_s2 + $0xd8] sm:$0xff] %vm2563_vm2, %v2526_v35  ;;  %v2525_v15 = vmax.f32 %v2461_v8, 0.0  ;;  %v2464_v23 = vmul.f32 %v3416_v3, %v2400_v41  ;;  %v5307_v41 = vld [vmem:[#allocation34_spill] sm:$0xff] }
 0x37f   :  { %v2192_v11 = vpop.f32.mrf.mxu1  ;;  %v2410_v35 = vsub.f32 %v5307_v41, %v4779_v49  ;;  %v5318_v41 = vld [vmem:[#allocation45_spill] sm:$0xff] }
 0x380   :  { %2590 = vst.msk [vmem:[%s5130_s2 + $0xd0] sm:$0xff] %vm2563_vm2, %v2525_v15  ;;  %v2528_v30 = vmax.f32 %v2464_v23, 0.0  ;;  %v2463_v12 = vmul.f32 %v2399_v37, %v2192_v11  ;;  %v2409_v37 = vsub.f32 %v5308_v25, %v4793_v16  ;;  %v4975_v11 = vpop.f32.mrf.mxu0  ;;  %v5319_v25 = vld [vmem:[#allocation46_spill] sm:$0xff] }
 0x381   :  { %v3419_v46 = vpop.f32.mrf.mxu1 }
 0x382   :  { %2593 = vst.msk [vmem:[%s5130_s2 + $0xe8] sm:$0xff] %vm2563_vm2, %v2528_v30  ;;  %v2527_v31 = vmax.f32 %v2463_v12, 0.0  ;;  %v2466_v53 = vmul.f32 %v3419_v46, %v2402_v48  ;;  %v2412_v48 = vsub.f32 %v5309_v20, %v4807_v5  ;;  %v5310_v46 = vld [vmem:[#allocation37_spill] sm:$0xff] }
 0x383   :  { %v2202_v61 = vpop.f32.mrf.mxu1  ;;  %v2411_v0 = vsub.f32 %v5310_v46, %v4821_v57 }
 0x384   :  { %2592 = vst.msk [vmem:[%s5130_s2 + $0xe0] sm:$0xff] %vm2563_vm2, %v2527_v31  ;;  %v2530_v58 = vmax.f32 %v2466_v53, 0.0  ;;  %v2465_v42 = vmul.f32 %v2401_v28, %v2202_v61  ;;  %v4989_v53 = vpop.f32.mrf.mxu0  ;;  %v5311_v61 = vld [vmem:[#allocation38_spill] sm:$0xff] }
 0x385   :  { %v3422_v51 = vpop.f32.mrf.mxu1  ;;  %v2414_v26 = vsub.f32 %v5311_v61, %v4835_v56 }
 0x386   :  { %2595 = vst.msk [vmem:[%s5130_s2 + $0xf8] sm:$0xff] %vm2563_vm2, %v2530_v58  ;;  %v2529_v4 = vmax.f32 %v2465_v42, 0.0  ;;  %v2468_v63 = vmul.f32 %v3422_v51, %v2404_v29  ;;  %v5312_v42 = vld [vmem:[#allocation36_spill] sm:$0xff] }
 0x387   :  { %v2212_v19 = vpop.f32.mrf.mxu1  ;;  %v2413_v51 = vsub.f32 %v5312_v42, %v4849_v32 }
 0x388   :  { %2594 = vst.msk [vmem:[%s5130_s2 + $0xf0] sm:$0xff] %vm2563_vm2, %v2529_v4  ;;  %v2532_v7 = vmax.f32 %v2468_v63, 0.0  ;;  %v2467_v54 = vmul.f32 %v2403_v9, %v2212_v19  ;;  %v5003_v4 = vpop.f32.mrf.mxu0  ;;  %v5313_v63 = vld [vmem:[#allocation43_spill] sm:$0xff] }
 0x389   :  { %v3425_v21 = vpop.f32.mrf.mxu1  ;;  %v2416_v19 = vsub.f32 %v5313_v63, %v4863_v2 }
 0x38a   :  { %2597 = vst.msk [vmem:[%s5130_s2 + $0x108] sm:$0xff] %vm2563_vm2, %v2532_v7  ;;  %v2531_v62 = vmax.f32 %v2467_v54, 0.0  ;;  %v2470_v34 = vmul.f32 %v3425_v21, %v2406_v13  ;;  %v5314_v7 = vld [vmem:[#allocation41_spill] sm:$0xff] }
 0x38b   :  { %v2222_v59 = vpop.f32.mrf.mxu1  ;;  %v2415_v54 = vsub.f32 %v5314_v7, %v4877_v47 }
 0x38c   :  { %2596 = vst.msk [vmem:[%s5130_s2 + $0x100] sm:$0xff] %vm2563_vm2, %v2531_v62  ;;  %v2534_v22 = vmax.f32 %v2470_v34, 0.0  ;;  %v2469_v33 = vmul.f32 %v2405_v18, %v2222_v59  ;;  %v1934_v18 = vpop.f32.mrf.mxu0  ;;  %v5315_v62 = vld [vmem:[#allocation42_spill] sm:$0xff] }
 0x38d   :  { %v3428_v43 = vpop.f32.mrf.mxu1  ;;  %v2418_v34 = vsub.f32 %v5315_v62, %v4891_v36 }
 0x38e   :  { %2599 = vst.msk [vmem:[%s5130_s2 + $0x118] sm:$0xff] %vm2563_vm2, %v2534_v22  ;;  %v2533_v24 = vmax.f32 %v2469_v33, 0.0  ;;  %v2472_v39 = vmul.f32 %v3428_v43, %v2408_v6  ;;  %v5316_v6 = vld [vmem:[#allocation40_spill] sm:$0xff]  ;;  %v3360_v55 = vpop.f32.mrf.mxu0 }
 0x38f   :  { %v2232_v10 = vpop.f32.mrf.mxu1  ;;  %v2417_v22 = vsub.f32 %v5316_v6, %v4905_v27 }
 0x390   :  { %2598 = vst.msk [vmem:[%s5130_s2 + $0x110] sm:$0xff] %vm2563_vm2, %v2533_v24  ;;  %v2536_v8 = vmax.f32 %v2472_v39, 0.0  ;;  %v2471_v60 = vmul.f32 %v2407_v17, %v2232_v10  ;;  %v5317_v17 = vld [vmem:[#allocation47_spill] sm:$0xff] }
 0x391   :  { %v3431_v3 = vpop.f32.mrf.mxu1  ;;  %v2420_v24 = vsub.f32 %v5317_v17, %v4919_v40 }
 0x392   :  { %2601 = vst.msk [vmem:[%s5130_s2 + $0x128] sm:$0xff] %vm2563_vm2, %v2536_v8  ;;  %v2535_v15 = vmax.f32 %v2471_v60, 0.0  ;;  %v2474_v23 = vmul.f32 %v3431_v3, %v2410_v35  ;;  %v2419_v35 = vsub.f32 %v5318_v41, %v4933_v52  ;;  %v1944_v3 = vpop.f32.mrf.mxu0 }
 0x393   :  { %v2242_v49 = vpop.f32.mrf.mxu1 }
 0x394   :  { %2600 = vst.msk [vmem:[%s5130_s2 + $0x120] sm:$0xff] %vm2563_vm2, %v2535_v15  ;;  %v2538_v30 = vmax.f32 %v2474_v23, 0.0  ;;  %v2473_v16 = vmul.f32 %v2409_v37, %v2242_v49  ;;  %v2422_v37 = vsub.f32 %v5319_v25, %v4947_v38  ;;  %v5320_v49 = vld [vmem:[#allocation44_spill] sm:$0xff] }
 0x395   :  { %v3434_v12 = vpop.f32.mrf.mxu1  ;;  %v2421_v20 = vsub.f32 %v5320_v49, %v4961_v44 }
 0x396   :  { %2603 = vst.msk [vmem:[%s5130_s2 + $0x138] sm:$0xff] %vm2563_vm2, %v2538_v30  ;;  %v2537_v28 = vmax.f32 %v2473_v16, 0.0  ;;  %v2476_v31 = vmul.f32 %v3434_v12, %v2412_v48  ;;  %v3363_v16 = vpop.f32.mrf.mxu0  ;;  %v5321_v12 = vld [vmem:[#allocation51_spill] sm:$0xff] }
 0x397   :  { %v2252_v5 = vpop.f32.mrf.mxu1  ;;  %v2424_v46 = vsub.f32 %v5321_v12, %v4975_v11 }
 0x398   :  { %2602 = vst.msk [vmem:[%s5130_s2 + $0x130] sm:$0xff] %vm2563_vm2, %v2537_v28  ;;  %v2540_v29 = vmax.f32 %v2476_v31, 0.0  ;;  %v2475_v57 = vmul.f32 %v2411_v0, %v2252_v5  ;;  %v5322_v31 = vld [vmem:[#allocation49_spill] sm:$0xff] }
 0x399   :  { %v3437_v58 = vpop.f32.mrf.mxu1  ;;  %v2423_v5 = vsub.f32 %v5322_v31, %v4989_v53 }
 0x39a   :  { %2605 = vst.msk [vmem:[%s5130_s2 + $0x148] sm:$0xff] %vm2563_vm2, %v2540_v29  ;;  %v2539_v1 = vmax.f32 %v2475_v57, 0.0  ;;  %v2478_v9 = vmul.f32 %v3437_v58, %v2414_v26  ;;  %v1954_v29 = vpop.f32.mrf.mxu0  ;;  %v5323_v57 = vld [vmem:[#allocation50_spill] sm:$0xff] }
 0x39b   :  { %v2262_v56 = vpop.f32.mrf.mxu1  ;;  %v2426_v58 = vsub.f32 %v5323_v57, %v5003_v4  ;;  %v5325_v4 = vld [vmem:[#allocation55_spill] sm:$0xff] }
 0x39c   :  { %2604 = vst.msk [vmem:[%s5130_s2 + $0x140] sm:$0xff] %vm2563_vm2, %v2539_v1  ;;  %v2542_v45 = vmax.f32 %v2478_v9, 0.0  ;;  %v2477_v32 = vmul.f32 %v2413_v51, %v2262_v56  ;;  %v5324_v1 = vld [vmem:[#allocation48_spill] sm:$0xff] }
 0x39d   :  { %v3440_v13 = vpop.f32.mrf.mxu1  ;;  %v2425_v9 = vsub.f32 %v5324_v1, %v1934_v18 }
 0x39e   :  { %2607 = vst.msk [vmem:[%s5130_s2 + $0x158] sm:$0xff] %vm2563_vm2, %v2542_v45  ;;  %v2541_v21 = vmax.f32 %v2477_v32, 0.0  ;;  %v2480_v50 = vmul.f32 %v3440_v13, %v2416_v19  ;;  %v3366_v19 = vpop.f32.mrf.mxu0  ;;  %v2428_v32 = vsub.f32 %v5325_v4, %v3360_v55 }
 0x39f   :  { %v2272_v2 = vpop.f32.mrf.mxu1 }
 0x3a0   :  { %2606 = vst.msk [vmem:[%s5130_s2 + $0x150] sm:$0xff] %vm2563_vm2, %v2541_v21  ;;  %v2544_v59 = vmax.f32 %v2480_v50, 0.0  ;;  %v2479_v14 = vmul.f32 %v2415_v54, %v2272_v2  ;;  %v5326_v21 = vld [vmem:[#allocation53_spill] sm:$0xff]  ;;  %v1964_v62 = vpop.f32.mrf.mxu0 }
 0x3a1   :  { %v3443_v47 = vpop.f32.mrf.mxu1  ;;  %v2427_v50 = vsub.f32 %v5326_v21, %v1944_v3 }
 0x3a2   :  { %2609 = vst.msk [vmem:[%s5130_s2 + $0x168] sm:$0xff] %vm2563_vm2, %v2544_v59  ;;  %v2543_v33 = vmax.f32 %v2479_v14, 0.0  ;;  %v2482_v43 = vmul.f32 %v3443_v47, %v2418_v34  ;;  %v5327_v59 = vld [vmem:[#allocation54_spill] sm:$0xff]  ;;  %v3369_v17 = vpop.f32.mrf.mxu0 }
 0x3a3   :  { %v2282_v36 = vpop.f32.mrf.mxu1  ;;  %v2430_v14 = vsub.f32 %v5327_v59, %v3363_v16 }
 0x3a4   :  { %2608 = vst.msk [vmem:[%s5130_s2 + $0x160] sm:$0xff] %vm2563_vm2, %v2543_v33  ;;  %v2546_v39 = vmax.f32 %v2482_v43, 0.0  ;;  %v2481_v10 = vmul.f32 %v2417_v22, %v2282_v36  ;;  %v5328_v33 = vld [vmem:[#allocation52_spill] sm:$0xff]  ;;  %v1974_v25 = vpop.f32.mrf.mxu0 }
 0x3a5   :  { %v3446_v27 = vpop.f32.mrf.mxu1  ;;  %v2429_v43 = vsub.f32 %v5328_v33, %v1954_v29 }
 0x3a6   :  { %2611 = vst.msk [vmem:[%s5130_s2 + $0x178] sm:$0xff] %vm2563_vm2, %v2546_v39  ;;  %v2545_v8 = vmax.f32 %v2481_v10, 0.0  ;;  %v2484_v60 = vmul.f32 %v3446_v27, %v2420_v24  ;;  %v5329_v39 = vld [vmem:[#allocation59_spill] sm:$0xff] }
 0x3a7   :  { %v2292_v40 = vpop.f32.mrf.mxu1  ;;  %v2432_v10 = vsub.f32 %v5329_v39, %v3366_v19 }
 0x3a8   :  { %2610 = vst.msk [vmem:[%s5130_s2 + $0x170] sm:$0xff] %vm2563_vm2, %v2545_v8  ;;  %v2548_v15 = vmax.f32 %v2484_v60, 0.0  ;;  %v2483_v23 = vmul.f32 %v2419_v35, %v2292_v40  ;;  %v5330_v8 = vld [vmem:[#allocation57_spill] sm:$0xff] }
 0x3a9   :  { %v3449_v52 = vpop.f32.mrf.mxu1  ;;  %v2431_v60 = vsub.f32 %v5330_v8, %v1964_v62 }
 0x3aa   :  { %2613 = vst.msk [vmem:[%s5130_s2 + $0x188] sm:$0xff] %vm2563_vm2, %v2548_v15  ;;  %v2547_v48 = vmax.f32 %v2483_v23, 0.0  ;;  %v2486_v30 = vmul.f32 %v3449_v52, %v2422_v37  ;;  %v5331_v15 = vld [vmem:[#allocation58_spill] sm:$0xff] }
 0x3ab   :  { %v2302_v38 = vpop.f32.mrf.mxu1  ;;  %v2434_v23 = vsub.f32 %v5331_v15, %v3369_v17 }
 0x3ac   :  { %2612 = vst.msk [vmem:[%s5130_s2 + $0x180] sm:$0xff] %vm2563_vm2, %v2547_v48  ;;  %v2550_v0 = vmax.f32 %v2486_v30, 0.0  ;;  %v2485_v28 = vmul.f32 %v2421_v20, %v2302_v38  ;;  %v5332_v48 = vld [vmem:[#allocation56_spill] sm:$0xff] }
 0x3ad   :  { %v3452_v44 = vpop.f32.mrf.mxu1  ;;  %v2433_v30 = vsub.f32 %v5332_v48, %v1974_v25 }
 0x3ae   :  { %2615 = vst.msk [vmem:[%s5130_s2 + $0x198] sm:$0xff] %vm2563_vm2, %v2550_v0  ;;  %v2549_v61 = vmax.f32 %v2485_v28, 0.0  ;;  %v2488_v26 = vmul.f32 %v3452_v44, %v2424_v46 }
 0x3af   :  { %v2312_v11 = vpop.f32.mrf.mxu1 }
 0x3b0   :  { %2614 = vst.msk [vmem:[%s5130_s2 + $0x190] sm:$0xff] %vm2563_vm2, %v2549_v61  ;;  %v2552_v42 = vmax.f32 %v2488_v26, 0.0  ;;  %v2487_v51 = vmul.f32 %v2423_v5, %v2312_v11 }
 0x3b1   :  { %v3455_v53 = vpop.f32.mrf.mxu1 }
 0x3b2   :  { %2617 = vst.msk [vmem:[%s5130_s2 + $0x1a8] sm:$0xff] %vm2563_vm2, %v2552_v42  ;;  %v2551_v56 = vmax.f32 %v2487_v51, 0.0  ;;  %v2490_v63 = vmul.f32 %v3455_v53, %v2426_v58 }
 0x3b3   :  { %v2322_v45 = vpop.f32.mrf.mxu1 }
 0x3b4   :  { %2616 = vst.msk [vmem:[%s5130_s2 + $0x1a0] sm:$0xff] %vm2563_vm2, %v2551_v56  ;;  %v2554_v13 = vmax.f32 %v2490_v63, 0.0  ;;  %v2489_v7 = vmul.f32 %v2425_v9, %v2322_v45 }
 0x3b5   :  { %v3458_v54 = vpop.f32.mrf.mxu1 }
 0x3b6   :  { %2619 = vst.msk [vmem:[%s5130_s2 + $0x1b8] sm:$0xff] %vm2563_vm2, %v2554_v13  ;;  %v2553_v18 = vmax.f32 %v2489_v7, 0.0  ;;  %v2492_v2 = vmul.f32 %v3458_v54, %v2428_v32 }
 0x3b7   :  { %v2332_v34 = vpop.f32.mrf.mxu1 }
 0x3b8   :  { %2618 = vst.msk [vmem:[%s5130_s2 + $0x1b0] sm:$0xff] %vm2563_vm2, %v2553_v18  ;;  %v2556_v47 = vmax.f32 %v2492_v2, 0.0  ;;  %v2491_v6 = vmul.f32 %v2427_v50, %v2332_v34 }
 0x3b9   :  { %v3461_v22 = vpop.f32.mrf.mxu1 }
 0x3ba   :  { %2621 = vst.msk [vmem:[%s5130_s2 + $0x1c8] sm:$0xff] %vm2563_vm2, %v2556_v47  ;;  %v2555_v55 = vmax.f32 %v2491_v6, 0.0  ;;  %v2494_v36 = vmul.f32 %v3461_v22, %v2430_v14 }
 0x3bb   :  { %v2342_v24 = vpop.f32.mrf.mxu1 }
 0x3bc   :  { %2620 = vst.msk [vmem:[%s5130_s2 + $0x1c0] sm:$0xff] %vm2563_vm2, %v2555_v55  ;;  %v2558_v27 = vmax.f32 %v2494_v36, 0.0  ;;  %v2493_v41 = vmul.f32 %v2429_v43, %v2342_v24 }
 0x3bd   :  { %v3464_v35 = vpop.f32.mrf.mxu1 }
 0x3be   :  { %2623 = vst.msk [vmem:[%s5130_s2 + $0x1d8] sm:$0xff] %vm2563_vm2, %v2558_v27  ;;  %v2557_v3 = vmax.f32 %v2493_v41, 0.0  ;;  %v2496_v40 = vmul.f32 %v3464_v35, %v2432_v10 }
 0x3bf   :  { %v2352_v37 = vpop.f32.mrf.mxu1 }
 0x3c0   :  { %2622 = vst.msk [vmem:[%s5130_s2 + $0x1d0] sm:$0xff] %vm2563_vm2, %v2557_v3  ;;  %v2560_v52 = vmax.f32 %v2496_v40, 0.0  ;;  %v2495_v49 = vmul.f32 %v2431_v60, %v2352_v37 }
 0x3c1   :  { %v3467_v20 = vpop.f32.mrf.mxu1 }
 0x3c2   :  { %2625 = vst.msk [vmem:[%s5130_s2 + $0x1e8] sm:$0xff] %vm2563_vm2, %v2560_v52  ;;  %v2559_v16 = vmax.f32 %v2495_v49, 0.0  ;;  %v2498_v38 = vmul.f32 %v3467_v20, %v2434_v23 }
 0x3c3   :  { %v2362_v12 = vpop.f32.mrf.mxu1 }
 0x3c4   :  { %2624 = vst.msk [vmem:[%s5130_s2 + $0x1e0] sm:$0xff] %vm2563_vm2, %v2559_v16  ;;  %v2562_v46 = vmax.f32 %v2498_v38, 0.0  ;;  %v2497_v0 = vmul.f32 %v2433_v30, %v2362_v12 }
 0x3c6   :  { %2627 = vst.msk [vmem:[%s5130_s2 + $0x1f8] sm:$0xff] %vm2563_vm2, %v2562_v46  ;;  %v2561_v28 = vmax.f32 %v2497_v0, 0.0 }
 0x3c8   :  { %2626 = vst.msk [vmem:[%s5130_s2 + $0x1f0] sm:$0xff] %vm2563_vm2, %v2561_v28 }

// kernel: content_encoder_forward.7
= control target key start
LH: loop header
LB: loop body
LE: loop exit
PB: predicated region body
PF: predicated region fallthrough
CT: control target
= control target key end

     0   :  { %vm362_vm0 = vcmask 523264   ;;  %v1170_v46 = vmov 0.0   ;;  %vm1171_vm1 = vmmov 0   ;;  %v516_v54 = vlaneseq  ;;  %s1410_s1 = inlined_call_operand.vmem [shape: bf16[576,128], index: 1, kind: input, shape index: {}]   ;;  %s1411_s0 = inlined_call_operand.vmem [shape: bf16[32,576], index: 0, kind: input, shape index: {}]   ;;  %s1412_s2 = inlined_call_operand.vmem [shape: f32[32,128], index: 2, kind: output, shape index: {}]  }
   0x1   :  { %v1118_v0 = vld [vmem:[%s1410_s1 + $0x78] sm:$0xff]   ;;  %v1122_v4 = vld [vmem:[%s1410_s1 + $0x70] sm:$0xff]   ;;  %v1126_v8 = vld [vmem:[%s1410_s1 + $0x68] sm:$0xff]   ;;  %vm552_vm5 = vcmask 261120   ;;  %vm707_vm11 = vcmask 15360  }
   0x2   :  { %v1119_v1 = vld [vmem:[%s1410_s1 + $0xf8] sm:$0xff]   ;;  %982 = vmatprep.subr.bf16.mxu0 %v1118_v0  ;;  %v1123_v5 = vld [vmem:[%s1410_s1 + $0xf0] sm:$0xff]   ;;  %v1127_v9 = vld [vmem:[%s1410_s1 + $0xe8] sm:$0xff]   ;;  %v1329_v59 = vshrl.u32 %v516_v54, 7 }
   0x3   :  { %v1120_v2 = vld [vmem:[%s1410_s1 + $0x38] sm:$0xff]   ;;  %1010 = vmatprep.subr.bf16.mxu1 %v1119_v1  ;;  %v1124_v6 = vld [vmem:[%s1410_s1 + $0x30] sm:$0xff]   ;;  %v1128_v10 = vld [vmem:[%s1410_s1 + $0x28] sm:$0xff]  }
   0x4   :  { %v1121_v3 = vld [vmem:[%s1410_s1 + $0xb8] sm:$0xff]   ;;  %983 = vmatpush3.bf16.msra.mxu0 %v1120_v2  ;;  %v1125_v7 = vld [vmem:[%s1410_s1 + $0xb0] sm:$0xff]   ;;  %v1129_v11 = vld [vmem:[%s1410_s1 + $0xa8] sm:$0xff]   ;;  %v520_v0 = vmul.u32 16, %v1329_v59 }
   0x5   :  { %1011 = vmatpush3.bf16.msra.mxu1 %v1121_v3  ;;  %984 = vmatprep.subr.bf16.mxu0 %v1122_v4  ;;  %v1130_v12 = vld [vmem:[%s1410_s1 + $0x60] sm:$0xff]   ;;  %v1134_v16 = vld [vmem:[%s1410_s1 + $0x58] sm:$0xff]   ;;  %v1138_v20 = vld [vmem:[%s1410_s1 + $0x50] sm:$0xff]  }
   0x6   :  { %1012 = vmatprep.subr.bf16.mxu1 %v1123_v5  ;;  %v1131_v13 = vld [vmem:[%s1410_s1 + $0xe0] sm:$0xff]   ;;  %v1135_v17 = vld [vmem:[%s1410_s1 + $0xd8] sm:$0xff]   ;;  %v1139_v21 = vld [vmem:[%s1410_s1 + $0xd0] sm:$0xff]  }
   0x7   :  { %v1132_v14 = vld [vmem:[%s1410_s1 + $0x20] sm:$0xff]   ;;  %v1136_v18 = vld [vmem:[%s1410_s1 + $0x18] sm:$0xff]   ;;  %v1140_v22 = vld [vmem:[%s1410_s1 + $0x10] sm:$0xff]  }
   0x8   :  { %985 = vmatpush3.bf16.msra.mxu0 %v1124_v6  ;;  %v1133_v15 = vld [vmem:[%s1410_s1 + $0xa0] sm:$0xff]   ;;  %v1137_v19 = vld [vmem:[%s1410_s1 + $0x98] sm:$0xff]   ;;  %v1141_v23 = vld [vmem:[%s1410_s1 + $0x90] sm:$0xff]  }
   0x9   :  { %1013 = vmatpush3.bf16.msra.mxu1 %v1125_v7  ;;  %986 = vmatprep.subr.bf16.mxu0 %v1126_v8  ;;  %v1142_v24 = vld [vmem:[%s1410_s1 + $0x48] sm:$0xff]   ;;  %v1146_v28 = vld [vmem:[%s1410_s1 + $0x40] sm:$0xff]   ;;  %v1156_v36 = vld [vmem:[%s1410_s1 + $0x118] sm:$0xff]   ;;  %v517_v7 = vand.u32 127, %v516_v54 }
   0xa   :  { %1014 = vmatprep.subr.bf16.mxu1 %v1127_v9  ;;  %v1143_v25 = vld [vmem:[%s1410_s1 + $0xc8] sm:$0xff]   ;;  %v1147_v29 = vld [vmem:[%s1410_s1 + $0xc0] sm:$0xff]   ;;  %v1157_v37 = vld [vmem:[%s1410_s1 + $0x110] sm:$0xff]  }
   0xb   :  { %v1144_v26 = vld [vmem:[%s1410_s1 + $0x8] sm:$0xff]   ;;  %v1148_v30 = vld [vmem:[%s1410_s1] sm:$0xff]   ;;  %vm521_vm2 = vcmp.ge.s32.totalorder %v517_v7, %v520_v0 }
   0xc   :  { %987 = vmatpush3.bf16.msra.mxu0 %v1128_v10  ;;  %v1145_v27 = vld [vmem:[%s1410_s1 + $0x88] sm:$0xff]   ;;  %v1149_v31 = vld [vmem:[%s1410_s1 + $0x80] sm:$0xff]   ;;  %v522_v10 = vadd.s32 16, %v520_v0 }
   0xd   :  { %1015 = vmatpush3.bf16.msra.mxu1 %v1129_v11  ;;  %988 = vmatprep.subr.bf16.mxu0 %v1130_v12  ;;  %v1150_v32 = vld [vmem:[%s1411_s0] ss:$20 sps:$4 sm:$0xff]   ;;  %v1152_v33 = vld [vmem:[%s1411_s0 + $0x4] ss:$20 sps:$4 sm:$0xff]   ;;  %v1153_v34 = vld [vmem:[%s1411_s0 + $0x8] ss:$20 sps:$4 sm:$0xff]  }
   0xe   :  { %1016 = vmatprep.subr.bf16.mxu1 %v1131_v13  ;;  %v1155_v35 = vld [vmem:[%s1411_s0 + $0xc] ss:$20 sps:$4 sm:$0xff]   ;;  %401 = vmatprep.mubr.bf16.mxu0 %v1152_v33  ;;  %v1160_v39 = vld [vmem:[%s1411_s0 + $0x34] ss:$20 sps:$4 sm:$0xff]   ;;  %v1163_v42 = vld [vmem:[%s1411_s0 + $0x30] ss:$20 sps:$4 sm:$0xff]   ;;  %vm523_vm3 = vcmp.lt.s32.totalorder %v517_v7, %v522_v10 }
   0xf   :  { %450 = vmatprep.mubr.bf16.mxu1 %v1155_v35  ;;  %v1158_v38 = vld [vmem:[%s1411_s0 + $0x2c] ss:$20 sps:$4 sm:$0xff]   ;;  %v1162_v40 = vld [vmem:[%s1411_s0 + $0x28] ss:$20 sps:$4 sm:$0xff]   ;;  %v1166_v43 = vld [vmem:[%s1411_s0 + $0x10] ss:$20 sps:$4 sm:$0xff]  }
  0x10   :  { %989 = vmatpush3.bf16.msra.mxu0 %v1132_v14  ;;  %v1164_v41 = vld [vmem:[%s1410_s1 + $0x108] sm:$0xff]   ;;  %v1165_v44 = vld [vmem:[%s1410_s1 + $0x100] sm:$0xff]   ;;  %vm524_vm4 = vmand %vm521_vm2, %vm523_vm3  ;;  %v529_v35 = vadd.s32 24, %v1329_v59  ;;  %vm720_vm3 = vcmask 1041408  }
  0x11   :  { %1017 = vmatpush3.bf16.msra.mxu1 %v1133_v15  ;;  %990 = vmatprep.subr.bf16.mxu0 %v1134_v16  ;;  %v1167_v45 = vld [vmem:[%s1411_s0 + $0x38] ss:$20 sps:$4 sm:$0xff]  }
  0x12   :  { %1018 = vmatprep.subr.bf16.mxu1 %v1135_v17 }
  0x14   :  { %991 = vmatpush3.bf16.msra.mxu0 %v1136_v18 }
  0x15   :  { %1019 = vmatpush3.bf16.msra.mxu1 %v1137_v19  ;;  %992 = vmatprep.subr.bf16.mxu0 %v1138_v20 }
  0x16   :  { %1020 = vmatprep.subr.bf16.mxu1 %v1139_v21 }
  0x18   :  { %993 = vmatpush3.bf16.msra.mxu0 %v1140_v22 }
  0x19   :  { %1021 = vmatpush3.bf16.msra.mxu1 %v1141_v23  ;;  %994 = vmatprep.subr.bf16.mxu0 %v1142_v24 }
  0x1a   :  { %1022 = vmatprep.subr.bf16.mxu1 %v1143_v25 }
  0x1c   :  { %995 = vmatpush3.bf16.msra.mxu0 %v1144_v26 }
  0x1d   :  { %1023 = vmatpush3.bf16.msra.mxu1 %v1145_v27  ;;  %996 = vmatprep.subr.bf16.mxu0 %v1146_v28  ;;  %v965_v27 = vsel %vm524_vm4, 1.0, %v1170_v46 }
  0x1e   :  { %1024 = vmatprep.subr.bf16.mxu1 %v1147_v29  ;;  %v530_v29 = vmul.u32 16, %v517_v7 }
  0x20   :  { %997 = vmatpush3.bf16.msra.mxu0 %v1148_v30  ;;  %v535_v30 = vadd.s32 16, %v530_v29  ;;  %vm531_vm6 = vcmp.ge.s32.totalorder %v1329_v59, %v530_v29 }
  0x21   :  { %1025 = vmatpush3.bf16.msra.mxu1 %v1149_v31  ;;  %1064 = vmatprep.subr.bf16.mxu0 %v1156_v36  ;;  %v527_v31 = vadd.s32 8, %v1329_v59 }
  0x22   :  { %1076 = vmatprep.subr.mxu1 %v1170_v46  ;;  %vm536_vm7 = vcmp.lt.s32.totalorder %v1329_v59, %v535_v30 }
  0x23   :  { %402 = vmatmul.mubr.bf16.vlgmr.msra.gmra.mxu0 %v1150_v32  ;;  %vm540_vm8 = vmand %vm531_vm6, %vm536_vm7  ;;  %vm532_vm9 = vcmp.ge.s32.totalorder %v527_v31, %v530_v29  ;;  %vm537_vm10 = vcmp.lt.s32.totalorder %v527_v31, %v535_v30 }
  0x24   :  { %451 = vmatmul.mubr.bf16.vlgmr.msra.gmra.mxu1 %v1153_v34  ;;  %1065 = vmatpush3.bf16.msra.mxu0 %v1156_v36  ;;  %v966_v32 = vsel %vm540_vm8, 1.0, %v1170_v46  ;;  %vm1363_vm12 = vmand %vm532_vm9, %vm537_vm10  ;;  %v528_v34 = vadd.s32 16, %v1329_v59 }
  0x25   :  { %1066 = vmatprep.subr.bf16.mxu0 %v1157_v37  ;;  %409 = vmatprep.mubr.bf16.mxu0 %v1158_v38 }
  0x26   :  { %458 = vmatprep.mubr.bf16.mxu1 %v1160_v39  ;;  %vm533_vm13 = vcmp.ge.s32.totalorder %v528_v34, %v530_v29  ;;  %vm538_vm14 = vcmp.lt.s32.totalorder %v528_v34, %v535_v30 }
  0x27   :  { %vm542_vm15 = vmand %vm533_vm13, %vm538_vm14 }
  0x28   :  { %1067 = vmatpush3.bf16.msra.mxu0 %v1157_v37 }
  0x29   :  { %1068 = vmatprep.subr.bf16.mxu0 %v1164_v41 }
  0x2b   :  { %410 = vmatmul.mubr.bf16.gmra.mxu0 %v1162_v40 }
  0x2c   :  { %459 = vmatmul.mubr.bf16.gmra.mxu1 %v1163_v42  ;;  %1072 = vmatprep.mubr.msk.bf16.mxu0 %vm362_vm0, %v1166_v43 }
  0x2d   :  { %1069 = vmatpush3.bf16.msra.mxu0 %v1164_v41  ;;  %1084 = vmatprep.mubr.msk.f32.mxu1 %vm1171_vm1, %v1170_v46  ;;  %v967_v41 = vsel %vm1363_vm12, 1.0, %v1170_v46 }
  0x2e   :  { %1070 = vmatprep.subr.bf16.mxu0 %v1165_v44 }
  0x31   :  { %1071 = vmatpush3.bf16.msra.mxu0 %v1165_v44  ;;  %v968_v44 = vsel %vm542_vm15, 1.0, %v1170_v46 }
  0x32   :  { %1087 = vmatprep.subr.mxu0 %v1170_v46 }
  0x34   :  { %1073 = vmatmul.mubr.msk.bf16.vlgmr.msra.gmra.mxu0 %vm362_vm0, %v1167_v45  ;;  %vm534_vm0 = vcmp.ge.s32.totalorder %v529_v35, %v530_v29 }
  0x35   :  { %1095 = vmatprep.mubr.msk.f32.mxu0 %vm1171_vm1, %v1170_v46  ;;  %vm539_vm1 = vcmp.lt.s32.totalorder %v529_v35, %v535_v30 }
  0x36   :  { %vm1371_vm2 = vmand %vm534_vm0, %vm539_vm1 }
  0xe3   :  { %v998_v47 = vpop.f32.mrf.mxu0 }
  0xe4   :  { %v1026_v48 = vpop.f32.mrf.mxu1 }
  0xe5   :  { %v999_v49 = vpop.f32.mrf.mxu0 }
  0xe6   :  { %v1027_v50 = vpop.f32.mrf.mxu1  ;;  %v1000_v12 = vadd.f32 %v999_v49, %v998_v47 }
  0xe7   :  { %v1001_v51 = vpop.f32.mrf.mxu0  ;;  %v1028_v13 = vadd.f32 %v1027_v50, %v1026_v48  ;;  %v969_v48 = vsel %vm1371_vm2, 1.0, %v1170_v46 }
  0xe8   :  { %v1029_v52 = vpop.f32.mrf.mxu1 }
  0xe9   :  { %v1002_v53 = vpop.f32.mrf.mxu0  ;;  %v453_v21 = vadd.f32 %v1028_v13, %v1000_v12 }
  0xea   :  { %v1030_v55 = vpop.f32.mrf.mxu1  ;;  %v1003_v8 = vadd.f32 %v1002_v53, %v1001_v51 }
  0xeb   :  { %v1004_v56 = vpop.f32.mrf.mxu0  ;;  %v1031_v9 = vadd.f32 %v1030_v55, %v1029_v52 }
  0xec   :  { %v1032_v57 = vpop.f32.mrf.mxu1 }
  0xed   :  { %v1005_v58 = vpop.f32.mrf.mxu0  ;;  %v456_v19 = vadd.f32 %v1031_v9, %v1003_v8 }
  0xee   :  { %v1033_v60 = vpop.f32.mrf.mxu1  ;;  %v1006_v2 = vadd.f32 %v1005_v58, %v1004_v56 }
  0xef   :  { %v1007_v61 = vpop.f32.mrf.mxu0  ;;  %v1034_v3 = vadd.f32 %v1033_v60, %v1032_v57 }
  0xf0   :  { %v1035_v62 = vpop.f32.mrf.mxu1 }
  0xf1   :  { %v1008_v63 = vpop.f32.mrf.mxu0  ;;  %v461_v14 = vadd.f32 %v1034_v3, %v1006_v2 }
  0xf2   :  { %v1036_v1 = vpop.f32.mrf.mxu1  ;;  %v1009_v4 = vadd.f32 %v1008_v63, %v1007_v61 }
  0xf3   :  { %v1037_v5 = vadd.f32 %v1036_v1, %v1035_v62 }
  0xf4   :  { %v1074_v6 = vpop.f32.mrf.mxu0 }
  0xf5   :  { %v464_v15 = vadd.f32 %v1037_v5, %v1009_v4  ;;  %v1332_v17 = vadd.f32 %v1074_v6, %v461_v14 }
  0xf6   :  { %v501_v11 = vpop.f32.mrf.mxu0 }
  0xf7   :  { %v628_v24 = vmul.f32 %v1332_v17, %v1332_v17  ;;  %v1344_v25 = vadd.f32 %v501_v11, %v453_v21 }
  0xf8   :  { %v1075_v16 = vpop.f32.mrf.mxu0 }
  0xf9   :  { %v1334_v18 = vadd.f32 %v1075_v16, %v464_v15  ;;  %v626_v28 = vmul.f32 %v1344_v25, %v1344_v25 }
  0xfa   :  { %v504_v20 = vpop.f32.mrf.mxu0 }
  0xfb   :  { %v629_v22 = vmul.f32 %v1334_v18, %v1334_v18  ;;  %v1338_v23 = vadd.f32 %v504_v20, %v456_v19  ;;  %1077 = vmatpush3.msra.mxu1 %v1334_v18 }
  0xfc   :  { %1078 = vmatprep.subr.mxu1 %v1170_v46 }
  0xfd   :  { %1079 = vmatpush3.msra.mxu1 %v1332_v17  ;;  %1088 = vmatpush3.msra.mxu0 %v629_v22  ;;  %v627_v26 = vmul.f32 %v1338_v23, %v1338_v23 }
  0xfe   :  { %1080 = vmatprep.subr.mxu1 %v1170_v46  ;;  %1089 = vmatprep.subr.mxu0 %v1170_v46 }
  0xff   :  { %1081 = vmatpush3.msra.mxu1 %v1338_v23  ;;  %1090 = vmatpush3.msra.mxu0 %v628_v24 }
 0x100   :  { %1082 = vmatprep.subr.mxu1 %v1170_v46  ;;  %1091 = vmatprep.subr.mxu0 %v1170_v46 }
 0x101   :  { %1083 = vmatpush3.msra.mxu1 %v1344_v25  ;;  %1092 = vmatpush3.msra.mxu0 %v627_v26 }
 0x102   :  { %1085 = vmatmul.mubr.msk.f32.vlgmr.msra.gmra.mxu1 %vm552_vm5, %v965_v27  ;;  %1093 = vmatprep.subr.mxu0 %v1170_v46 }
 0x103   :  { %1094 = vmatpush3.msra.mxu0 %v626_v28  ;;  %1100 = vmatprep.mubr.msk.f32.mxu1 %vm707_vm11, %v966_v32 }
 0x104   :  { %1096 = vmatmul.mubr.msk.f32.vlgmr.msra.gmra.mxu0 %vm552_vm5, %v965_v27 }
 0x105   :  { %1108 = vmatprep.mubr.msk.f32.mxu0 %vm707_vm11, %v966_v32 }
 0x1c2   :  { %v622_v37 = vpop.f32.mrf.mxu1 }
 0x1c3   :  { %v700_v38 = vmul.f32 0.0625, %v622_v37 }
 0x1c4   :  { %v1086_v39 = vpop.f32.mrf.mxu1  ;;  %v696_v40 = vpop.f32.mrf.mxu0 }
 0x1c5   :  { %v701_v42 = vmul.f32 0.0625, %v696_v40  ;;  %v702_v43 = vmul.f32 %v700_v38, %v700_v38  ;;  %1098 = vmatprep.subr.msk.mxu1 %vm720_vm3, %v700_v38 }
 0x1c6   :  { %v1097_v45 = vpop.f32.mrf.mxu0  ;;  %1099 = vmatpush3.msk.msra.mxu1 %vm720_vm3, %v700_v38 }
 0x1c7   :  { %v703_v47 = vsub.f32 %v701_v42, %v702_v43  ;;  %1101 = vmatmul.mubr.msk.f32.vlgmr.msra.gmra.mxu1 %vm707_vm11, %v967_v41 }
 0x1c8   :  { %1103 = vmatprep.mubr.msk.f32.mxu1 %vm707_vm11, %v968_v44 }
 0x1c9   :  { %v704_v49 = vmax.f32 %v703_v47, 0.0 }
 0x1cb   :  { %v705_v50 = vadd.f32 1e-05, %v704_v49  ;;  %1104 = vmatmul.mubr.msk.f32.gmra.mxu1 %vm707_vm11, %v969_v48 }
 0x1cc   :  { %1111 = vmatprep.mubr.msk.f32.mxu1 %vm707_vm11, %v968_v44 }
 0x1cd   :  { %1168 = vrsqrt.f32 %v705_v50 }
 0x1da   :  { %v1169_v51 = vpop.eup %1168 }
 0x1db   :  { %1106 = vmatprep.subr.msk.mxu0 %vm720_vm3, %v1169_v51  ;;  %1114 = vmatprep.subr.msk.mxu1 %vm720_vm3, %v1169_v51 }
 0x1dc   :  { %1107 = vmatpush3.msk.msra.mxu0 %vm720_vm3, %v1169_v51  ;;  %1115 = vmatpush3.msk.msra.mxu1 %vm720_vm3, %v1169_v51 }
 0x1dd   :  { %1109 = vmatmul.mubr.msk.f32.vlgmr.msra.gmra.mxu0 %vm707_vm11, %v967_v41  ;;  %1112 = vmatmul.mubr.msk.f32.vlgmr.msra.gmra.mxu1 %vm707_vm11, %v969_v48 }
 0x287   :  { %v1102_v46 = vpop.f32.mrf.mxu1 }
 0x288   :  { %v898_v55 = vsub.f32 %v1338_v23, %v1102_v46 }
 0x289   :  { %v790_v52 = vpop.f32.mrf.mxu1 }
 0x28a   :  { %v897_v59 = vsub.f32 %v1344_v25, %v790_v52 }
 0x28b   :  { %v1105_v53 = vpop.f32.mrf.mxu1 }
 0x28c   :  { %v900_v56 = vsub.f32 %v1334_v18, %v1105_v53 }
 0x28d   :  { %v800_v54 = vpop.f32.mrf.mxu1 }
 0x28e   :  { %v899_v60 = vsub.f32 %v1332_v17, %v800_v54 }
 0x29d   :  { %v1110_v57 = vpop.f32.mrf.mxu0  ;;  %v1113_v58 = vpop.f32.mrf.mxu1 }
 0x29e   :  { %v902_v61 = vmul.f32 %v1110_v57, %v898_v55  ;;  %v904_v62 = vmul.f32 %v1113_v58, %v900_v56 }
 0x29f   :  { %v878_v63 = vpop.f32.mrf.mxu0  ;;  %v888_v0 = vpop.f32.mrf.mxu1 }
 0x2a0   :  { %v906_v1 = vmax.f32 %v902_v61, 0.0  ;;  %v908_v2 = vmax.f32 %v904_v62, 0.0  ;;  %v901_v3 = vmul.f32 %v897_v59, %v878_v63  ;;  %v903_v4 = vmul.f32 %v899_v60, %v888_v0 }
 0x2a2   :  { %910 = vst [vmem:[%s1412_s2 + $0x8] sm:$0xff] %v906_v1  ;;  %912 = vst [vmem:[%s1412_s2 + $0x18] sm:$0xff] %v908_v2  ;;  %v905_v5 = vmax.f32 %v901_v3, 0.0  ;;  %v907_v6 = vmax.f32 %v903_v4, 0.0 }
 0x2a4   :  { %909 = vst [vmem:[%s1412_s2] sm:$0xff] %v905_v5  ;;  %911 = vst [vmem:[%s1412_s2 + $0x10] sm:$0xff] %v907_v6 }

// kernel: content_encoder_forward.8
= control target key start
LH: loop header
LB: loop body
LE: loop exit
PB: predicated region body
PF: predicated region fallthrough
CT: control target
= control target key end

     0   :  { %vm1136_vm3 = vcmask 64512   ;;  %vm1302_vm7 = vcmask 1041408   ;;  %vm1298_vm8 = vcmask 15360   ;;  %s2357_s1 = inlined_call_operand.vmem [shape: bf16[1152,256], index: 1, kind: input, shape index: {}]   ;;  %s2358_s0 = inlined_call_operand.vmem [shape: bf16[8,1152], index: 0, kind: input, shape index: {}]   ;;  %s2359_s2 = inlined_call_operand.vmem [shape: f32[8,256], index: 2, kind: output, shape index: {}]  }
   0x1   :  { %v1634_v0 = vld [vmem:[%s2357_s1 + $0x74] ss:$8 sps:$4 sm:$0xff]   ;;  %v1638_v2 = vld [vmem:[%s2357_s1 + $0x70] ss:$8 sps:$4 sm:$0xff]   ;;  %v1640_v4 = vld [vmem:[%s2357_s1 + $0x64] ss:$8 sps:$4 sm:$0xff]  }
   0x2   :  { %v1636_v1 = vld [vmem:[%s2357_s1 + $0x174] ss:$8 sps:$4 sm:$0xff]   ;;  %913 = vmatprep.subr.bf16.mxu0 %v1634_v0  ;;  %v1639_v3 = vld [vmem:[%s2357_s1 + $0x170] ss:$8 sps:$4 sm:$0xff]   ;;  %v1642_v5 = vld [vmem:[%s2357_s1 + $0x164] ss:$8 sps:$4 sm:$0xff]  }
   0x3   :  { %954 = vmatprep.subr.bf16.mxu1 %v1636_v1  ;;  %914 = vmatpush1.bf16.msra.mxu0 %v1638_v2  ;;  %v1644_v6 = vld [vmem:[%s2357_s1 + $0x60] ss:$8 sps:$4 sm:$0xff]   ;;  %v1646_v8 = vld [vmem:[%s2357_s1 + $0x54] ss:$8 sps:$4 sm:$0xff]   ;;  %v1650_v10 = vld [vmem:[%s2357_s1 + $0x50] ss:$8 sps:$4 sm:$0xff]  }
   0x4   :  { %955 = vmatpush1.bf16.msra.mxu1 %v1639_v3  ;;  %915 = vmatprep.subr.bf16.mxu0 %v1640_v4  ;;  %v1645_v7 = vld [vmem:[%s2357_s1 + $0x160] ss:$8 sps:$4 sm:$0xff]   ;;  %v1648_v9 = vld [vmem:[%s2357_s1 + $0x154] ss:$8 sps:$4 sm:$0xff]   ;;  %v1651_v11 = vld [vmem:[%s2357_s1 + $0x150] ss:$8 sps:$4 sm:$0xff]  }
   0x5   :  { %956 = vmatprep.subr.bf16.mxu1 %v1642_v5  ;;  %v1652_v12 = vld [vmem:[%s2357_s1 + $0x44] ss:$8 sps:$4 sm:$0xff]   ;;  %v1656_v14 = vld [vmem:[%s2357_s1 + $0x40] ss:$8 sps:$4 sm:$0xff]   ;;  %v1658_v16 = vld [vmem:[%s2357_s1 + $0x34] ss:$8 sps:$4 sm:$0xff]  }
   0x6   :  { %v1654_v13 = vld [vmem:[%s2357_s1 + $0x144] ss:$8 sps:$4 sm:$0xff]   ;;  %v1657_v15 = vld [vmem:[%s2357_s1 + $0x140] ss:$8 sps:$4 sm:$0xff]   ;;  %v1660_v17 = vld [vmem:[%s2357_s1 + $0x134] ss:$8 sps:$4 sm:$0xff]  }
   0x7   :  { %916 = vmatpush1.bf16.msra.mxu0 %v1644_v6  ;;  %v1662_v18 = vld [vmem:[%s2357_s1 + $0x30] ss:$8 sps:$4 sm:$0xff]   ;;  %v1664_v20 = vld [vmem:[%s2357_s1 + $0x24] ss:$8 sps:$4 sm:$0xff]   ;;  %v1668_v22 = vld [vmem:[%s2357_s1 + $0x20] ss:$8 sps:$4 sm:$0xff]  }
   0x8   :  { %957 = vmatpush1.bf16.msra.mxu1 %v1645_v7  ;;  %917 = vmatprep.subr.bf16.mxu0 %v1646_v8  ;;  %v1663_v19 = vld [vmem:[%s2357_s1 + $0x130] ss:$8 sps:$4 sm:$0xff]   ;;  %v1666_v21 = vld [vmem:[%s2357_s1 + $0x124] ss:$8 sps:$4 sm:$0xff]   ;;  %v1669_v23 = vld [vmem:[%s2357_s1 + $0x120] ss:$8 sps:$4 sm:$0xff]  }
   0x9   :  { %958 = vmatprep.subr.bf16.mxu1 %v1648_v9  ;;  %v1670_v24 = vld [vmem:[%s2357_s1 + $0x14] ss:$8 sps:$4 sm:$0xff]   ;;  %v1674_v26 = vld [vmem:[%s2357_s1 + $0x10] ss:$8 sps:$4 sm:$0xff]   ;;  %v1676_v28 = vld [vmem:[%s2357_s1 + $0x4] ss:$8 sps:$4 sm:$0xff]  }
   0xa   :  { %v1672_v25 = vld [vmem:[%s2357_s1 + $0x114] ss:$8 sps:$4 sm:$0xff]   ;;  %v1675_v27 = vld [vmem:[%s2357_s1 + $0x110] ss:$8 sps:$4 sm:$0xff]   ;;  %v1678_v29 = vld [vmem:[%s2357_s1 + $0x104] ss:$8 sps:$4 sm:$0xff]  }
   0xb   :  { %918 = vmatpush1.bf16.msra.mxu0 %v1650_v10  ;;  %v1680_v30 = vld [vmem:[%s2357_s1] ss:$8 sps:$4 sm:$0xff]   ;;  %v1682_v32 = vld [vmem:[%s2357_s1 + $0xf4] ss:$8 sps:$4 sm:$0xff]   ;;  %v1686_v34 = vld [vmem:[%s2357_s1 + $0xf0] ss:$8 sps:$4 sm:$0xff]  }
   0xc   :  { %959 = vmatpush1.bf16.msra.mxu1 %v1651_v11  ;;  %919 = vmatprep.subr.bf16.mxu0 %v1652_v12  ;;  %v1681_v31 = vld [vmem:[%s2357_s1 + $0x100] ss:$8 sps:$4 sm:$0xff]   ;;  %v1684_v33 = vld [vmem:[%s2357_s1 + $0x1f4] ss:$8 sps:$4 sm:$0xff]   ;;  %v1687_v35 = vld [vmem:[%s2357_s1 + $0x1f0] ss:$8 sps:$4 sm:$0xff]  }
   0xd   :  { %960 = vmatprep.subr.bf16.mxu1 %v1654_v13  ;;  %v1688_v36 = vld [vmem:[%s2357_s1 + $0xe4] ss:$8 sps:$4 sm:$0xff]   ;;  %v1692_v38 = vld [vmem:[%s2357_s1 + $0xe0] ss:$8 sps:$4 sm:$0xff]   ;;  %v1694_v40 = vld [vmem:[%s2357_s1 + $0xd4] ss:$8 sps:$4 sm:$0xff]  }
   0xe   :  { %v1690_v37 = vld [vmem:[%s2357_s1 + $0x1e4] ss:$8 sps:$4 sm:$0xff]   ;;  %v1693_v39 = vld [vmem:[%s2357_s1 + $0x1e0] ss:$8 sps:$4 sm:$0xff]   ;;  %v1696_v41 = vld [vmem:[%s2357_s1 + $0x1d4] ss:$8 sps:$4 sm:$0xff]  }
   0xf   :  { %920 = vmatpush1.bf16.msra.mxu0 %v1656_v14  ;;  %v1698_v42 = vld [vmem:[%s2357_s1 + $0xd0] ss:$8 sps:$4 sm:$0xff]   ;;  %v1700_v44 = vld [vmem:[%s2357_s1 + $0xc4] ss:$8 sps:$4 sm:$0xff]   ;;  %v1704_v49 = vld [vmem:[%s2357_s1 + $0xc0] ss:$8 sps:$4 sm:$0xff]  }
  0x10   :  { %961 = vmatpush1.bf16.msra.mxu1 %v1657_v15  ;;  %921 = vmatprep.subr.bf16.mxu0 %v1658_v16  ;;  %v1699_v43 = vld [vmem:[%s2357_s1 + $0x1d0] ss:$8 sps:$4 sm:$0xff]   ;;  %v1702_v45 = vld [vmem:[%s2357_s1 + $0x1c4] ss:$8 sps:$4 sm:$0xff]   ;;  %v1705_v50 = vld [vmem:[%s2357_s1 + $0x1c0] ss:$8 sps:$4 sm:$0xff]  }
  0x11   :  { %962 = vmatprep.subr.bf16.mxu1 %v1660_v17  ;;  %v12_v46 = vld [vmem:[%s2358_s0] sm:$0xff]  ;;  %v13_v48 = vld [vmem:[%s2358_s0 + $0x8] sm:$0xff]  ;;  %v1706_v52 = vld [vmem:[%s2357_s1 + $0xb4] ss:$8 sps:$4 sm:$0xff]  }
  0x12   :  { %v1470_v47 = vcombine.high %v12_v46, %v12_v46  ;;  %v1472_v51 = vcombine.high %v13_v48, %v13_v48  ;;  %v1708_v53 = vld [vmem:[%s2357_s1 + $0x1b4] ss:$8 sps:$4 sm:$0xff]   ;;  %v1710_v54 = vld [vmem:[%s2357_s1 + $0xb0] ss:$8 sps:$4 sm:$0xff]   ;;  %v1712_v56 = vld [vmem:[%s2357_s1 + $0xa4] ss:$8 sps:$4 sm:$0xff]   ;;  %v1469_v6 = vcombine.low %v12_v46, %v12_v46  ;;  %v1471_v7 = vcombine.low %v13_v48, %v13_v48 }
  0x13   :  { %922 = vmatpush1.bf16.msra.mxu0 %v1662_v18  ;;  %v1711_v55 = vld [vmem:[%s2357_s1 + $0x1b0] ss:$8 sps:$4 sm:$0xff]   ;;  %v1714_v57 = vld [vmem:[%s2357_s1 + $0x1a4] ss:$8 sps:$4 sm:$0xff]   ;;  %v1716_v58 = vld [vmem:[%s2357_s1 + $0xa0] ss:$8 sps:$4 sm:$0xff]  }
  0x14   :  { %963 = vmatpush1.bf16.msra.mxu1 %v1663_v19  ;;  %923 = vmatprep.subr.bf16.mxu0 %v1664_v20  ;;  %v1717_v59 = vld [vmem:[%s2357_s1 + $0x1a0] ss:$8 sps:$4 sm:$0xff]   ;;  %v1718_v60 = vld [vmem:[%s2357_s1 + $0x94] ss:$8 sps:$4 sm:$0xff]   ;;  %v1722_v62 = vld [vmem:[%s2357_s1 + $0x90] ss:$8 sps:$4 sm:$0xff]  }
  0x15   :  { %964 = vmatprep.subr.bf16.mxu1 %v1666_v21  ;;  %945 = vmatprep.mubr.bf16.mxu0 %v1470_v47  ;;  %v1720_v61 = vld [vmem:[%s2357_s1 + $0x194] ss:$8 sps:$4 sm:$0xff]   ;;  %v1723_v63 = vld [vmem:[%s2357_s1 + $0x190] ss:$8 sps:$4 sm:$0xff]   ;;  %v1724_v0 = vld [vmem:[%s2357_s1 + $0x84] ss:$8 sps:$4 sm:$0xff]  }
  0x16   :  { %986 = vmatprep.mubr.bf16.mxu1 %v1472_v51  ;;  %v1726_v1 = vld [vmem:[%s2357_s1 + $0x184] ss:$8 sps:$4 sm:$0xff]   ;;  %v1728_v2 = vld [vmem:[%s2357_s1 + $0x80] ss:$8 sps:$4 sm:$0xff]   ;;  %v1736_v4 = vld [vmem:[%s2357_s1 + $0x274] ss:$8 sps:$4 sm:$0xff]  }
  0x17   :  { %924 = vmatpush1.bf16.msra.mxu0 %v1668_v22  ;;  %v1729_v3 = vld [vmem:[%s2357_s1 + $0x180] ss:$8 sps:$4 sm:$0xff]   ;;  %v1739_v5 = vld [vmem:[%s2357_s1 + $0x374] ss:$8 sps:$4 sm:$0xff]   ;;  %v1734_v8 = vld [vmem:[%s2357_s1 + $0x270] ss:$8 sps:$4 sm:$0xff]  }
  0x18   :  { %965 = vmatpush1.bf16.msra.mxu1 %v1669_v23  ;;  %925 = vmatprep.subr.bf16.mxu0 %v1670_v24  ;;  %v1737_v9 = vld [vmem:[%s2357_s1 + $0x370] ss:$8 sps:$4 sm:$0xff]   ;;  %v1742_v10 = vld [vmem:[%s2357_s1 + $0x264] ss:$8 sps:$4 sm:$0xff]   ;;  %v1740_v12 = vld [vmem:[%s2357_s1 + $0x260] ss:$8 sps:$4 sm:$0xff]  }
  0x19   :  { %966 = vmatprep.subr.bf16.mxu1 %v1672_v25  ;;  %v1745_v11 = vld [vmem:[%s2357_s1 + $0x364] ss:$8 sps:$4 sm:$0xff]   ;;  %v1743_v13 = vld [vmem:[%s2357_s1 + $0x360] ss:$8 sps:$4 sm:$0xff]   ;;  %v1748_v14 = vld [vmem:[%s2357_s1 + $0x254] ss:$8 sps:$4 sm:$0xff]  }
  0x1a   :  { %v1751_v15 = vld [vmem:[%s2357_s1 + $0x354] ss:$8 sps:$4 sm:$0xff]   ;;  %v1746_v16 = vld [vmem:[%s2357_s1 + $0x250] ss:$8 sps:$4 sm:$0xff]   ;;  %v1754_v18 = vld [vmem:[%s2357_s1 + $0x244] ss:$8 sps:$4 sm:$0xff]  }
  0x1b   :  { %926 = vmatpush1.bf16.msra.mxu0 %v1674_v26  ;;  %v1749_v17 = vld [vmem:[%s2357_s1 + $0x350] ss:$8 sps:$4 sm:$0xff]   ;;  %v1757_v19 = vld [vmem:[%s2357_s1 + $0x344] ss:$8 sps:$4 sm:$0xff]   ;;  %v1752_v20 = vld [vmem:[%s2357_s1 + $0x240] ss:$8 sps:$4 sm:$0xff]  }
  0x1c   :  { %967 = vmatpush1.bf16.msra.mxu1 %v1675_v27  ;;  %927 = vmatprep.subr.bf16.mxu0 %v1676_v28  ;;  %v1755_v21 = vld [vmem:[%s2357_s1 + $0x340] ss:$8 sps:$4 sm:$0xff]   ;;  %v1760_v22 = vld [vmem:[%s2357_s1 + $0x234] ss:$8 sps:$4 sm:$0xff]   ;;  %v1758_v24 = vld [vmem:[%s2357_s1 + $0x230] ss:$8 sps:$4 sm:$0xff]  }
  0x1d   :  { %968 = vmatprep.subr.bf16.mxu1 %v1678_v29  ;;  %v1763_v23 = vld [vmem:[%s2357_s1 + $0x334] ss:$8 sps:$4 sm:$0xff]   ;;  %v1761_v25 = vld [vmem:[%s2357_s1 + $0x330] ss:$8 sps:$4 sm:$0xff]   ;;  %v1766_v26 = vld [vmem:[%s2357_s1 + $0x224] ss:$8 sps:$4 sm:$0xff]  }
  0x1e   :  { %v1769_v27 = vld [vmem:[%s2357_s1 + $0x324] ss:$8 sps:$4 sm:$0xff]   ;;  %v1764_v28 = vld [vmem:[%s2357_s1 + $0x220] ss:$8 sps:$4 sm:$0xff]   ;;  %v1799_v51 = vld [vmem:[%s2357_s1 + $0x3d4] ss:$8 sps:$4 sm:$0xff]  }
  0x1f   :  { %928 = vmatpush1.bf16.msra.mxu0 %v1680_v30  ;;  %v1767_v29 = vld [vmem:[%s2357_s1 + $0x320] ss:$8 sps:$4 sm:$0xff]   ;;  %v1772_v30 = vld [vmem:[%s2357_s1 + $0x214] ss:$8 sps:$4 sm:$0xff]   ;;  %v1790_v46 = vld [vmem:[%s2357_s1 + $0x2e4] ss:$8 sps:$4 sm:$0xff]  }
  0x20   :  { %969 = vmatpush1.bf16.msra.mxu1 %v1681_v31  ;;  %929 = vmatprep.subr.bf16.mxu0 %v1682_v32  ;;  %v1775_v31 = vld [vmem:[%s2357_s1 + $0x314] ss:$8 sps:$4 sm:$0xff]   ;;  %v1793_v47 = vld [vmem:[%s2357_s1 + $0x3e4] ss:$8 sps:$4 sm:$0xff]   ;;  %v1788_v48 = vld [vmem:[%s2357_s1 + $0x2e0] ss:$8 sps:$4 sm:$0xff]  }
  0x21   :  { %970 = vmatprep.subr.bf16.mxu1 %v1684_v33  ;;  %v2159_v32 = vld [vmem:[%s2358_s0 + $0x10] sm:$0xff] }
  0x22   :  { %v1770_v33 = vld [vmem:[%s2357_s1 + $0x210] ss:$8 sps:$4 sm:$0xff]  }
  0x23   :  { %930 = vmatpush2.bf16.msra.mxu0 %v1686_v34  ;;  %v1773_v34 = vld [vmem:[%s2357_s1 + $0x310] ss:$8 sps:$4 sm:$0xff]  }
  0x24   :  { %971 = vmatpush2.bf16.msra.mxu1 %v1687_v35  ;;  %931 = vmatprep.subr.bf16.mxu0 %v1688_v36  ;;  %v1474_v35 = vcombine.high %v2159_v32, %v2159_v32  ;;  %v2172_v36 = vld [vmem:[%s2358_s0 + $0x18] sm:$0xff] }
  0x25   :  { %972 = vmatprep.subr.bf16.mxu1 %v1690_v37  ;;  %v1778_v37 = vld [vmem:[%s2357_s1 + $0x204] ss:$8 sps:$4 sm:$0xff]  }
  0x27   :  { %932 = vmatpush2.bf16.msra.mxu0 %v1692_v38  ;;  %v1476_v38 = vcombine.high %v2172_v36, %v2172_v36 }
  0x28   :  { %973 = vmatpush2.bf16.msra.mxu1 %v1693_v39  ;;  %933 = vmatprep.subr.bf16.mxu0 %v1694_v40  ;;  %v1781_v39 = vld [vmem:[%s2357_s1 + $0x304] ss:$8 sps:$4 sm:$0xff]   ;;  %v1776_v40 = vld [vmem:[%s2357_s1 + $0x200] ss:$8 sps:$4 sm:$0xff]  }
  0x29   :  { %974 = vmatprep.subr.bf16.mxu1 %v1696_v41  ;;  %v1779_v41 = vld [vmem:[%s2357_s1 + $0x300] ss:$8 sps:$4 sm:$0xff]  }
  0x2b   :  { %934 = vmatpush2.bf16.msra.mxu0 %v1698_v42  ;;  %v1784_v42 = vld [vmem:[%s2357_s1 + $0x2f4] ss:$8 sps:$4 sm:$0xff]  }
  0x2c   :  { %975 = vmatpush2.bf16.msra.mxu1 %v1699_v43  ;;  %935 = vmatprep.subr.bf16.mxu0 %v1700_v44  ;;  %v1787_v43 = vld [vmem:[%s2357_s1 + $0x3f4] ss:$8 sps:$4 sm:$0xff]   ;;  %v1782_v44 = vld [vmem:[%s2357_s1 + $0x2f0] ss:$8 sps:$4 sm:$0xff]  }
  0x2d   :  { %976 = vmatprep.subr.bf16.mxu1 %v1702_v45  ;;  %v1785_v45 = vld [vmem:[%s2357_s1 + $0x3f0] ss:$8 sps:$4 sm:$0xff]  }
  0x2f   :  { %936 = vmatpush2.bf16.msra.mxu0 %v1704_v49  ;;  %v1791_v49 = vld [vmem:[%s2357_s1 + $0x3e0] ss:$8 sps:$4 sm:$0xff]  }
  0x30   :  { %977 = vmatpush2.bf16.msra.mxu1 %v1705_v50  ;;  %937 = vmatprep.subr.bf16.mxu0 %v1706_v52  ;;  %v1796_v50 = vld [vmem:[%s2357_s1 + $0x2d4] ss:$8 sps:$4 sm:$0xff]   ;;  %v1794_v52 = vld [vmem:[%s2357_s1 + $0x2d0] ss:$8 sps:$4 sm:$0xff]  }
  0x31   :  { %978 = vmatprep.subr.bf16.mxu1 %v1708_v53  ;;  %v1797_v53 = vld [vmem:[%s2357_s1 + $0x3d0] ss:$8 sps:$4 sm:$0xff]  }
  0x33   :  { %938 = vmatpush2.bf16.msra.mxu0 %v1710_v54  ;;  %v1802_v54 = vld [vmem:[%s2357_s1 + $0x2c4] ss:$8 sps:$4 sm:$0xff]  }
  0x34   :  { %979 = vmatpush2.bf16.msra.mxu1 %v1711_v55  ;;  %939 = vmatprep.subr.bf16.mxu0 %v1712_v56  ;;  %v1805_v55 = vld [vmem:[%s2357_s1 + $0x3c4] ss:$8 sps:$4 sm:$0xff]   ;;  %v1800_v56 = vld [vmem:[%s2357_s1 + $0x2c0] ss:$8 sps:$4 sm:$0xff]  }
  0x35   :  { %980 = vmatprep.subr.bf16.mxu1 %v1714_v57  ;;  %v1803_v57 = vld [vmem:[%s2357_s1 + $0x3c0] ss:$8 sps:$4 sm:$0xff]  }
  0x37   :  { %940 = vmatpush2.bf16.msra.mxu0 %v1716_v58  ;;  %v1808_v58 = vld [vmem:[%s2357_s1 + $0x2b4] ss:$8 sps:$4 sm:$0xff]  }
  0x38   :  { %981 = vmatpush2.bf16.msra.mxu1 %v1717_v59  ;;  %941 = vmatprep.subr.bf16.mxu0 %v1718_v60  ;;  %v1811_v59 = vld [vmem:[%s2357_s1 + $0x3b4] ss:$8 sps:$4 sm:$0xff]   ;;  %v1806_v60 = vld [vmem:[%s2357_s1 + $0x2b0] ss:$8 sps:$4 sm:$0xff]  }
  0x39   :  { %982 = vmatprep.subr.bf16.mxu1 %v1720_v61  ;;  %v1809_v61 = vld [vmem:[%s2357_s1 + $0x3b0] ss:$8 sps:$4 sm:$0xff]  }
  0x3b   :  { %942 = vmatpush2.bf16.msra.mxu0 %v1722_v62  ;;  %v1814_v62 = vld [vmem:[%s2357_s1 + $0x2a4] ss:$8 sps:$4 sm:$0xff]  }
  0x3c   :  { %983 = vmatpush2.bf16.msra.mxu1 %v1723_v63  ;;  %943 = vmatprep.subr.bf16.mxu0 %v1724_v0  ;;  %v1817_v63 = vld [vmem:[%s2357_s1 + $0x3a4] ss:$8 sps:$4 sm:$0xff]   ;;  %v1812_v0 = vld [vmem:[%s2357_s1 + $0x2a0] ss:$8 sps:$4 sm:$0xff]  }
  0x3d   :  { %984 = vmatprep.subr.bf16.mxu1 %v1726_v1  ;;  %v1815_v1 = vld [vmem:[%s2357_s1 + $0x3a0] ss:$8 sps:$4 sm:$0xff]  }
  0x3f   :  { %944 = vmatpush2.bf16.msra.mxu0 %v1728_v2  ;;  %v1820_v2 = vld [vmem:[%s2357_s1 + $0x294] ss:$8 sps:$4 sm:$0xff]  }
  0x40   :  { %985 = vmatpush2.bf16.msra.mxu1 %v1729_v3  ;;  %995 = vmatprep.subr.bf16.mxu0 %v1736_v4  ;;  %v1823_v3 = vld [vmem:[%s2357_s1 + $0x394] ss:$8 sps:$4 sm:$0xff]   ;;  %v1818_v4 = vld [vmem:[%s2357_s1 + $0x290] ss:$8 sps:$4 sm:$0xff]  }
  0x41   :  { %1036 = vmatprep.subr.bf16.mxu1 %v1739_v5  ;;  %v1821_v5 = vld [vmem:[%s2357_s1 + $0x390] ss:$8 sps:$4 sm:$0xff]  }
  0x42   :  { %946 = vmatmul.mubr.bf16.vlgmr.msra.gmra.mxu0 %v1469_v6  ;;  %v1826_v6 = vld [vmem:[%s2357_s1 + $0x284] ss:$8 sps:$4 sm:$0xff]  }
  0x43   :  { %987 = vmatmul.mubr.bf16.vlgmr.msra.gmra.mxu1 %v1471_v7  ;;  %996 = vmatpush1.bf16.msra.mxu0 %v1734_v8  ;;  %v1829_v7 = vld [vmem:[%s2357_s1 + $0x384] ss:$8 sps:$4 sm:$0xff]   ;;  %v1824_v8 = vld [vmem:[%s2357_s1 + $0x280] ss:$8 sps:$4 sm:$0xff]  }
  0x44   :  { %1037 = vmatpush1.bf16.msra.mxu1 %v1737_v9  ;;  %997 = vmatprep.subr.bf16.mxu0 %v1742_v10  ;;  %v1827_v9 = vld [vmem:[%s2357_s1 + $0x380] ss:$8 sps:$4 sm:$0xff]   ;;  %v1834_v10 = vld [vmem:[%s2357_s1 + $0x474] ss:$8 sps:$4 sm:$0xff]  }
  0x45   :  { %1038 = vmatprep.subr.bf16.mxu1 %v1745_v11  ;;  %1027 = vmatprep.mubr.bf16.mxu0 %v1474_v35  ;;  %v1473_v11 = vcombine.low %v2159_v32, %v2159_v32 }
  0x46   :  { %1068 = vmatprep.mubr.bf16.mxu1 %v1476_v38 }
  0x47   :  { %998 = vmatpush1.bf16.msra.mxu0 %v1740_v12  ;;  %v1475_v12 = vcombine.low %v2172_v36, %v2172_v36 }
  0x48   :  { %1039 = vmatpush1.bf16.msra.mxu1 %v1743_v13  ;;  %999 = vmatprep.subr.bf16.mxu0 %v1748_v14  ;;  %v1832_v13 = vld [vmem:[%s2357_s1 + $0x470] ss:$8 sps:$4 sm:$0xff]   ;;  %v1839_v14 = vld [vmem:[%s2357_s1 + $0x464] ss:$8 sps:$4 sm:$0xff]  }
  0x49   :  { %1040 = vmatprep.subr.bf16.mxu1 %v1751_v15  ;;  %v1837_v15 = vld [vmem:[%s2357_s1 + $0x460] ss:$8 sps:$4 sm:$0xff]  }
  0x4b   :  { %1000 = vmatpush1.bf16.msra.mxu0 %v1746_v16  ;;  %v1863_v16 = vmov 0  }
  0x4c   :  { %1041 = vmatpush1.bf16.msra.mxu1 %v1749_v17  ;;  %1001 = vmatprep.subr.bf16.mxu0 %v1754_v18  ;;  %v1842_v17 = vld [vmem:[%s2357_s1 + $0x454] ss:$8 sps:$4 sm:$0xff]   ;;  %v1840_v18 = vld [vmem:[%s2357_s1 + $0x450] ss:$8 sps:$4 sm:$0xff]  }
  0x4d   :  { %1042 = vmatprep.subr.bf16.mxu1 %v1757_v19  ;;  %v1845_v19 = vld [vmem:[%s2357_s1 + $0x444] ss:$8 sps:$4 sm:$0xff]  }
  0x4f   :  { %1002 = vmatpush1.bf16.msra.mxu0 %v1752_v20  ;;  %v1843_v20 = vld [vmem:[%s2357_s1 + $0x440] ss:$8 sps:$4 sm:$0xff]  }
  0x50   :  { %1043 = vmatpush1.bf16.msra.mxu1 %v1755_v21  ;;  %1003 = vmatprep.subr.bf16.mxu0 %v1760_v22  ;;  %v1848_v21 = vld [vmem:[%s2357_s1 + $0x434] ss:$8 sps:$4 sm:$0xff]   ;;  %v1846_v22 = vld [vmem:[%s2357_s1 + $0x430] ss:$8 sps:$4 sm:$0xff]  }
  0x51   :  { %1044 = vmatprep.subr.bf16.mxu1 %v1763_v23  ;;  %v1851_v23 = vld [vmem:[%s2357_s1 + $0x424] ss:$8 sps:$4 sm:$0xff]  }
  0x53   :  { %1004 = vmatpush1.bf16.msra.mxu0 %v1758_v24  ;;  %v1849_v24 = vld [vmem:[%s2357_s1 + $0x420] ss:$8 sps:$4 sm:$0xff]  }
  0x54   :  { %1045 = vmatpush1.bf16.msra.mxu1 %v1761_v25  ;;  %1005 = vmatprep.subr.bf16.mxu0 %v1766_v26  ;;  %v1854_v25 = vld [vmem:[%s2357_s1 + $0x414] ss:$8 sps:$4 sm:$0xff]   ;;  %v1852_v26 = vld [vmem:[%s2357_s1 + $0x410] ss:$8 sps:$4 sm:$0xff]  }
  0x55   :  { %1046 = vmatprep.subr.bf16.mxu1 %v1769_v27  ;;  %v1857_v27 = vld [vmem:[%s2357_s1 + $0x404] ss:$8 sps:$4 sm:$0xff]  }
  0x57   :  { %1006 = vmatpush1.bf16.msra.mxu0 %v1764_v28  ;;  %v1855_v28 = vld [vmem:[%s2357_s1 + $0x400] ss:$8 sps:$4 sm:$0xff]  }
  0x58   :  { %1047 = vmatpush1.bf16.msra.mxu1 %v1767_v29  ;;  %1007 = vmatprep.subr.bf16.mxu0 %v1772_v30  ;;  %v1858_v29 = vld [vmem:[%s2358_s0 + $0x20] ss:$0 sps:$4 sm:$0xff]   ;;  %v1864_v30 = vmov 0.0  }
  0x59   :  { %1048 = vmatprep.subr.bf16.mxu1 %v1775_v31 }
  0x5b   :  { %1008 = vmatpush1.bf16.msra.mxu0 %v1770_v33 }
  0x5c   :  { %1049 = vmatpush1.bf16.msra.mxu1 %v1773_v34  ;;  %1009 = vmatprep.subr.bf16.mxu0 %v1778_v37 }
  0x5d   :  { %1050 = vmatprep.subr.bf16.mxu1 %v1781_v39 }
  0x5f   :  { %1010 = vmatpush1.bf16.msra.mxu0 %v1776_v40 }
  0x60   :  { %1051 = vmatpush1.bf16.msra.mxu1 %v1779_v41  ;;  %1011 = vmatprep.subr.bf16.mxu0 %v1784_v42 }
  0x61   :  { %1052 = vmatprep.subr.bf16.mxu1 %v1787_v43 }
  0x63   :  { %1012 = vmatpush2.bf16.msra.mxu0 %v1782_v44 }
  0x64   :  { %1053 = vmatpush2.bf16.msra.mxu1 %v1785_v45  ;;  %1013 = vmatprep.subr.bf16.mxu0 %v1790_v46 }
  0x65   :  { %1054 = vmatprep.subr.bf16.mxu1 %v1793_v47 }
  0x67   :  { %1014 = vmatpush2.bf16.msra.mxu0 %v1788_v48 }
  0x68   :  { %1055 = vmatpush2.bf16.msra.mxu1 %v1791_v49  ;;  %1015 = vmatprep.subr.bf16.mxu0 %v1796_v50  ;;  %v1118_v49 = vlaneseq }
  0x69   :  { %1056 = vmatprep.subr.bf16.mxu1 %v1799_v51 }
  0x6a   :  { %v1121_v50 = vshrl.u32 %v1118_v49, 7 }
  0x6b   :  { %1016 = vmatpush2.bf16.msra.mxu0 %v1794_v52  ;;  %v1119_v52 = vand.u32 127, %v1118_v49 }
  0x6c   :  { %1057 = vmatpush2.bf16.msra.mxu1 %v1797_v53  ;;  %1017 = vmatprep.subr.bf16.mxu0 %v1802_v54  ;;  %v1122_v51 = vmul.u32 4, %v1121_v50 }
  0x6d   :  { %1058 = vmatprep.subr.bf16.mxu1 %v1805_v55 }
  0x6e   :  { %v1124_v53 = vadd.s32 4, %v1122_v51  ;;  %vm1123_vm0 = vcmp.ge.s32.totalorder %v1119_v52, %v1122_v51 }
  0x6f   :  { %1018 = vmatpush2.bf16.msra.mxu0 %v1800_v56 }
  0x70   :  { %1059 = vmatpush2.bf16.msra.mxu1 %v1803_v57  ;;  %1019 = vmatprep.subr.bf16.mxu0 %v1808_v58  ;;  %vm1125_vm1 = vcmp.lt.s32.totalorder %v1119_v52, %v1124_v53 }
  0x71   :  { %1060 = vmatprep.subr.bf16.mxu1 %v1811_v59  ;;  %vm1126_vm2 = vmand %vm1123_vm0, %vm1125_vm1 }
  0x73   :  { %1020 = vmatpush2.bf16.msra.mxu0 %v1806_v60 }
  0x74   :  { %1061 = vmatpush2.bf16.msra.mxu1 %v1809_v61  ;;  %1021 = vmatprep.subr.bf16.mxu0 %v1814_v62 }
  0x75   :  { %1062 = vmatprep.subr.bf16.mxu1 %v1817_v63  ;;  %v1622_v63 = vsel %vm1126_vm2, 1.0, %v1864_v30 }
  0x77   :  { %1022 = vmatpush2.bf16.msra.mxu0 %v1812_v0 }
  0x78   :  { %1063 = vmatpush2.bf16.msra.mxu1 %v1815_v1  ;;  %1023 = vmatprep.subr.bf16.mxu0 %v1820_v2 }
  0x79   :  { %1064 = vmatprep.subr.bf16.mxu1 %v1823_v3  ;;  %v1129_v3 = vmul.u32 4, %v1119_v52 }
  0x7b   :  { %1024 = vmatpush2.bf16.msra.mxu0 %v1818_v4  ;;  %v1131_v4 = vadd.s32 4, %v1129_v3  ;;  %vm1130_vm4 = vcmp.ge.s32.totalorder %v1121_v50, %v1129_v3 }
  0x7c   :  { %1065 = vmatpush2.bf16.msra.mxu1 %v1821_v5  ;;  %1025 = vmatprep.subr.bf16.mxu0 %v1826_v6 }
  0x7d   :  { %1066 = vmatprep.subr.bf16.mxu1 %v1829_v7  ;;  %vm1132_vm5 = vcmp.lt.s32.totalorder %v1121_v50, %v1131_v4 }
  0x7e   :  { %vm1133_vm6 = vmand %vm1130_vm4, %vm1132_vm5 }
  0x7f   :  { %1026 = vmatpush2.bf16.msra.mxu0 %v1824_v8 }
  0x80   :  { %1067 = vmatpush2.bf16.msra.mxu1 %v1827_v9  ;;  %1077 = vmatprep.subr.bf16.mxu0 %v1834_v10  ;;  %v1623_v10 = vsel %vm1133_vm6, 1.0, %v1864_v30 }
  0x82   :  { %1028 = vmatmul.mubr.bf16.vlgmr.msra.gmra.mxu0 %v1473_v11 }
  0x83   :  { %1069 = vmatmul.mubr.bf16.vlgmr.msra.gmra.mxu1 %v1475_v12  ;;  %1078 = vmatpush1.bf16.msra.mxu0 %v1832_v13 }
  0x84   :  { %1109 = vmatprep.mubr.bf16.mxu0 %v1863_v16  ;;  %1079 = vmatprep.subr.bf16.mxu0 %v1839_v14 }
  0x85   :  { %1204 = vmatprep.mubr.f32.mxu1 %v1864_v30 }
  0x87   :  { %1080 = vmatpush1.bf16.msra.mxu0 %v1837_v15 }
  0x88   :  { %1081 = vmatprep.subr.bf16.mxu0 %v1842_v17 }
  0x8b   :  { %1082 = vmatpush1.bf16.msra.mxu0 %v1840_v18 }
  0x8c   :  { %1083 = vmatprep.subr.bf16.mxu0 %v1845_v19 }
  0x8f   :  { %1084 = vmatpush1.bf16.msra.mxu0 %v1843_v20 }
  0x90   :  { %1085 = vmatprep.subr.bf16.mxu0 %v1848_v21 }
  0x93   :  { %1086 = vmatpush1.bf16.msra.mxu0 %v1846_v22 }
  0x94   :  { %1087 = vmatprep.subr.bf16.mxu0 %v1851_v23 }
  0x97   :  { %1088 = vmatpush1.bf16.msra.mxu0 %v1849_v24 }
  0x98   :  { %1089 = vmatprep.subr.bf16.mxu0 %v1854_v25 }
  0x9b   :  { %1090 = vmatpush1.bf16.msra.mxu0 %v1852_v26 }
  0x9c   :  { %1091 = vmatprep.subr.bf16.mxu0 %v1857_v27 }
  0x9f   :  { %1092 = vmatpush1.bf16.msra.mxu0 %v1855_v28 }
  0xa2   :  { %1110 = vmatmul.mubr.bf16.vlgmr.msra.gmra.mxu0 %v1858_v29 }
 0x102   :  { %v947_v31 = vpop.f32.mrf.mxu0 }
 0x103   :  { %v988_v32 = vpop.f32.mrf.mxu1 }
 0x104   :  { %v989_v33 = vadd.f32 %v988_v32, %v947_v31  ;;  %v949_v34 = vpop.f32.mrf.mxu0 }
 0x105   :  { %v990_v35 = vpop.f32.mrf.mxu1 }
 0x106   :  { %v991_v36 = vadd.f32 %v990_v35, %v949_v34  ;;  %v951_v37 = vpop.f32.mrf.mxu0 }
 0x107   :  { %v992_v38 = vpop.f32.mrf.mxu1 }
 0x108   :  { %v952_v39 = vpop.f32.mrf.mxu0 }
 0x109   :  { %v993_v40 = vpop.f32.mrf.mxu1 }
 0x142   :  { %v1029_v41 = vpop.f32.mrf.mxu0 }
 0x143   :  { %v1070_v42 = vpop.f32.mrf.mxu1  ;;  %v1030_v54 = vadd.f32 %v1029_v41, %v989_v33 }
 0x144   :  { %v1031_v43 = vpop.f32.mrf.mxu0 }
 0x145   :  { %v1072_v44 = vpop.f32.mrf.mxu1  ;;  %v1032_v55 = vadd.f32 %v1031_v43, %v991_v36  ;;  %v1071_v56 = vadd.f32 %v1070_v42, %v1030_v54 }
 0x146   :  { %v1033_v45 = vpop.f32.mrf.mxu0 }
 0x147   :  { %v1074_v46 = vpop.f32.mrf.mxu1  ;;  %v1073_v58 = vadd.f32 %v1072_v44, %v1032_v55 }
 0x148   :  { %v1034_v47 = vpop.f32.mrf.mxu0 }
 0x149   :  { %v1075_v48 = vpop.f32.mrf.mxu1 }
 0x162   :  { %v1111_v57 = vpop.f32.mrf.mxu0 }
 0x163   :  { %v1112_v59 = vadd.f32 %v1111_v57, %v1071_v56 }
 0x164   :  { %v1113_v60 = vpop.f32.mrf.mxu0 }
 0x165   :  { %v1114_v61 = vadd.f32 %v1113_v60, %v1073_v58  ;;  %v1211_v1 = vmul.f32 %v1112_v59, %v1112_v59 }
 0x166   :  { %v1115_v62 = vpop.f32.mrf.mxu0 }
 0x167   :  { %1170 = vmatprep.subr.mxu1 %v1114_v61  ;;  %v1212_v0 = vmul.f32 %v1114_v61, %v1114_v61 }
 0x168   :  { %v1116_v2 = vpop.f32.mrf.mxu0  ;;  %1171 = vmatpush1.msra.mxu1 %v1112_v59 }
 0x169   :  { %1624 = vmatmul.mubr.msk.f32.vlgmr.msra.gmra.mxu1 %vm1136_vm3, %v1622_v63  ;;  %1243 = vmatprep.subr.mxu1 %v1212_v0 }
 0x16a   :  { %1244 = vmatpush1.msra.mxu1 %v1211_v1  ;;  %1277 = vmatprep.mubr.f32.mxu1 %v1864_v30 }
 0x16d   :  { %1625 = vmatmul.mubr.msk.f32.vlgmr.msra.gmra.mxu1 %vm1136_vm3, %v1622_v63 }
 0x16e   :  { %1373 = vmatprep.mubr.f32.mxu1 %v1864_v30 }
 0x229   :  { %v1206_v5 = vpop.f32.mrf.mxu1 }
 0x22a   :  { %v1284_v6 = vmul.f32 0.25, %v1206_v5 }
 0x22b   :  { %v1208_v7 = vpop.f32.mrf.mxu1 }
 0x22c   :  { %v1285_v8 = vmul.f32 0.25, %v1208_v7  ;;  %v1288_v11 = vmul.f32 %v1284_v6, %v1284_v6 }
 0x22d   :  { %v1279_v9 = vpop.f32.mrf.mxu1 }
 0x22e   :  { %v1286_v12 = vmul.f32 0.25, %v1279_v9  ;;  %1626 = vmatprep.subr.msk.mxu1 %vm1302_vm7, %v1285_v8  ;;  %v1289_v14 = vmul.f32 %v1285_v8, %v1285_v8 }
 0x22f   :  { %v1281_v13 = vpop.f32.mrf.mxu1  ;;  %1627 = vmatpush1.msk.msra.mxu1 %vm1302_vm7, %v1284_v6 }
 0x230   :  { %v1290_v15 = vsub.f32 %v1286_v12, %v1288_v11  ;;  %v1287_v16 = vmul.f32 0.25, %v1281_v13  ;;  %1628 = vmatmul.mubr.msk.f32.vlgmr.msra.gmra.mxu1 %vm1298_vm8, %v1623_v10 }
 0x231   :  { %1450 = vmatprep.mubr.f32.mxu1 %v1864_v30 }
 0x232   :  { %v1292_v17 = vmax.f32 %v1290_v15, 0.0  ;;  %v1291_v18 = vsub.f32 %v1287_v16, %v1289_v14 }
 0x234   :  { %v1293_v19 = vmax.f32 %v1291_v18, 0.0  ;;  %v1294_v20 = vadd.f32 1e-05, %v1292_v17 }
 0x236   :  { %v1295_v21 = vadd.f32 1e-05, %v1293_v19 }
 0x238   :  { %1859 = vrsqrt.f32 %v1295_v21 }
 0x239   :  { %1861 = vrsqrt.f32 %v1294_v20 }
 0x245   :  { %v1860_v22 = vpop.eup %1859 }
 0x246   :  { %v1862_v23 = vpop.eup %1861  ;;  %1629 = vmatprep.subr.msk.mxu1 %vm1302_vm7, %v1860_v22 }
 0x247   :  { %1630 = vmatpush1.msk.msra.mxu1 %vm1302_vm7, %v1862_v23 }
 0x248   :  { %1631 = vmatmul.mubr.msk.f32.vlgmr.msra.gmra.mxu1 %vm1298_vm8, %v1623_v10 }
 0x2f0   :  { %v1375_v24 = vpop.f32.mrf.mxu1 }
 0x2f1   :  { %v1457_v26 = vsub.f32 %v1112_v59, %v1375_v24 }
 0x2f2   :  { %v1377_v25 = vpop.f32.mrf.mxu1 }
 0x2f3   :  { %v1458_v28 = vsub.f32 %v1114_v61, %v1377_v25 }
 0x308   :  { %v1452_v27 = vpop.f32.mrf.mxu1 }
 0x309   :  { %v1459_v29 = vmul.f32 %v1457_v26, %v1452_v27 }
 0x30a   :  { %v1454_v30 = vpop.f32.mrf.mxu1 }
 0x30b   :  { %v1461_v31 = vmax.f32 %v1459_v29, 0.0  ;;  %v1460_v32 = vmul.f32 %v1458_v28, %v1454_v30 }
 0x30d   :  { %1463 = vst [vmem:[%s2359_s2] sm:$0xff] %v1461_v31  ;;  %v1462_v33 = vmax.f32 %v1460_v32, 0.0 }
 0x30f   :  { %1464 = vst [vmem:[%s2359_s2 + $0x8] sm:$0xff] %v1462_v33 }

// kernel: content_encoder_forward.9
= control target key start
LH: loop header
LB: loop body
LE: loop exit
PB: predicated region body
PF: predicated region fallthrough
CT: control target
= control target key end

     0   :  { %vm2198_vm3 = vcmask 64512   ;;  %vm2364_vm7 = vcmask 1041408   ;;  %vm2360_vm8 = vcmask 15360   ;;  %s4269_s1 = inlined_call_operand.vmem [shape: bf16[2304,256], index: 1, kind: input, shape index: {}]   ;;  %s4270_s0 = inlined_call_operand.vmem [shape: bf16[8,2304], index: 0, kind: input, shape index: {}]   ;;  %s4271_s2 = inlined_call_operand.vmem [shape: f32[8,256], index: 2, kind: output, shape index: {}]  }
   0x1   :  { %v2848_v0 = vld [vmem:[%s4269_s1 + $0x74] ss:$8 sps:$4 sm:$0xff]   ;;  %v2852_v2 = vld [vmem:[%s4269_s1 + $0x70] ss:$8 sps:$4 sm:$0xff]   ;;  %v2854_v4 = vld [vmem:[%s4269_s1 + $0x64] ss:$8 sps:$4 sm:$0xff]  }
   0x2   :  { %v2850_v1 = vld [vmem:[%s4269_s1 + $0x174] ss:$8 sps:$4 sm:$0xff]   ;;  %1811 = vmatprep.subr.bf16.mxu0 %v2848_v0  ;;  %v2853_v3 = vld [vmem:[%s4269_s1 + $0x170] ss:$8 sps:$4 sm:$0xff]   ;;  %v2856_v5 = vld [vmem:[%s4269_s1 + $0x164] ss:$8 sps:$4 sm:$0xff]  }
   0x3   :  { %1852 = vmatprep.subr.bf16.mxu1 %v2850_v1  ;;  %1812 = vmatpush1.bf16.msra.mxu0 %v2852_v2  ;;  %v2858_v6 = vld [vmem:[%s4269_s1 + $0x60] ss:$8 sps:$4 sm:$0xff]   ;;  %v2860_v8 = vld [vmem:[%s4269_s1 + $0x54] ss:$8 sps:$4 sm:$0xff]   ;;  %v2864_v10 = vld [vmem:[%s4269_s1 + $0x50] ss:$8 sps:$4 sm:$0xff]  }
   0x4   :  { %1853 = vmatpush1.bf16.msra.mxu1 %v2853_v3  ;;  %1813 = vmatprep.subr.bf16.mxu0 %v2854_v4  ;;  %v2859_v7 = vld [vmem:[%s4269_s1 + $0x160] ss:$8 sps:$4 sm:$0xff]   ;;  %v2862_v9 = vld [vmem:[%s4269_s1 + $0x154] ss:$8 sps:$4 sm:$0xff]   ;;  %v2865_v11 = vld [vmem:[%s4269_s1 + $0x150] ss:$8 sps:$4 sm:$0xff]  }
   0x5   :  { %1854 = vmatprep.subr.bf16.mxu1 %v2856_v5  ;;  %v2866_v12 = vld [vmem:[%s4269_s1 + $0x44] ss:$8 sps:$4 sm:$0xff]   ;;  %v2870_v14 = vld [vmem:[%s4269_s1 + $0x40] ss:$8 sps:$4 sm:$0xff]   ;;  %v2872_v16 = vld [vmem:[%s4269_s1 + $0x34] ss:$8 sps:$4 sm:$0xff]  }
   0x6   :  { %v2868_v13 = vld [vmem:[%s4269_s1 + $0x144] ss:$8 sps:$4 sm:$0xff]   ;;  %v2871_v15 = vld [vmem:[%s4269_s1 + $0x140] ss:$8 sps:$4 sm:$0xff]   ;;  %v2874_v17 = vld [vmem:[%s4269_s1 + $0x134] ss:$8 sps:$4 sm:$0xff]  }
   0x7   :  { %1814 = vmatpush1.bf16.msra.mxu0 %v2858_v6  ;;  %v2876_v18 = vld [vmem:[%s4269_s1 + $0x30] ss:$8 sps:$4 sm:$0xff]   ;;  %v2878_v20 = vld [vmem:[%s4269_s1 + $0x24] ss:$8 sps:$4 sm:$0xff]   ;;  %v2882_v22 = vld [vmem:[%s4269_s1 + $0x20] ss:$8 sps:$4 sm:$0xff]  }
   0x8   :  { %1855 = vmatpush1.bf16.msra.mxu1 %v2859_v7  ;;  %1815 = vmatprep.subr.bf16.mxu0 %v2860_v8  ;;  %v2877_v19 = vld [vmem:[%s4269_s1 + $0x130] ss:$8 sps:$4 sm:$0xff]   ;;  %v2880_v21 = vld [vmem:[%s4269_s1 + $0x124] ss:$8 sps:$4 sm:$0xff]   ;;  %v2883_v23 = vld [vmem:[%s4269_s1 + $0x120] ss:$8 sps:$4 sm:$0xff]  }
   0x9   :  { %1856 = vmatprep.subr.bf16.mxu1 %v2862_v9  ;;  %v2884_v24 = vld [vmem:[%s4269_s1 + $0x14] ss:$8 sps:$4 sm:$0xff]   ;;  %v2888_v26 = vld [vmem:[%s4269_s1 + $0x10] ss:$8 sps:$4 sm:$0xff]   ;;  %v2890_v28 = vld [vmem:[%s4269_s1 + $0x4] ss:$8 sps:$4 sm:$0xff]  }
   0xa   :  { %v2886_v25 = vld [vmem:[%s4269_s1 + $0x114] ss:$8 sps:$4 sm:$0xff]   ;;  %v2889_v27 = vld [vmem:[%s4269_s1 + $0x110] ss:$8 sps:$4 sm:$0xff]   ;;  %v2892_v29 = vld [vmem:[%s4269_s1 + $0x104] ss:$8 sps:$4 sm:$0xff]  }
   0xb   :  { %1816 = vmatpush1.bf16.msra.mxu0 %v2864_v10  ;;  %v2894_v30 = vld [vmem:[%s4269_s1] ss:$8 sps:$4 sm:$0xff]   ;;  %v2896_v32 = vld [vmem:[%s4269_s1 + $0xf4] ss:$8 sps:$4 sm:$0xff]   ;;  %v2900_v34 = vld [vmem:[%s4269_s1 + $0xf0] ss:$8 sps:$4 sm:$0xff]  }
   0xc   :  { %1857 = vmatpush1.bf16.msra.mxu1 %v2865_v11  ;;  %1817 = vmatprep.subr.bf16.mxu0 %v2866_v12  ;;  %v2895_v31 = vld [vmem:[%s4269_s1 + $0x100] ss:$8 sps:$4 sm:$0xff]   ;;  %v2898_v33 = vld [vmem:[%s4269_s1 + $0x1f4] ss:$8 sps:$4 sm:$0xff]   ;;  %v2901_v35 = vld [vmem:[%s4269_s1 + $0x1f0] ss:$8 sps:$4 sm:$0xff]  }
   0xd   :  { %1858 = vmatprep.subr.bf16.mxu1 %v2868_v13  ;;  %v2902_v36 = vld [vmem:[%s4269_s1 + $0xe4] ss:$8 sps:$4 sm:$0xff]   ;;  %v2906_v38 = vld [vmem:[%s4269_s1 + $0xe0] ss:$8 sps:$4 sm:$0xff]   ;;  %v2908_v40 = vld [vmem:[%s4269_s1 + $0xd4] ss:$8 sps:$4 sm:$0xff]  }
   0xe   :  { %v2904_v37 = vld [vmem:[%s4269_s1 + $0x1e4] ss:$8 sps:$4 sm:$0xff]   ;;  %v2907_v39 = vld [vmem:[%s4269_s1 + $0x1e0] ss:$8 sps:$4 sm:$0xff]   ;;  %v2910_v41 = vld [vmem:[%s4269_s1 + $0x1d4] ss:$8 sps:$4 sm:$0xff]  }
   0xf   :  { %1818 = vmatpush1.bf16.msra.mxu0 %v2870_v14  ;;  %v2912_v42 = vld [vmem:[%s4269_s1 + $0xd0] ss:$8 sps:$4 sm:$0xff]   ;;  %v2914_v44 = vld [vmem:[%s4269_s1 + $0xc4] ss:$8 sps:$4 sm:$0xff]   ;;  %v2918_v49 = vld [vmem:[%s4269_s1 + $0xc0] ss:$8 sps:$4 sm:$0xff]  }
  0x10   :  { %1859 = vmatpush1.bf16.msra.mxu1 %v2871_v15  ;;  %1819 = vmatprep.subr.bf16.mxu0 %v2872_v16  ;;  %v2913_v43 = vld [vmem:[%s4269_s1 + $0x1d0] ss:$8 sps:$4 sm:$0xff]   ;;  %v2916_v45 = vld [vmem:[%s4269_s1 + $0x1c4] ss:$8 sps:$4 sm:$0xff]   ;;  %v2919_v50 = vld [vmem:[%s4269_s1 + $0x1c0] ss:$8 sps:$4 sm:$0xff]  }
  0x11   :  { %1860 = vmatprep.subr.bf16.mxu1 %v2874_v17  ;;  %v11_v46 = vld [vmem:[%s4270_s0] sm:$0xff]  ;;  %v12_v48 = vld [vmem:[%s4270_s0 + $0x8] sm:$0xff]  ;;  %v2920_v52 = vld [vmem:[%s4269_s1 + $0xb4] ss:$8 sps:$4 sm:$0xff]  }
  0x12   :  { %v2532_v47 = vcombine.high %v11_v46, %v11_v46  ;;  %v2534_v51 = vcombine.high %v12_v48, %v12_v48  ;;  %v2922_v53 = vld [vmem:[%s4269_s1 + $0x1b4] ss:$8 sps:$4 sm:$0xff]   ;;  %v2924_v54 = vld [vmem:[%s4269_s1 + $0xb0] ss:$8 sps:$4 sm:$0xff]   ;;  %v2926_v56 = vld [vmem:[%s4269_s1 + $0xa4] ss:$8 sps:$4 sm:$0xff]   ;;  %v2531_v6 = vcombine.low %v11_v46, %v11_v46  ;;  %v2533_v7 = vcombine.low %v12_v48, %v12_v48 }
  0x13   :  { %1820 = vmatpush1.bf16.msra.mxu0 %v2876_v18  ;;  %v2925_v55 = vld [vmem:[%s4269_s1 + $0x1b0] ss:$8 sps:$4 sm:$0xff]   ;;  %v2928_v57 = vld [vmem:[%s4269_s1 + $0x1a4] ss:$8 sps:$4 sm:$0xff]   ;;  %v2930_v58 = vld [vmem:[%s4269_s1 + $0xa0] ss:$8 sps:$4 sm:$0xff]  }
  0x14   :  { %1861 = vmatpush1.bf16.msra.mxu1 %v2877_v19  ;;  %1821 = vmatprep.subr.bf16.mxu0 %v2878_v20  ;;  %v2931_v59 = vld [vmem:[%s4269_s1 + $0x1a0] ss:$8 sps:$4 sm:$0xff]   ;;  %v2932_v60 = vld [vmem:[%s4269_s1 + $0x94] ss:$8 sps:$4 sm:$0xff]   ;;  %v2936_v62 = vld [vmem:[%s4269_s1 + $0x90] ss:$8 sps:$4 sm:$0xff]  }
  0x15   :  { %1862 = vmatprep.subr.bf16.mxu1 %v2880_v21  ;;  %1843 = vmatprep.mubr.bf16.mxu0 %v2532_v47  ;;  %v2934_v61 = vld [vmem:[%s4269_s1 + $0x194] ss:$8 sps:$4 sm:$0xff]   ;;  %v2937_v63 = vld [vmem:[%s4269_s1 + $0x190] ss:$8 sps:$4 sm:$0xff]   ;;  %v2938_v0 = vld [vmem:[%s4269_s1 + $0x84] ss:$8 sps:$4 sm:$0xff]  }
  0x16   :  { %1884 = vmatprep.mubr.bf16.mxu1 %v2534_v51  ;;  %v2940_v1 = vld [vmem:[%s4269_s1 + $0x184] ss:$8 sps:$4 sm:$0xff]   ;;  %v2942_v2 = vld [vmem:[%s4269_s1 + $0x80] ss:$8 sps:$4 sm:$0xff]   ;;  %v2950_v4 = vld [vmem:[%s4269_s1 + $0x274] ss:$8 sps:$4 sm:$0xff]  }
  0x17   :  { %1822 = vmatpush1.bf16.msra.mxu0 %v2882_v22  ;;  %v2943_v3 = vld [vmem:[%s4269_s1 + $0x180] ss:$8 sps:$4 sm:$0xff]   ;;  %v2953_v5 = vld [vmem:[%s4269_s1 + $0x374] ss:$8 sps:$4 sm:$0xff]   ;;  %v2948_v8 = vld [vmem:[%s4269_s1 + $0x270] ss:$8 sps:$4 sm:$0xff]  }
  0x18   :  { %1863 = vmatpush1.bf16.msra.mxu1 %v2883_v23  ;;  %1823 = vmatprep.subr.bf16.mxu0 %v2884_v24  ;;  %v2951_v9 = vld [vmem:[%s4269_s1 + $0x370] ss:$8 sps:$4 sm:$0xff]   ;;  %v2956_v10 = vld [vmem:[%s4269_s1 + $0x264] ss:$8 sps:$4 sm:$0xff]   ;;  %v2954_v12 = vld [vmem:[%s4269_s1 + $0x260] ss:$8 sps:$4 sm:$0xff]  }
  0x19   :  { %1864 = vmatprep.subr.bf16.mxu1 %v2886_v25  ;;  %v2959_v11 = vld [vmem:[%s4269_s1 + $0x364] ss:$8 sps:$4 sm:$0xff]   ;;  %v2957_v13 = vld [vmem:[%s4269_s1 + $0x360] ss:$8 sps:$4 sm:$0xff]   ;;  %v2962_v14 = vld [vmem:[%s4269_s1 + $0x254] ss:$8 sps:$4 sm:$0xff]  }
  0x1a   :  { %v2965_v15 = vld [vmem:[%s4269_s1 + $0x354] ss:$8 sps:$4 sm:$0xff]   ;;  %v2960_v16 = vld [vmem:[%s4269_s1 + $0x250] ss:$8 sps:$4 sm:$0xff]   ;;  %v2968_v18 = vld [vmem:[%s4269_s1 + $0x244] ss:$8 sps:$4 sm:$0xff]  }
  0x1b   :  { %1824 = vmatpush1.bf16.msra.mxu0 %v2888_v26  ;;  %v2963_v17 = vld [vmem:[%s4269_s1 + $0x350] ss:$8 sps:$4 sm:$0xff]   ;;  %v2971_v19 = vld [vmem:[%s4269_s1 + $0x344] ss:$8 sps:$4 sm:$0xff]   ;;  %v2966_v20 = vld [vmem:[%s4269_s1 + $0x240] ss:$8 sps:$4 sm:$0xff]  }
  0x1c   :  { %1865 = vmatpush1.bf16.msra.mxu1 %v2889_v27  ;;  %1825 = vmatprep.subr.bf16.mxu0 %v2890_v28  ;;  %v2969_v21 = vld [vmem:[%s4269_s1 + $0x340] ss:$8 sps:$4 sm:$0xff]   ;;  %v2974_v22 = vld [vmem:[%s4269_s1 + $0x234] ss:$8 sps:$4 sm:$0xff]   ;;  %v2972_v24 = vld [vmem:[%s4269_s1 + $0x230] ss:$8 sps:$4 sm:$0xff]  }
  0x1d   :  { %1866 = vmatprep.subr.bf16.mxu1 %v2892_v29  ;;  %v2977_v23 = vld [vmem:[%s4269_s1 + $0x334] ss:$8 sps:$4 sm:$0xff]   ;;  %v2975_v25 = vld [vmem:[%s4269_s1 + $0x330] ss:$8 sps:$4 sm:$0xff]   ;;  %v2980_v26 = vld [vmem:[%s4269_s1 + $0x224] ss:$8 sps:$4 sm:$0xff]  }
  0x1e   :  { %v2983_v27 = vld [vmem:[%s4269_s1 + $0x324] ss:$8 sps:$4 sm:$0xff]   ;;  %v2978_v28 = vld [vmem:[%s4269_s1 + $0x220] ss:$8 sps:$4 sm:$0xff]   ;;  %v3013_v51 = vld [vmem:[%s4269_s1 + $0x3d4] ss:$8 sps:$4 sm:$0xff]  }
  0x1f   :  { %1826 = vmatpush1.bf16.msra.mxu0 %v2894_v30  ;;  %v2981_v29 = vld [vmem:[%s4269_s1 + $0x320] ss:$8 sps:$4 sm:$0xff]   ;;  %v2986_v30 = vld [vmem:[%s4269_s1 + $0x214] ss:$8 sps:$4 sm:$0xff]   ;;  %v3004_v46 = vld [vmem:[%s4269_s1 + $0x2e4] ss:$8 sps:$4 sm:$0xff]  }
  0x20   :  { %1867 = vmatpush1.bf16.msra.mxu1 %v2895_v31  ;;  %1827 = vmatprep.subr.bf16.mxu0 %v2896_v32  ;;  %v2989_v31 = vld [vmem:[%s4269_s1 + $0x314] ss:$8 sps:$4 sm:$0xff]   ;;  %v3007_v47 = vld [vmem:[%s4269_s1 + $0x3e4] ss:$8 sps:$4 sm:$0xff]   ;;  %v3002_v48 = vld [vmem:[%s4269_s1 + $0x2e0] ss:$8 sps:$4 sm:$0xff]  }
  0x21   :  { %1868 = vmatprep.subr.bf16.mxu1 %v2898_v33  ;;  %v3597_v32 = vld [vmem:[%s4270_s0 + $0x10] sm:$0xff] }
  0x22   :  { %v2984_v33 = vld [vmem:[%s4269_s1 + $0x210] ss:$8 sps:$4 sm:$0xff]  }
  0x23   :  { %1828 = vmatpush2.bf16.msra.mxu0 %v2900_v34  ;;  %v2987_v34 = vld [vmem:[%s4269_s1 + $0x310] ss:$8 sps:$4 sm:$0xff]  }
  0x24   :  { %1869 = vmatpush2.bf16.msra.mxu1 %v2901_v35  ;;  %1829 = vmatprep.subr.bf16.mxu0 %v2902_v36  ;;  %v2536_v35 = vcombine.high %v3597_v32, %v3597_v32  ;;  %v3610_v36 = vld [vmem:[%s4270_s0 + $0x18] sm:$0xff] }
  0x25   :  { %1870 = vmatprep.subr.bf16.mxu1 %v2904_v37  ;;  %v2992_v37 = vld [vmem:[%s4269_s1 + $0x204] ss:$8 sps:$4 sm:$0xff]  }
  0x27   :  { %1830 = vmatpush2.bf16.msra.mxu0 %v2906_v38  ;;  %v2538_v38 = vcombine.high %v3610_v36, %v3610_v36 }
  0x28   :  { %1871 = vmatpush2.bf16.msra.mxu1 %v2907_v39  ;;  %1831 = vmatprep.subr.bf16.mxu0 %v2908_v40  ;;  %v2995_v39 = vld [vmem:[%s4269_s1 + $0x304] ss:$8 sps:$4 sm:$0xff]   ;;  %v2990_v40 = vld [vmem:[%s4269_s1 + $0x200] ss:$8 sps:$4 sm:$0xff]  }
  0x29   :  { %1872 = vmatprep.subr.bf16.mxu1 %v2910_v41  ;;  %v2993_v41 = vld [vmem:[%s4269_s1 + $0x300] ss:$8 sps:$4 sm:$0xff]  }
  0x2b   :  { %1832 = vmatpush2.bf16.msra.mxu0 %v2912_v42  ;;  %v2998_v42 = vld [vmem:[%s4269_s1 + $0x2f4] ss:$8 sps:$4 sm:$0xff]  }
  0x2c   :  { %1873 = vmatpush2.bf16.msra.mxu1 %v2913_v43  ;;  %1833 = vmatprep.subr.bf16.mxu0 %v2914_v44  ;;  %v3001_v43 = vld [vmem:[%s4269_s1 + $0x3f4] ss:$8 sps:$4 sm:$0xff]   ;;  %v2996_v44 = vld [vmem:[%s4269_s1 + $0x2f0] ss:$8 sps:$4 sm:$0xff]  }
  0x2d   :  { %1874 = vmatprep.subr.bf16.mxu1 %v2916_v45  ;;  %v2999_v45 = vld [vmem:[%s4269_s1 + $0x3f0] ss:$8 sps:$4 sm:$0xff]  }
  0x2f   :  { %1834 = vmatpush2.bf16.msra.mxu0 %v2918_v49  ;;  %v3005_v49 = vld [vmem:[%s4269_s1 + $0x3e0] ss:$8 sps:$4 sm:$0xff]  }
  0x30   :  { %1875 = vmatpush2.bf16.msra.mxu1 %v2919_v50  ;;  %1835 = vmatprep.subr.bf16.mxu0 %v2920_v52  ;;  %v3010_v50 = vld [vmem:[%s4269_s1 + $0x2d4] ss:$8 sps:$4 sm:$0xff]   ;;  %v3008_v52 = vld [vmem:[%s4269_s1 + $0x2d0] ss:$8 sps:$4 sm:$0xff]  }
  0x31   :  { %1876 = vmatprep.subr.bf16.mxu1 %v2922_v53  ;;  %v3011_v53 = vld [vmem:[%s4269_s1 + $0x3d0] ss:$8 sps:$4 sm:$0xff]  }
  0x33   :  { %1836 = vmatpush2.bf16.msra.mxu0 %v2924_v54  ;;  %v3016_v54 = vld [vmem:[%s4269_s1 + $0x2c4] ss:$8 sps:$4 sm:$0xff]  }
  0x34   :  { %1877 = vmatpush2.bf16.msra.mxu1 %v2925_v55  ;;  %1837 = vmatprep.subr.bf16.mxu0 %v2926_v56  ;;  %v3019_v55 = vld [vmem:[%s4269_s1 + $0x3c4] ss:$8 sps:$4 sm:$0xff]   ;;  %v3014_v56 = vld [vmem:[%s4269_s1 + $0x2c0] ss:$8 sps:$4 sm:$0xff]  }
  0x35   :  { %1878 = vmatprep.subr.bf16.mxu1 %v2928_v57  ;;  %v3017_v57 = vld [vmem:[%s4269_s1 + $0x3c0] ss:$8 sps:$4 sm:$0xff]  }
  0x37   :  { %1838 = vmatpush2.bf16.msra.mxu0 %v2930_v58  ;;  %v3022_v58 = vld [vmem:[%s4269_s1 + $0x2b4] ss:$8 sps:$4 sm:$0xff]  }
  0x38   :  { %1879 = vmatpush2.bf16.msra.mxu1 %v2931_v59  ;;  %1839 = vmatprep.subr.bf16.mxu0 %v2932_v60  ;;  %v3025_v59 = vld [vmem:[%s4269_s1 + $0x3b4] ss:$8 sps:$4 sm:$0xff]   ;;  %v3020_v60 = vld [vmem:[%s4269_s1 + $0x2b0] ss:$8 sps:$4 sm:$0xff]  }
  0x39   :  { %1880 = vmatprep.subr.bf16.mxu1 %v2934_v61  ;;  %v3023_v61 = vld [vmem:[%s4269_s1 + $0x3b0] ss:$8 sps:$4 sm:$0xff]  }
  0x3b   :  { %1840 = vmatpush2.bf16.msra.mxu0 %v2936_v62  ;;  %v3028_v62 = vld [vmem:[%s4269_s1 + $0x2a4] ss:$8 sps:$4 sm:$0xff]  }
  0x3c   :  { %1881 = vmatpush2.bf16.msra.mxu1 %v2937_v63  ;;  %1841 = vmatprep.subr.bf16.mxu0 %v2938_v0  ;;  %v3031_v63 = vld [vmem:[%s4269_s1 + $0x3a4] ss:$8 sps:$4 sm:$0xff]   ;;  %v3026_v0 = vld [vmem:[%s4269_s1 + $0x2a0] ss:$8 sps:$4 sm:$0xff]  }
  0x3d   :  { %1882 = vmatprep.subr.bf16.mxu1 %v2940_v1  ;;  %v3029_v1 = vld [vmem:[%s4269_s1 + $0x3a0] ss:$8 sps:$4 sm:$0xff]  }
  0x3f   :  { %1842 = vmatpush2.bf16.msra.mxu0 %v2942_v2  ;;  %v3034_v2 = vld [vmem:[%s4269_s1 + $0x294] ss:$8 sps:$4 sm:$0xff]  }
  0x40   :  { %1883 = vmatpush2.bf16.msra.mxu1 %v2943_v3  ;;  %1893 = vmatprep.subr.bf16.mxu0 %v2950_v4  ;;  %v3037_v3 = vld [vmem:[%s4269_s1 + $0x394] ss:$8 sps:$4 sm:$0xff]   ;;  %v3032_v4 = vld [vmem:[%s4269_s1 + $0x290] ss:$8 sps:$4 sm:$0xff]  }
  0x41   :  { %1934 = vmatprep.subr.bf16.mxu1 %v2953_v5  ;;  %v3035_v5 = vld [vmem:[%s4269_s1 + $0x390] ss:$8 sps:$4 sm:$0xff]  }
  0x42   :  { %1844 = vmatmul.mubr.bf16.vlgmr.msra.gmra.mxu0 %v2531_v6  ;;  %v3040_v6 = vld [vmem:[%s4269_s1 + $0x284] ss:$8 sps:$4 sm:$0xff]  }
  0x43   :  { %1885 = vmatmul.mubr.bf16.vlgmr.msra.gmra.mxu1 %v2533_v7  ;;  %1894 = vmatpush1.bf16.msra.mxu0 %v2948_v8  ;;  %v3043_v7 = vld [vmem:[%s4269_s1 + $0x384] ss:$8 sps:$4 sm:$0xff]   ;;  %v3038_v8 = vld [vmem:[%s4269_s1 + $0x280] ss:$8 sps:$4 sm:$0xff]  }
  0x44   :  { %1935 = vmatpush1.bf16.msra.mxu1 %v2951_v9  ;;  %1895 = vmatprep.subr.bf16.mxu0 %v2956_v10  ;;  %v3041_v9 = vld [vmem:[%s4269_s1 + $0x380] ss:$8 sps:$4 sm:$0xff]   ;;  %v3048_v10 = vld [vmem:[%s4269_s1 + $0x474] ss:$8 sps:$4 sm:$0xff]  }
  0x45   :  { %1936 = vmatprep.subr.bf16.mxu1 %v2959_v11  ;;  %1925 = vmatprep.mubr.bf16.mxu0 %v2536_v35  ;;  %v3053_v11 = vld [vmem:[%s4269_s1 + $0x574] ss:$8 sps:$4 sm:$0xff]   ;;  %v3075_v35 = vld [vmem:[%s4269_s1 + $0x530] ss:$8 sps:$4 sm:$0xff]  }
  0x46   :  { %1966 = vmatprep.mubr.bf16.mxu1 %v2538_v38  ;;  %v3078_v38 = vld [vmem:[%s4269_s1 + $0x420] ss:$8 sps:$4 sm:$0xff]  }
  0x47   :  { %1896 = vmatpush1.bf16.msra.mxu0 %v2954_v12  ;;  %v2535_v12 = vcombine.low %v3597_v32, %v3597_v32  ;;  %v3074_v32 = vld [vmem:[%s4269_s1 + $0x434] ss:$8 sps:$4 sm:$0xff]  }
  0x48   :  { %1937 = vmatpush1.bf16.msra.mxu1 %v2957_v13  ;;  %1897 = vmatprep.subr.bf16.mxu0 %v2962_v14  ;;  %v3046_v13 = vld [vmem:[%s4269_s1 + $0x470] ss:$8 sps:$4 sm:$0xff]   ;;  %v2537_v14 = vcombine.low %v3610_v36, %v3610_v36  ;;  %v3080_v36 = vld [vmem:[%s4269_s1 + $0x424] ss:$8 sps:$4 sm:$0xff]  }
  0x49   :  { %1938 = vmatprep.subr.bf16.mxu1 %v2965_v15  ;;  %v3051_v15 = vld [vmem:[%s4269_s1 + $0x570] ss:$8 sps:$4 sm:$0xff]  }
  0x4b   :  { %1898 = vmatpush1.bf16.msra.mxu0 %v2960_v16  ;;  %v3056_v16 = vld [vmem:[%s4269_s1 + $0x464] ss:$8 sps:$4 sm:$0xff]  }
  0x4c   :  { %1939 = vmatpush1.bf16.msra.mxu1 %v2963_v17  ;;  %1899 = vmatprep.subr.bf16.mxu0 %v2968_v18  ;;  %v3059_v17 = vld [vmem:[%s4269_s1 + $0x564] ss:$8 sps:$4 sm:$0xff]  }
  0x4d   :  { %1940 = vmatprep.subr.bf16.mxu1 %v2971_v19  ;;  %v3747_v18 = vld [vmem:[%s4270_s0 + $0x20] sm:$0xff] }
  0x4e   :  { %v2540_v19 = vcombine.high %v3747_v18, %v3747_v18 }
  0x4f   :  { %1900 = vmatpush1.bf16.msra.mxu0 %v2966_v20  ;;  %v3754_v20 = vld [vmem:[%s4270_s0 + $0x28] sm:$0xff] }
  0x50   :  { %1941 = vmatpush1.bf16.msra.mxu1 %v2969_v21  ;;  %1901 = vmatprep.subr.bf16.mxu0 %v2974_v22  ;;  %v3054_v21 = vld [vmem:[%s4269_s1 + $0x460] ss:$8 sps:$4 sm:$0xff]  }
  0x51   :  { %1942 = vmatprep.subr.bf16.mxu1 %v2977_v23  ;;  %v3057_v22 = vld [vmem:[%s4269_s1 + $0x560] ss:$8 sps:$4 sm:$0xff]   ;;  %v2542_v23 = vcombine.high %v3754_v20, %v3754_v20 }
  0x53   :  { %1902 = vmatpush1.bf16.msra.mxu0 %v2972_v24  ;;  %v3062_v24 = vld [vmem:[%s4269_s1 + $0x454] ss:$8 sps:$4 sm:$0xff]  }
  0x54   :  { %1943 = vmatpush1.bf16.msra.mxu1 %v2975_v25  ;;  %1903 = vmatprep.subr.bf16.mxu0 %v2980_v26  ;;  %v3065_v25 = vld [vmem:[%s4269_s1 + $0x554] ss:$8 sps:$4 sm:$0xff]   ;;  %v3060_v26 = vld [vmem:[%s4269_s1 + $0x450] ss:$8 sps:$4 sm:$0xff]  }
  0x55   :  { %1944 = vmatprep.subr.bf16.mxu1 %v2983_v27  ;;  %v3063_v27 = vld [vmem:[%s4269_s1 + $0x550] ss:$8 sps:$4 sm:$0xff]  }
  0x57   :  { %1904 = vmatpush1.bf16.msra.mxu0 %v2978_v28  ;;  %v3068_v28 = vld [vmem:[%s4269_s1 + $0x444] ss:$8 sps:$4 sm:$0xff]  }
  0x58   :  { %1945 = vmatpush1.bf16.msra.mxu1 %v2981_v29  ;;  %1905 = vmatprep.subr.bf16.mxu0 %v2986_v30  ;;  %v3071_v29 = vld [vmem:[%s4269_s1 + $0x544] ss:$8 sps:$4 sm:$0xff]   ;;  %v3066_v30 = vld [vmem:[%s4269_s1 + $0x440] ss:$8 sps:$4 sm:$0xff]  }
  0x59   :  { %1946 = vmatprep.subr.bf16.mxu1 %v2989_v31  ;;  %v3069_v31 = vld [vmem:[%s4269_s1 + $0x540] ss:$8 sps:$4 sm:$0xff]  }
  0x5b   :  { %1906 = vmatpush1.bf16.msra.mxu0 %v2984_v33  ;;  %v3077_v33 = vld [vmem:[%s4269_s1 + $0x534] ss:$8 sps:$4 sm:$0xff]  }
  0x5c   :  { %1947 = vmatpush1.bf16.msra.mxu1 %v2987_v34  ;;  %1907 = vmatprep.subr.bf16.mxu0 %v2992_v37  ;;  %v3072_v34 = vld [vmem:[%s4269_s1 + $0x430] ss:$8 sps:$4 sm:$0xff]   ;;  %v3083_v37 = vld [vmem:[%s4269_s1 + $0x524] ss:$8 sps:$4 sm:$0xff]  }
  0x5d   :  { %1948 = vmatprep.subr.bf16.mxu1 %v2995_v39  ;;  %v3081_v39 = vld [vmem:[%s4269_s1 + $0x520] ss:$8 sps:$4 sm:$0xff]  }
  0x5f   :  { %1908 = vmatpush1.bf16.msra.mxu0 %v2990_v40  ;;  %v3086_v40 = vld [vmem:[%s4269_s1 + $0x414] ss:$8 sps:$4 sm:$0xff]  }
  0x60   :  { %1949 = vmatpush1.bf16.msra.mxu1 %v2993_v41  ;;  %1909 = vmatprep.subr.bf16.mxu0 %v2998_v42  ;;  %v3089_v41 = vld [vmem:[%s4269_s1 + $0x514] ss:$8 sps:$4 sm:$0xff]   ;;  %v3084_v42 = vld [vmem:[%s4269_s1 + $0x410] ss:$8 sps:$4 sm:$0xff]  }
  0x61   :  { %1950 = vmatprep.subr.bf16.mxu1 %v3001_v43  ;;  %v3087_v43 = vld [vmem:[%s4269_s1 + $0x510] ss:$8 sps:$4 sm:$0xff]  }
  0x63   :  { %1910 = vmatpush2.bf16.msra.mxu0 %v2996_v44  ;;  %v3092_v44 = vld [vmem:[%s4269_s1 + $0x404] ss:$8 sps:$4 sm:$0xff]  }
  0x64   :  { %1951 = vmatpush2.bf16.msra.mxu1 %v2999_v45  ;;  %1911 = vmatprep.subr.bf16.mxu0 %v3004_v46  ;;  %v3095_v45 = vld [vmem:[%s4269_s1 + $0x504] ss:$8 sps:$4 sm:$0xff]   ;;  %v3090_v46 = vld [vmem:[%s4269_s1 + $0x400] ss:$8 sps:$4 sm:$0xff]  }
  0x65   :  { %1952 = vmatprep.subr.bf16.mxu1 %v3007_v47  ;;  %v3093_v47 = vld [vmem:[%s4269_s1 + $0x500] ss:$8 sps:$4 sm:$0xff]  }
  0x67   :  { %1912 = vmatpush2.bf16.msra.mxu0 %v3002_v48  ;;  %v3098_v48 = vld [vmem:[%s4269_s1 + $0x4f4] ss:$8 sps:$4 sm:$0xff]  }
  0x68   :  { %1953 = vmatpush2.bf16.msra.mxu1 %v3005_v49  ;;  %1913 = vmatprep.subr.bf16.mxu0 %v3010_v50  ;;  %v3101_v49 = vld [vmem:[%s4269_s1 + $0x5f4] ss:$8 sps:$4 sm:$0xff]   ;;  %v3096_v50 = vld [vmem:[%s4269_s1 + $0x4f0] ss:$8 sps:$4 sm:$0xff]  }
  0x69   :  { %1954 = vmatprep.subr.bf16.mxu1 %v3013_v51  ;;  %v3099_v51 = vld [vmem:[%s4269_s1 + $0x5f0] ss:$8 sps:$4 sm:$0xff]  }
  0x6b   :  { %1914 = vmatpush2.bf16.msra.mxu0 %v3008_v52  ;;  %v3104_v52 = vld [vmem:[%s4269_s1 + $0x4e4] ss:$8 sps:$4 sm:$0xff]  }
  0x6c   :  { %1955 = vmatpush2.bf16.msra.mxu1 %v3011_v53  ;;  %1915 = vmatprep.subr.bf16.mxu0 %v3016_v54  ;;  %v3107_v53 = vld [vmem:[%s4269_s1 + $0x5e4] ss:$8 sps:$4 sm:$0xff]   ;;  %v3102_v54 = vld [vmem:[%s4269_s1 + $0x4e0] ss:$8 sps:$4 sm:$0xff]  }
  0x6d   :  { %1956 = vmatprep.subr.bf16.mxu1 %v3019_v55  ;;  %v3105_v55 = vld [vmem:[%s4269_s1 + $0x5e0] ss:$8 sps:$4 sm:$0xff]  }
  0x6f   :  { %1916 = vmatpush2.bf16.msra.mxu0 %v3014_v56  ;;  %v3110_v56 = vld [vmem:[%s4269_s1 + $0x4d4] ss:$8 sps:$4 sm:$0xff]  }
  0x70   :  { %1957 = vmatpush2.bf16.msra.mxu1 %v3017_v57  ;;  %1917 = vmatprep.subr.bf16.mxu0 %v3022_v58  ;;  %v3113_v57 = vld [vmem:[%s4269_s1 + $0x5d4] ss:$8 sps:$4 sm:$0xff]   ;;  %v3108_v58 = vld [vmem:[%s4269_s1 + $0x4d0] ss:$8 sps:$4 sm:$0xff]  }
  0x71   :  { %1958 = vmatprep.subr.bf16.mxu1 %v3025_v59  ;;  %v3111_v59 = vld [vmem:[%s4269_s1 + $0x5d0] ss:$8 sps:$4 sm:$0xff]  }
  0x73   :  { %1918 = vmatpush2.bf16.msra.mxu0 %v3020_v60  ;;  %v3116_v60 = vld [vmem:[%s4269_s1 + $0x4c4] ss:$8 sps:$4 sm:$0xff]  }
  0x74   :  { %1959 = vmatpush2.bf16.msra.mxu1 %v3023_v61  ;;  %1919 = vmatprep.subr.bf16.mxu0 %v3028_v62  ;;  %v3119_v61 = vld [vmem:[%s4269_s1 + $0x5c4] ss:$8 sps:$4 sm:$0xff]   ;;  %v3114_v62 = vld [vmem:[%s4269_s1 + $0x4c0] ss:$8 sps:$4 sm:$0xff]  }
  0x75   :  { %1960 = vmatprep.subr.bf16.mxu1 %v3031_v63  ;;  %v3117_v63 = vld [vmem:[%s4269_s1 + $0x5c0] ss:$8 sps:$4 sm:$0xff]  }
  0x77   :  { %1920 = vmatpush2.bf16.msra.mxu0 %v3026_v0  ;;  %v3122_v0 = vld [vmem:[%s4269_s1 + $0x4b4] ss:$8 sps:$4 sm:$0xff]  }
  0x78   :  { %1961 = vmatpush2.bf16.msra.mxu1 %v3029_v1  ;;  %1921 = vmatprep.subr.bf16.mxu0 %v3034_v2  ;;  %v3125_v1 = vld [vmem:[%s4269_s1 + $0x5b4] ss:$8 sps:$4 sm:$0xff]   ;;  %v3120_v2 = vld [vmem:[%s4269_s1 + $0x4b0] ss:$8 sps:$4 sm:$0xff]  }
  0x79   :  { %1962 = vmatprep.subr.bf16.mxu1 %v3037_v3  ;;  %v3123_v3 = vld [vmem:[%s4269_s1 + $0x5b0] ss:$8 sps:$4 sm:$0xff]  }
  0x7b   :  { %1922 = vmatpush2.bf16.msra.mxu0 %v3032_v4  ;;  %v3128_v4 = vld [vmem:[%s4269_s1 + $0x4a4] ss:$8 sps:$4 sm:$0xff]  }
  0x7c   :  { %1963 = vmatpush2.bf16.msra.mxu1 %v3035_v5  ;;  %1923 = vmatprep.subr.bf16.mxu0 %v3040_v6  ;;  %v3131_v5 = vld [vmem:[%s4269_s1 + $0x5a4] ss:$8 sps:$4 sm:$0xff]   ;;  %v3126_v6 = vld [vmem:[%s4269_s1 + $0x4a0] ss:$8 sps:$4 sm:$0xff]  }
  0x7d   :  { %1964 = vmatprep.subr.bf16.mxu1 %v3043_v7  ;;  %v3129_v7 = vld [vmem:[%s4269_s1 + $0x5a0] ss:$8 sps:$4 sm:$0xff]  }
  0x7f   :  { %1924 = vmatpush2.bf16.msra.mxu0 %v3038_v8  ;;  %v3134_v8 = vld [vmem:[%s4269_s1 + $0x494] ss:$8 sps:$4 sm:$0xff]  }
  0x80   :  { %1965 = vmatpush2.bf16.msra.mxu1 %v3041_v9  ;;  %1975 = vmatprep.subr.bf16.mxu0 %v3048_v10  ;;  %v3137_v9 = vld [vmem:[%s4269_s1 + $0x594] ss:$8 sps:$4 sm:$0xff]   ;;  %v3132_v10 = vld [vmem:[%s4269_s1 + $0x490] ss:$8 sps:$4 sm:$0xff]  }
  0x81   :  { %2016 = vmatprep.subr.bf16.mxu1 %v3053_v11  ;;  %v3135_v11 = vld [vmem:[%s4269_s1 + $0x590] ss:$8 sps:$4 sm:$0xff]  }
  0x82   :  { %1926 = vmatmul.mubr.bf16.vlgmr.msra.gmra.mxu0 %v2535_v12  ;;  %v3140_v12 = vld [vmem:[%s4269_s1 + $0x484] ss:$8 sps:$4 sm:$0xff]  }
  0x83   :  { %1967 = vmatmul.mubr.bf16.vlgmr.msra.gmra.mxu1 %v2537_v14  ;;  %1976 = vmatpush1.bf16.msra.mxu0 %v3046_v13  ;;  %v3143_v13 = vld [vmem:[%s4269_s1 + $0x584] ss:$8 sps:$4 sm:$0xff]   ;;  %v3138_v14 = vld [vmem:[%s4269_s1 + $0x480] ss:$8 sps:$4 sm:$0xff]  }
  0x84   :  { %2017 = vmatpush1.bf16.msra.mxu1 %v3051_v15  ;;  %1977 = vmatprep.subr.bf16.mxu0 %v3056_v16  ;;  %v3141_v15 = vld [vmem:[%s4269_s1 + $0x580] ss:$8 sps:$4 sm:$0xff]   ;;  %v3148_v16 = vld [vmem:[%s4269_s1 + $0x674] ss:$8 sps:$4 sm:$0xff]  }
  0x85   :  { %2018 = vmatprep.subr.bf16.mxu1 %v3059_v17  ;;  %2007 = vmatprep.mubr.bf16.mxu0 %v2540_v19  ;;  %v3153_v17 = vld [vmem:[%s4269_s1 + $0x774] ss:$8 sps:$4 sm:$0xff]   ;;  %v3146_v19 = vld [vmem:[%s4269_s1 + $0x670] ss:$8 sps:$4 sm:$0xff]  }
  0x86   :  { %2048 = vmatprep.mubr.bf16.mxu1 %v2542_v23  ;;  %v2541_v23 = vcombine.low %v3754_v20, %v3754_v20 }
  0x87   :  { %1978 = vmatpush1.bf16.msra.mxu0 %v3054_v21  ;;  %v3151_v21 = vld [vmem:[%s4269_s1 + $0x770] ss:$8 sps:$4 sm:$0xff]  }
  0x88   :  { %2019 = vmatpush1.bf16.msra.mxu1 %v3057_v22  ;;  %1979 = vmatprep.subr.bf16.mxu0 %v3062_v24  ;;  %v2539_v22 = vcombine.low %v3747_v18, %v3747_v18  ;;  %v3951_v24 = vld [vmem:[%s4270_s0 + $0x30] sm:$0xff]  ;;  %v3159_v18 = vld [vmem:[%s4269_s1 + $0x764] ss:$8 sps:$4 sm:$0xff]  }
  0x89   :  { %2020 = vmatprep.subr.bf16.mxu1 %v3065_v25  ;;  %v3956_v25 = vld [vmem:[%s4270_s0 + $0x38] sm:$0xff]  ;;  %v2544_v20 = vcombine.high %v3951_v24, %v3951_v24 }
  0x8b   :  { %1980 = vmatpush1.bf16.msra.mxu0 %v3060_v26  ;;  %v3156_v26 = vld [vmem:[%s4269_s1 + $0x664] ss:$8 sps:$4 sm:$0xff]  }
  0x8c   :  { %2021 = vmatpush1.bf16.msra.mxu1 %v3063_v27  ;;  %1981 = vmatprep.subr.bf16.mxu0 %v3068_v28  ;;  %v2546_v27 = vcombine.high %v3956_v25, %v3956_v25  ;;  %v3154_v28 = vld [vmem:[%s4269_s1 + $0x660] ss:$8 sps:$4 sm:$0xff]  }
  0x8d   :  { %2022 = vmatprep.subr.bf16.mxu1 %v3071_v29  ;;  %v3157_v29 = vld [vmem:[%s4269_s1 + $0x760] ss:$8 sps:$4 sm:$0xff]  }
  0x8f   :  { %1982 = vmatpush1.bf16.msra.mxu0 %v3066_v30  ;;  %v3162_v30 = vld [vmem:[%s4269_s1 + $0x654] ss:$8 sps:$4 sm:$0xff]  }
  0x90   :  { %2023 = vmatpush1.bf16.msra.mxu1 %v3069_v31  ;;  %1983 = vmatprep.subr.bf16.mxu0 %v3074_v32  ;;  %v3165_v31 = vld [vmem:[%s4269_s1 + $0x754] ss:$8 sps:$4 sm:$0xff]   ;;  %v3160_v32 = vld [vmem:[%s4269_s1 + $0x650] ss:$8 sps:$4 sm:$0xff]  }
  0x91   :  { %2024 = vmatprep.subr.bf16.mxu1 %v3077_v33  ;;  %v3163_v33 = vld [vmem:[%s4269_s1 + $0x750] ss:$8 sps:$4 sm:$0xff]  }
  0x93   :  { %1984 = vmatpush1.bf16.msra.mxu0 %v3072_v34  ;;  %v3168_v34 = vld [vmem:[%s4269_s1 + $0x644] ss:$8 sps:$4 sm:$0xff]  }
  0x94   :  { %2025 = vmatpush1.bf16.msra.mxu1 %v3075_v35  ;;  %1985 = vmatprep.subr.bf16.mxu0 %v3080_v36  ;;  %v3171_v35 = vld [vmem:[%s4269_s1 + $0x744] ss:$8 sps:$4 sm:$0xff]   ;;  %v3166_v36 = vld [vmem:[%s4269_s1 + $0x640] ss:$8 sps:$4 sm:$0xff]  }
  0x95   :  { %2026 = vmatprep.subr.bf16.mxu1 %v3083_v37  ;;  %v3169_v37 = vld [vmem:[%s4269_s1 + $0x740] ss:$8 sps:$4 sm:$0xff]  }
  0x97   :  { %1986 = vmatpush1.bf16.msra.mxu0 %v3078_v38  ;;  %v3174_v38 = vld [vmem:[%s4269_s1 + $0x634] ss:$8 sps:$4 sm:$0xff]  }
  0x98   :  { %2027 = vmatpush1.bf16.msra.mxu1 %v3081_v39  ;;  %1987 = vmatprep.subr.bf16.mxu0 %v3086_v40  ;;  %v3177_v39 = vld [vmem:[%s4269_s1 + $0x734] ss:$8 sps:$4 sm:$0xff]   ;;  %v3172_v40 = vld [vmem:[%s4269_s1 + $0x630] ss:$8 sps:$4 sm:$0xff]  }
  0x99   :  { %2028 = vmatprep.subr.bf16.mxu1 %v3089_v41  ;;  %v3175_v41 = vld [vmem:[%s4269_s1 + $0x730] ss:$8 sps:$4 sm:$0xff]  }
  0x9b   :  { %1988 = vmatpush1.bf16.msra.mxu0 %v3084_v42  ;;  %v3180_v42 = vld [vmem:[%s4269_s1 + $0x624] ss:$8 sps:$4 sm:$0xff]  }
  0x9c   :  { %2029 = vmatpush1.bf16.msra.mxu1 %v3087_v43  ;;  %1989 = vmatprep.subr.bf16.mxu0 %v3092_v44  ;;  %v3183_v43 = vld [vmem:[%s4269_s1 + $0x724] ss:$8 sps:$4 sm:$0xff]   ;;  %v3178_v44 = vld [vmem:[%s4269_s1 + $0x620] ss:$8 sps:$4 sm:$0xff]  }
  0x9d   :  { %2030 = vmatprep.subr.bf16.mxu1 %v3095_v45  ;;  %v3181_v45 = vld [vmem:[%s4269_s1 + $0x720] ss:$8 sps:$4 sm:$0xff]  }
  0x9f   :  { %1990 = vmatpush1.bf16.msra.mxu0 %v3090_v46  ;;  %v3186_v46 = vld [vmem:[%s4269_s1 + $0x614] ss:$8 sps:$4 sm:$0xff]  }
  0xa0   :  { %2031 = vmatpush1.bf16.msra.mxu1 %v3093_v47  ;;  %1991 = vmatprep.subr.bf16.mxu0 %v3098_v48  ;;  %v3189_v47 = vld [vmem:[%s4269_s1 + $0x714] ss:$8 sps:$4 sm:$0xff]   ;;  %v3184_v48 = vld [vmem:[%s4269_s1 + $0x610] ss:$8 sps:$4 sm:$0xff]  }
  0xa1   :  { %2032 = vmatprep.subr.bf16.mxu1 %v3101_v49  ;;  %v3187_v49 = vld [vmem:[%s4269_s1 + $0x710] ss:$8 sps:$4 sm:$0xff]  }
  0xa3   :  { %1992 = vmatpush2.bf16.msra.mxu0 %v3096_v50  ;;  %v3192_v50 = vld [vmem:[%s4269_s1 + $0x604] ss:$8 sps:$4 sm:$0xff]  }
  0xa4   :  { %2033 = vmatpush2.bf16.msra.mxu1 %v3099_v51  ;;  %1993 = vmatprep.subr.bf16.mxu0 %v3104_v52  ;;  %v3195_v51 = vld [vmem:[%s4269_s1 + $0x704] ss:$8 sps:$4 sm:$0xff]   ;;  %v3190_v52 = vld [vmem:[%s4269_s1 + $0x600] ss:$8 sps:$4 sm:$0xff]  }
  0xa5   :  { %2034 = vmatprep.subr.bf16.mxu1 %v3107_v53  ;;  %v3193_v53 = vld [vmem:[%s4269_s1 + $0x700] ss:$8 sps:$4 sm:$0xff]  }
  0xa7   :  { %1994 = vmatpush2.bf16.msra.mxu0 %v3102_v54  ;;  %v3198_v54 = vld [vmem:[%s4269_s1 + $0x6f4] ss:$8 sps:$4 sm:$0xff]  }
  0xa8   :  { %2035 = vmatpush2.bf16.msra.mxu1 %v3105_v55  ;;  %1995 = vmatprep.subr.bf16.mxu0 %v3110_v56  ;;  %v3201_v55 = vld [vmem:[%s4269_s1 + $0x7f4] ss:$8 sps:$4 sm:$0xff]   ;;  %v3196_v56 = vld [vmem:[%s4269_s1 + $0x6f0] ss:$8 sps:$4 sm:$0xff]  }
  0xa9   :  { %2036 = vmatprep.subr.bf16.mxu1 %v3113_v57  ;;  %v3199_v57 = vld [vmem:[%s4269_s1 + $0x7f0] ss:$8 sps:$4 sm:$0xff]  }
  0xab   :  { %1996 = vmatpush2.bf16.msra.mxu0 %v3108_v58  ;;  %v3204_v58 = vld [vmem:[%s4269_s1 + $0x6e4] ss:$8 sps:$4 sm:$0xff]  }
  0xac   :  { %2037 = vmatpush2.bf16.msra.mxu1 %v3111_v59  ;;  %1997 = vmatprep.subr.bf16.mxu0 %v3116_v60  ;;  %v3207_v59 = vld [vmem:[%s4269_s1 + $0x7e4] ss:$8 sps:$4 sm:$0xff]   ;;  %v3202_v60 = vld [vmem:[%s4269_s1 + $0x6e0] ss:$8 sps:$4 sm:$0xff]  }
  0xad   :  { %2038 = vmatprep.subr.bf16.mxu1 %v3119_v61  ;;  %v3205_v61 = vld [vmem:[%s4269_s1 + $0x7e0] ss:$8 sps:$4 sm:$0xff]  }
  0xaf   :  { %1998 = vmatpush2.bf16.msra.mxu0 %v3114_v62  ;;  %v3210_v62 = vld [vmem:[%s4269_s1 + $0x6d4] ss:$8 sps:$4 sm:$0xff]  }
  0xb0   :  { %2039 = vmatpush2.bf16.msra.mxu1 %v3117_v63  ;;  %1999 = vmatprep.subr.bf16.mxu0 %v3122_v0  ;;  %v3213_v63 = vld [vmem:[%s4269_s1 + $0x7d4] ss:$8 sps:$4 sm:$0xff]   ;;  %v3208_v0 = vld [vmem:[%s4269_s1 + $0x6d0] ss:$8 sps:$4 sm:$0xff]  }
  0xb1   :  { %2040 = vmatprep.subr.bf16.mxu1 %v3125_v1  ;;  %v3211_v1 = vld [vmem:[%s4269_s1 + $0x7d0] ss:$8 sps:$4 sm:$0xff]  }
  0xb3   :  { %2000 = vmatpush2.bf16.msra.mxu0 %v3120_v2  ;;  %v3216_v2 = vld [vmem:[%s4269_s1 + $0x6c4] ss:$8 sps:$4 sm:$0xff]  }
  0xb4   :  { %2041 = vmatpush2.bf16.msra.mxu1 %v3123_v3  ;;  %2001 = vmatprep.subr.bf16.mxu0 %v3128_v4  ;;  %v3219_v3 = vld [vmem:[%s4269_s1 + $0x7c4] ss:$8 sps:$4 sm:$0xff]   ;;  %v3214_v4 = vld [vmem:[%s4269_s1 + $0x6c0] ss:$8 sps:$4 sm:$0xff]  }
  0xb5   :  { %2042 = vmatprep.subr.bf16.mxu1 %v3131_v5  ;;  %v3217_v5 = vld [vmem:[%s4269_s1 + $0x7c0] ss:$8 sps:$4 sm:$0xff]  }
  0xb7   :  { %2002 = vmatpush2.bf16.msra.mxu0 %v3126_v6  ;;  %v3222_v6 = vld [vmem:[%s4269_s1 + $0x6b4] ss:$8 sps:$4 sm:$0xff]  }
  0xb8   :  { %2043 = vmatpush2.bf16.msra.mxu1 %v3129_v7  ;;  %2003 = vmatprep.subr.bf16.mxu0 %v3134_v8  ;;  %v3225_v7 = vld [vmem:[%s4269_s1 + $0x7b4] ss:$8 sps:$4 sm:$0xff]   ;;  %v3220_v8 = vld [vmem:[%s4269_s1 + $0x6b0] ss:$8 sps:$4 sm:$0xff]  }
  0xb9   :  { %2044 = vmatprep.subr.bf16.mxu1 %v3137_v9  ;;  %v3223_v9 = vld [vmem:[%s4269_s1 + $0x7b0] ss:$8 sps:$4 sm:$0xff]  }
  0xbb   :  { %2004 = vmatpush2.bf16.msra.mxu0 %v3132_v10  ;;  %v3228_v10 = vld [vmem:[%s4269_s1 + $0x6a4] ss:$8 sps:$4 sm:$0xff]  }
  0xbc   :  { %2045 = vmatpush2.bf16.msra.mxu1 %v3135_v11  ;;  %2005 = vmatprep.subr.bf16.mxu0 %v3140_v12  ;;  %v3231_v11 = vld [vmem:[%s4269_s1 + $0x7a4] ss:$8 sps:$4 sm:$0xff]   ;;  %v3226_v12 = vld [vmem:[%s4269_s1 + $0x6a0] ss:$8 sps:$4 sm:$0xff]  }
  0xbd   :  { %2046 = vmatprep.subr.bf16.mxu1 %v3143_v13  ;;  %v3229_v13 = vld [vmem:[%s4269_s1 + $0x7a0] ss:$8 sps:$4 sm:$0xff]  }
  0xbf   :  { %2006 = vmatpush2.bf16.msra.mxu0 %v3138_v14  ;;  %v3234_v14 = vld [vmem:[%s4269_s1 + $0x694] ss:$8 sps:$4 sm:$0xff]  }
  0xc0   :  { %2047 = vmatpush2.bf16.msra.mxu1 %v3141_v15  ;;  %2057 = vmatprep.subr.bf16.mxu0 %v3148_v16  ;;  %v3237_v15 = vld [vmem:[%s4269_s1 + $0x794] ss:$8 sps:$4 sm:$0xff]   ;;  %v3232_v16 = vld [vmem:[%s4269_s1 + $0x690] ss:$8 sps:$4 sm:$0xff]  }
  0xc1   :  { %2098 = vmatprep.subr.bf16.mxu1 %v3153_v17  ;;  %v3235_v17 = vld [vmem:[%s4269_s1 + $0x790] ss:$8 sps:$4 sm:$0xff]  }
  0xc2   :  { %2008 = vmatmul.mubr.bf16.vlgmr.msra.gmra.mxu0 %v2539_v22  ;;  %v3238_v22 = vld [vmem:[%s4269_s1 + $0x680] ss:$8 sps:$4 sm:$0xff]  }
  0xc3   :  { %2049 = vmatmul.mubr.bf16.vlgmr.msra.gmra.mxu1 %v2541_v23  ;;  %2058 = vmatpush1.bf16.msra.mxu0 %v3146_v19  ;;  %v3240_v19 = vld [vmem:[%s4269_s1 + $0x684] ss:$8 sps:$4 sm:$0xff]   ;;  %v3241_v23 = vld [vmem:[%s4269_s1 + $0x780] ss:$8 sps:$4 sm:$0xff]  }
  0xc4   :  { %2099 = vmatpush1.bf16.msra.mxu1 %v3151_v21  ;;  %2059 = vmatprep.subr.bf16.mxu0 %v3156_v26  ;;  %v3243_v21 = vld [vmem:[%s4269_s1 + $0x784] ss:$8 sps:$4 sm:$0xff]   ;;  %v3248_v26 = vld [vmem:[%s4269_s1 + $0x874] ss:$8 sps:$4 sm:$0xff]  }
  0xc5   :  { %2100 = vmatprep.subr.bf16.mxu1 %v3159_v18  ;;  %2089 = vmatprep.mubr.bf16.mxu0 %v2544_v20  ;;  %v4148_v18 = vld [vmem:[%s4270_s0 + $0x40] sm:$0xff]  ;;  %v2543_v20 = vcombine.low %v3951_v24, %v3951_v24 }
  0xc6   :  { %2130 = vmatprep.mubr.bf16.mxu1 %v2546_v27  ;;  %v2545_v27 = vcombine.low %v3956_v25, %v3956_v25  ;;  %v3251_v25 = vld [vmem:[%s4269_s1 + $0x860] ss:$8 sps:$4 sm:$0xff]  }
  0xc7   :  { %2060 = vmatpush1.bf16.msra.mxu0 %v3154_v28  ;;  %v3246_v28 = vld [vmem:[%s4269_s1 + $0x870] ss:$8 sps:$4 sm:$0xff]  }
  0xc8   :  { %2101 = vmatpush1.bf16.msra.mxu1 %v3157_v29  ;;  %2061 = vmatprep.subr.bf16.mxu0 %v3162_v30  ;;  %v2548_v29 = vcombine.high %v4148_v18, %v4148_v18  ;;  %v3253_v30 = vld [vmem:[%s4269_s1 + $0x864] ss:$8 sps:$4 sm:$0xff]  }
  0xc9   :  { %2102 = vmatprep.subr.bf16.mxu1 %v3165_v31 }
  0xcb   :  { %2062 = vmatpush1.bf16.msra.mxu0 %v3160_v32 }
  0xcc   :  { %2103 = vmatpush1.bf16.msra.mxu1 %v3163_v33  ;;  %2063 = vmatprep.subr.bf16.mxu0 %v3168_v34 }
  0xcd   :  { %2104 = vmatprep.subr.bf16.mxu1 %v3171_v35  ;;  %v3256_v35 = vld [vmem:[%s4269_s1 + $0x854] ss:$8 sps:$4 sm:$0xff]  }
  0xcf   :  { %2064 = vmatpush1.bf16.msra.mxu0 %v3166_v36 }
  0xd0   :  { %2105 = vmatpush1.bf16.msra.mxu1 %v3169_v37  ;;  %2065 = vmatprep.subr.bf16.mxu0 %v3174_v38 }
  0xd1   :  { %2106 = vmatprep.subr.bf16.mxu1 %v3177_v39  ;;  %v3254_v39 = vld [vmem:[%s4269_s1 + $0x850] ss:$8 sps:$4 sm:$0xff]  }
  0xd3   :  { %2066 = vmatpush1.bf16.msra.mxu0 %v3172_v40 }
  0xd4   :  { %2107 = vmatpush1.bf16.msra.mxu1 %v3175_v41  ;;  %2067 = vmatprep.subr.bf16.mxu0 %v3180_v42  ;;  %v3259_v41 = vld [vmem:[%s4269_s1 + $0x844] ss:$8 sps:$4 sm:$0xff]  }
  0xd5   :  { %2108 = vmatprep.subr.bf16.mxu1 %v3183_v43  ;;  %v3257_v43 = vld [vmem:[%s4269_s1 + $0x840] ss:$8 sps:$4 sm:$0xff]  }
  0xd7   :  { %2068 = vmatpush1.bf16.msra.mxu0 %v3178_v44  ;;  %v3262_v44 = vld [vmem:[%s4269_s1 + $0x834] ss:$8 sps:$4 sm:$0xff]  }
  0xd8   :  { %2109 = vmatpush1.bf16.msra.mxu1 %v3181_v45  ;;  %2069 = vmatprep.subr.bf16.mxu0 %v3186_v46  ;;  %v3260_v45 = vld [vmem:[%s4269_s1 + $0x830] ss:$8 sps:$4 sm:$0xff]   ;;  %v3265_v46 = vld [vmem:[%s4269_s1 + $0x824] ss:$8 sps:$4 sm:$0xff]  }
  0xd9   :  { %2110 = vmatprep.subr.bf16.mxu1 %v3189_v47  ;;  %v3263_v47 = vld [vmem:[%s4269_s1 + $0x820] ss:$8 sps:$4 sm:$0xff]  }
  0xdb   :  { %2070 = vmatpush1.bf16.msra.mxu0 %v3184_v48  ;;  %v3268_v48 = vld [vmem:[%s4269_s1 + $0x814] ss:$8 sps:$4 sm:$0xff]  }
  0xdc   :  { %2111 = vmatpush1.bf16.msra.mxu1 %v3187_v49  ;;  %2071 = vmatprep.subr.bf16.mxu0 %v3192_v50  ;;  %v3266_v49 = vld [vmem:[%s4269_s1 + $0x810] ss:$8 sps:$4 sm:$0xff]   ;;  %v3271_v50 = vld [vmem:[%s4269_s1 + $0x804] ss:$8 sps:$4 sm:$0xff]  }
  0xdd   :  { %2112 = vmatprep.subr.bf16.mxu1 %v3195_v51  ;;  %v3269_v51 = vld [vmem:[%s4269_s1 + $0x800] ss:$8 sps:$4 sm:$0xff]  }
  0xdf   :  { %2072 = vmatpush1.bf16.msra.mxu0 %v3190_v52  ;;  %v3274_v52 = vld [vmem:[%s4269_s1 + $0x8f4] ss:$8 sps:$4 sm:$0xff]  }
  0xe0   :  { %2113 = vmatpush1.bf16.msra.mxu1 %v3193_v53  ;;  %2073 = vmatprep.subr.bf16.mxu0 %v3198_v54  ;;  %v3272_v53 = vld [vmem:[%s4269_s1 + $0x8f0] ss:$8 sps:$4 sm:$0xff]   ;;  %v3277_v54 = vld [vmem:[%s4269_s1 + $0x8e4] ss:$8 sps:$4 sm:$0xff]  }
  0xe1   :  { %2114 = vmatprep.subr.bf16.mxu1 %v3201_v55  ;;  %v3275_v55 = vld [vmem:[%s4269_s1 + $0x8e0] ss:$8 sps:$4 sm:$0xff]  }
  0xe3   :  { %2074 = vmatpush2.bf16.msra.mxu0 %v3196_v56  ;;  %v3280_v56 = vld [vmem:[%s4269_s1 + $0x8d4] ss:$8 sps:$4 sm:$0xff]  }
  0xe4   :  { %2115 = vmatpush2.bf16.msra.mxu1 %v3199_v57  ;;  %2075 = vmatprep.subr.bf16.mxu0 %v3204_v58  ;;  %v3278_v57 = vld [vmem:[%s4269_s1 + $0x8d0] ss:$8 sps:$4 sm:$0xff]   ;;  %v3283_v58 = vld [vmem:[%s4269_s1 + $0x8c4] ss:$8 sps:$4 sm:$0xff]  }
  0xe5   :  { %2116 = vmatprep.subr.bf16.mxu1 %v3207_v59  ;;  %v3281_v59 = vld [vmem:[%s4269_s1 + $0x8c0] ss:$8 sps:$4 sm:$0xff]  }
  0xe7   :  { %2076 = vmatpush2.bf16.msra.mxu0 %v3202_v60  ;;  %v3286_v60 = vld [vmem:[%s4269_s1 + $0x8b4] ss:$8 sps:$4 sm:$0xff]  }
  0xe8   :  { %2117 = vmatpush2.bf16.msra.mxu1 %v3205_v61  ;;  %2077 = vmatprep.subr.bf16.mxu0 %v3210_v62  ;;  %v3284_v61 = vld [vmem:[%s4269_s1 + $0x8b0] ss:$8 sps:$4 sm:$0xff]   ;;  %v3289_v62 = vld [vmem:[%s4269_s1 + $0x8a4] ss:$8 sps:$4 sm:$0xff]  }
  0xe9   :  { %2118 = vmatprep.subr.bf16.mxu1 %v3213_v63  ;;  %v3287_v63 = vld [vmem:[%s4269_s1 + $0x8a0] ss:$8 sps:$4 sm:$0xff]  }
  0xeb   :  { %2078 = vmatpush2.bf16.msra.mxu0 %v3208_v0  ;;  %v3292_v0 = vld [vmem:[%s4269_s1 + $0x894] ss:$8 sps:$4 sm:$0xff]  }
  0xec   :  { %2119 = vmatpush2.bf16.msra.mxu1 %v3211_v1  ;;  %2079 = vmatprep.subr.bf16.mxu0 %v3216_v2  ;;  %v3290_v1 = vld [vmem:[%s4269_s1 + $0x890] ss:$8 sps:$4 sm:$0xff]   ;;  %v3295_v2 = vld [vmem:[%s4269_s1 + $0x884] ss:$8 sps:$4 sm:$0xff]  }
  0xed   :  { %2120 = vmatprep.subr.bf16.mxu1 %v3219_v3  ;;  %v3293_v3 = vld [vmem:[%s4269_s1 + $0x880] ss:$8 sps:$4 sm:$0xff]  }
  0xef   :  { %2080 = vmatpush2.bf16.msra.mxu0 %v3214_v4  ;;  %v2547_v4 = vcombine.low %v4148_v18, %v4148_v18 }
  0xf0   :  { %2121 = vmatpush2.bf16.msra.mxu1 %v3217_v5  ;;  %2081 = vmatprep.subr.bf16.mxu0 %v3222_v6 }
  0xf1   :  { %2122 = vmatprep.subr.bf16.mxu1 %v3225_v7 }
  0xf3   :  { %2082 = vmatpush2.bf16.msra.mxu0 %v3220_v8 }
  0xf4   :  { %2123 = vmatpush2.bf16.msra.mxu1 %v3223_v9  ;;  %2083 = vmatprep.subr.bf16.mxu0 %v3228_v10 }
  0xf5   :  { %2124 = vmatprep.subr.bf16.mxu1 %v3231_v11 }
  0xf7   :  { %2084 = vmatpush2.bf16.msra.mxu0 %v3226_v12 }
  0xf8   :  { %2125 = vmatpush2.bf16.msra.mxu1 %v3229_v13  ;;  %2085 = vmatprep.subr.bf16.mxu0 %v3234_v14 }
  0xf9   :  { %2126 = vmatprep.subr.bf16.mxu1 %v3237_v15 }
  0xfb   :  { %2086 = vmatpush2.bf16.msra.mxu0 %v3232_v16 }
  0xfc   :  { %2127 = vmatpush2.bf16.msra.mxu1 %v3235_v17  ;;  %2087 = vmatprep.subr.bf16.mxu0 %v3240_v19 }
  0xfd   :  { %2128 = vmatprep.subr.bf16.mxu1 %v3243_v21 }
  0xff   :  { %2088 = vmatpush2.bf16.msra.mxu0 %v3238_v22 }
 0x100   :  { %2129 = vmatpush2.bf16.msra.mxu1 %v3241_v23  ;;  %2139 = vmatprep.subr.bf16.mxu0 %v3248_v26 }
 0x102   :  { %v1845_v31 = vpop.f32.mrf.mxu0  ;;  %2090 = vmatmul.mubr.bf16.vlgmr.msra.gmra.mxu0 %v2543_v20 }
 0x103   :  { %v1886_v32 = vpop.f32.mrf.mxu1  ;;  %2131 = vmatmul.mubr.bf16.vlgmr.msra.gmra.mxu1 %v2545_v27  ;;  %2140 = vmatpush1.bf16.msra.mxu0 %v3246_v28 }
 0x104   :  { %v4162_v24 = vadd.f32 %v1886_v32, %v1845_v31  ;;  %2171 = vmatprep.mubr.bf16.mxu0 %v2548_v29  ;;  %v1847_v33 = vpop.f32.mrf.mxu0  ;;  %2141 = vmatprep.subr.bf16.mxu0 %v3253_v30  ;;  %v3302_v31 = vmov 0.0  }
 0x105   :  { %v1888_v34 = vpop.f32.mrf.mxu1  ;;  %2266 = vmatprep.mubr.f32.mxu1 %v3302_v31 }
 0x106   :  { %v4170_v36 = vadd.f32 %v1888_v34, %v1847_v33  ;;  %v1849_v37 = vpop.f32.mrf.mxu0 }
 0x107   :  { %v1890_v38 = vpop.f32.mrf.mxu1  ;;  %2142 = vmatpush1.bf16.msra.mxu0 %v3251_v25 }
 0x108   :  { %v1850_v40 = vpop.f32.mrf.mxu0  ;;  %2143 = vmatprep.subr.bf16.mxu0 %v3256_v35 }
 0x109   :  { %v1891_v42 = vpop.f32.mrf.mxu1  ;;  %v2180_v40 = vlaneseq }
 0x10b   :  { %2144 = vmatpush1.bf16.msra.mxu0 %v3254_v39 }
 0x10c   :  { %2145 = vmatprep.subr.bf16.mxu0 %v3259_v41  ;;  %v2183_v41 = vshrl.u32 %v2180_v40, 7 }
 0x10e   :  { %v2184_v42 = vmul.u32 4, %v2183_v41 }
 0x10f   :  { %2146 = vmatpush1.bf16.msra.mxu0 %v3257_v43  ;;  %v2181_v43 = vand.u32 127, %v2180_v40 }
 0x110   :  { %2147 = vmatprep.subr.bf16.mxu0 %v3262_v44  ;;  %v2186_v44 = vadd.s32 4, %v2184_v42 }
 0x111   :  { %vm2185_vm0 = vcmp.ge.s32.totalorder %v2181_v43, %v2184_v42 }
 0x112   :  { %vm2187_vm1 = vcmp.lt.s32.totalorder %v2181_v43, %v2186_v44 }
 0x113   :  { %2148 = vmatpush1.bf16.msra.mxu0 %v3260_v45  ;;  %vm2188_vm2 = vmand %vm2185_vm0, %vm2187_vm1 }
 0x114   :  { %2149 = vmatprep.subr.bf16.mxu0 %v3265_v46 }
 0x117   :  { %2150 = vmatpush1.bf16.msra.mxu0 %v3263_v47 }
 0x118   :  { %2151 = vmatprep.subr.bf16.mxu0 %v3268_v48 }
 0x11b   :  { %2152 = vmatpush1.bf16.msra.mxu0 %v3266_v49 }
 0x11c   :  { %2153 = vmatprep.subr.bf16.mxu0 %v3271_v50 }
 0x11f   :  { %2154 = vmatpush1.bf16.msra.mxu0 %v3269_v51 }
 0x120   :  { %2155 = vmatprep.subr.bf16.mxu0 %v3274_v52  ;;  %v2837_v52 = vsel %vm2188_vm2, 1.0, %v3302_v31 }
 0x123   :  { %2156 = vmatpush2.bf16.msra.mxu0 %v3272_v53 }
 0x124   :  { %2157 = vmatprep.subr.bf16.mxu0 %v3277_v54 }
 0x127   :  { %2158 = vmatpush2.bf16.msra.mxu0 %v3275_v55 }
 0x128   :  { %2159 = vmatprep.subr.bf16.mxu0 %v3280_v56  ;;  %v2191_v56 = vmul.u32 4, %v2181_v43 }
 0x12a   :  { %vm2192_vm4 = vcmp.ge.s32.totalorder %v2183_v41, %v2191_v56 }
 0x12b   :  { %2160 = vmatpush2.bf16.msra.mxu0 %v3278_v57  ;;  %v2193_v57 = vadd.s32 4, %v2191_v56 }
 0x12c   :  { %2161 = vmatprep.subr.bf16.mxu0 %v3283_v58 }
 0x12d   :  { %vm2194_vm5 = vcmp.lt.s32.totalorder %v2183_v41, %v2193_v57 }
 0x12e   :  { %vm2195_vm6 = vmand %vm2192_vm4, %vm2194_vm5 }
 0x12f   :  { %2162 = vmatpush2.bf16.msra.mxu0 %v3281_v59 }
 0x130   :  { %2163 = vmatprep.subr.bf16.mxu0 %v3286_v60 }
 0x133   :  { %2164 = vmatpush2.bf16.msra.mxu0 %v3284_v61 }
 0x134   :  { %2165 = vmatprep.subr.bf16.mxu0 %v3289_v62 }
 0x137   :  { %2166 = vmatpush2.bf16.msra.mxu0 %v3287_v63  ;;  %v2838_v63 = vsel %vm2195_vm6, 1.0, %v3302_v31 }
 0x138   :  { %2167 = vmatprep.subr.bf16.mxu0 %v3292_v0 }
 0x13b   :  { %2168 = vmatpush2.bf16.msra.mxu0 %v3290_v1 }
 0x13c   :  { %2169 = vmatprep.subr.bf16.mxu0 %v3295_v2 }
 0x13f   :  { %2170 = vmatpush2.bf16.msra.mxu0 %v3293_v3 }
 0x142   :  { %v1927_v5 = vpop.f32.mrf.mxu0  ;;  %2172 = vmatmul.mubr.bf16.vlgmr.msra.gmra.mxu0 %v2547_v4 }
 0x143   :  { %v1968_v6 = vpop.f32.mrf.mxu1  ;;  %v1928_v7 = vadd.f32 %v1927_v5, %v4162_v24 }
 0x144   :  { %v1929_v8 = vpop.f32.mrf.mxu0 }
 0x145   :  { %v1970_v9 = vpop.f32.mrf.mxu1  ;;  %v1930_v10 = vadd.f32 %v1929_v8, %v4170_v36  ;;  %v1969_v11 = vadd.f32 %v1968_v6, %v1928_v7 }
 0x146   :  { %v1931_v12 = vpop.f32.mrf.mxu0 }
 0x147   :  { %v1972_v13 = vpop.f32.mrf.mxu1  ;;  %v1971_v14 = vadd.f32 %v1970_v9, %v1930_v10 }
 0x148   :  { %v1932_v15 = vpop.f32.mrf.mxu0 }
 0x149   :  { %v1973_v16 = vpop.f32.mrf.mxu1 }
 0x182   :  { %v2009_v17 = vpop.f32.mrf.mxu0 }
 0x183   :  { %v2050_v19 = vpop.f32.mrf.mxu1  ;;  %v2010_v21 = vadd.f32 %v2009_v17, %v1969_v11 }
 0x184   :  { %v2011_v22 = vpop.f32.mrf.mxu0 }
 0x185   :  { %v2052_v23 = vpop.f32.mrf.mxu1  ;;  %v2012_v26 = vadd.f32 %v2011_v22, %v1971_v14  ;;  %v2051_v18 = vadd.f32 %v2050_v19, %v2010_v21 }
 0x186   :  { %v2013_v20 = vpop.f32.mrf.mxu0 }
 0x187   :  { %v2054_v27 = vpop.f32.mrf.mxu1  ;;  %v2053_v28 = vadd.f32 %v2052_v23, %v2012_v26 }
 0x188   :  { %v2014_v29 = vpop.f32.mrf.mxu0 }
 0x189   :  { %v2055_v30 = vpop.f32.mrf.mxu1 }
 0x1c2   :  { %v2091_v32 = vpop.f32.mrf.mxu0 }
 0x1c3   :  { %v2132_v24 = vpop.f32.mrf.mxu1  ;;  %v2092_v25 = vadd.f32 %v2091_v32, %v2051_v18 }
 0x1c4   :  { %v2093_v33 = vpop.f32.mrf.mxu0 }
 0x1c5   :  { %v2134_v34 = vpop.f32.mrf.mxu1  ;;  %v2133_v35 = vadd.f32 %v2132_v24, %v2092_v25  ;;  %v2094_v45 = vadd.f32 %v2093_v33, %v2053_v28 }
 0x1c6   :  { %v2095_v36 = vpop.f32.mrf.mxu0 }
 0x1c7   :  { %v2136_v37 = vpop.f32.mrf.mxu1  ;;  %v2135_v47 = vadd.f32 %v2134_v34, %v2094_v45 }
 0x1c8   :  { %v2096_v38 = vpop.f32.mrf.mxu0 }
 0x1c9   :  { %v2137_v39 = vpop.f32.mrf.mxu1 }
 0x202   :  { %v2173_v46 = vpop.f32.mrf.mxu0 }
 0x203   :  { %v2174_v48 = vadd.f32 %v2173_v46, %v2133_v35 }
 0x204   :  { %v2175_v49 = vpop.f32.mrf.mxu0 }
 0x205   :  { %v2176_v50 = vadd.f32 %v2175_v49, %v2135_v47  ;;  %v2273_v54 = vmul.f32 %v2174_v48, %v2174_v48 }
 0x206   :  { %v2177_v51 = vpop.f32.mrf.mxu0 }
 0x207   :  { %2232 = vmatprep.subr.mxu1 %v2176_v50  ;;  %v2274_v53 = vmul.f32 %v2176_v50, %v2176_v50 }
 0x208   :  { %v2178_v55 = vpop.f32.mrf.mxu0  ;;  %2233 = vmatpush1.msra.mxu1 %v2174_v48 }
 0x209   :  { %2839 = vmatmul.mubr.msk.f32.vlgmr.msra.gmra.mxu1 %vm2198_vm3, %v2837_v52  ;;  %2305 = vmatprep.subr.mxu1 %v2274_v53 }
 0x20a   :  { %2306 = vmatpush1.msra.mxu1 %v2273_v54  ;;  %2339 = vmatprep.mubr.f32.mxu1 %v3302_v31 }
 0x20d   :  { %2840 = vmatmul.mubr.msk.f32.vlgmr.msra.gmra.mxu1 %vm2198_vm3, %v2837_v52 }
 0x20e   :  { %2435 = vmatprep.mubr.f32.mxu1 %v3302_v31 }
 0x2c9   :  { %v2268_v58 = vpop.f32.mrf.mxu1 }
 0x2ca   :  { %v2346_v59 = vmul.f32 0.25, %v2268_v58 }
 0x2cb   :  { %v2270_v60 = vpop.f32.mrf.mxu1 }
 0x2cc   :  { %v2347_v61 = vmul.f32 0.25, %v2270_v60  ;;  %v2350_v0 = vmul.f32 %v2346_v59, %v2346_v59 }
 0x2cd   :  { %v2341_v62 = vpop.f32.mrf.mxu1 }
 0x2ce   :  { %v2348_v1 = vmul.f32 0.25, %v2341_v62  ;;  %2841 = vmatprep.subr.msk.mxu1 %vm2364_vm7, %v2347_v61  ;;  %v2351_v3 = vmul.f32 %v2347_v61, %v2347_v61 }
 0x2cf   :  { %v2343_v2 = vpop.f32.mrf.mxu1  ;;  %2842 = vmatpush1.msk.msra.mxu1 %vm2364_vm7, %v2346_v59 }
 0x2d0   :  { %v2352_v4 = vsub.f32 %v2348_v1, %v2350_v0  ;;  %v2349_v5 = vmul.f32 0.25, %v2343_v2  ;;  %2843 = vmatmul.mubr.msk.f32.vlgmr.msra.gmra.mxu1 %vm2360_vm8, %v2838_v63 }
 0x2d1   :  { %2512 = vmatprep.mubr.f32.mxu1 %v3302_v31 }
 0x2d2   :  { %v2354_v6 = vmax.f32 %v2352_v4, 0.0  ;;  %v2353_v7 = vsub.f32 %v2349_v5, %v2351_v3 }
 0x2d4   :  { %v2355_v8 = vmax.f32 %v2353_v7, 0.0  ;;  %v2356_v9 = vadd.f32 1e-05, %v2354_v6 }
 0x2d6   :  { %v2357_v10 = vadd.f32 1e-05, %v2355_v8 }
 0x2d8   :  { %3298 = vrsqrt.f32 %v2357_v10 }
 0x2d9   :  { %3300 = vrsqrt.f32 %v2356_v9 }
 0x2e5   :  { %v3299_v11 = vpop.eup %3298 }
 0x2e6   :  { %v3301_v12 = vpop.eup %3300  ;;  %2844 = vmatprep.subr.msk.mxu1 %vm2364_vm7, %v3299_v11 }
 0x2e7   :  { %2845 = vmatpush1.msk.msra.mxu1 %vm2364_vm7, %v3301_v12 }
 0x2e8   :  { %2846 = vmatmul.mubr.msk.f32.vlgmr.msra.gmra.mxu1 %vm2360_vm8, %v2838_v63 }
 0x390   :  { %v2437_v13 = vpop.f32.mrf.mxu1 }
 0x391   :  { %v2519_v15 = vsub.f32 %v2174_v48, %v2437_v13 }
 0x392   :  { %v2439_v14 = vpop.f32.mrf.mxu1 }
 0x393   :  { %v2520_v17 = vsub.f32 %v2176_v50, %v2439_v14 }
 0x3a8   :  { %v2514_v16 = vpop.f32.mrf.mxu1 }
 0x3a9   :  { %v2521_v19 = vmul.f32 %v2519_v15, %v2514_v16 }
 0x3aa   :  { %v2516_v21 = vpop.f32.mrf.mxu1 }
 0x3ab   :  { %v2523_v22 = vmax.f32 %v2521_v19, 0.0  ;;  %v2522_v23 = vmul.f32 %v2520_v17, %v2516_v21 }
 0x3ad   :  { %2525 = vst [vmem:[%s4271_s2] sm:$0xff] %v2523_v22  ;;  %v2524_v26 = vmax.f32 %v2522_v23, 0.0 }
 0x3af   :  { %2526 = vst [vmem:[%s4271_s2 + $0x8] sm:$0xff] %v2524_v26 }

</bundles_post_ra>
